<compile_context>
chip_gen: v5e
topology: v5e:2x2
jax: 0.10.0
libtpu: 0.0.40
codegen_flags: <defaults>
</compile_context>

<pallas_src>
import math

import numpy as np

import jax
import jax.numpy as jnp
from jax.experimental import pallas as pl
from jax.experimental.pallas import tpu as pltpu


def _round_up(x: int, m: int) -> int:
    return ((x + m - 1) // m) * m


def _cdiv(a: int, b: int) -> int:
    return -(-a // b)


def _tile_bytes_budget() -> int:
    """Per-output-tile byte budget, conservative across v5e / v6e / v7x.

    ~2 MiB keeps (2 double-buffered output tiles + elementwise temporaries)
    comfortably under v5e's 16 MiB scoped-VMEM default and v7x's 64 MiB
    physical VMEM, while 512-row tiles (at 128 lanes) already sit in the
    ~85%-of-HBM-roofline regime, so larger tiles buy nothing.
    """
    budget = 2 << 20
    try:
        cap = int(pltpu.get_tpu_info().vmem_capacity_bytes)
        budget = max(256 * 1024, min(budget, cap // 16))
    except Exception:
        # Hardware-info query unavailable (e.g. interpret mode): keep default.
        pass
    return budget


def _lane_constants(d_model: int, lanes: int, steps_per_row: int) -> np.ndarray:
    """Precompute the per-lane slope/base rows (compile-time, numpy).

    Flat-slab element (flat_row, col) corresponds to
        time step t = flat_row * steps_per_row + col // d_model
        feature   j = col % d_model
    and its value is sin(t * inv_freq(j) + phase(j)) with
        inv_freq(j) = exp(-2*(j//2)*ln(10000)/d_model)
        phase(j)    = (j % 2) * pi/2           (cos(x) = sin(x + pi/2))
    which factors per lane into   arg = flat_row * slope(col) + base(col).
    """
    col = np.arange(lanes, dtype=np.int64)
    j = col % d_model
    inv_freq = np.exp((2 * (j // 2)).astype(np.float64)
                      * (-math.log(10000.0) / d_model))
    phase = (j % 2).astype(np.float64) * (math.pi / 2.0)
    t_in_row = (col // d_model).astype(np.float64)

    slope = float(steps_per_row) * inv_freq              # dArg / dFlatRow
    base = t_in_row * inv_freq + phase                   # arg at flat_row == 0

    # Pad to 8 sublanes so the constant block is a native (8, lanes) tile.
    const = np.zeros((8, lanes), dtype=np.float32)
    const[0, :] = slope.astype(np.float32)
    const[1, :] = base.astype(np.float32)
    return const


def _pe_fill_kernel(const_ref, o_ref):
    """Fill one (tile_r, lanes) slab of the flat PE table.

    const_ref: (8, lanes) f32 — row 0: slope(col), row 1: base(col).
    o_ref[r, c] = sin((tile_row0 + r) * slope(c) + base(c))
    """
    tile_r = o_ref.shape[0]
    row0 = (pl.program_id(0) * tile_r).astype(jnp.float32)

    slope = const_ref[0:1, :]                                   # (1, lanes)
    base = const_ref[1:2, :]                                    # (1, lanes)
    r = jax.lax.broadcasted_iota(jnp.int32, (tile_r, 1), 0)     # (R, 1)
    flat_row = r.astype(jnp.float32) + row0

    o_ref[...] = jnp.sin(flat_row * slope + base)


def build_pe_table(max_len: int, d_model: int) -> jax.Array:
    """Compute pe2d[max_len, d_model] (float32) on TPU via Pallas."""
    assert d_model % 2 == 0, "d_model must be even (as in the PyTorch module)"
    assert max_len >= 1

    # Lane-dense flat width: smallest multiple of 128 that d_model divides.
    lanes = 128 * d_model // math.gcd(128, d_model)
    steps_per_row = lanes // d_model
    rows_needed = _cdiv(max_len, steps_per_row)

    # --- VMEM-budget-driven tiling with minimal row padding ----------------
    bytes_per_row = lanes * 4
    target_rows = max(8, (_tile_bytes_budget() // bytes_per_row) // 8 * 8)
    num_tiles = max(1, _cdiv(rows_needed, target_rows))
    tile_r = _round_up(_cdiv(rows_needed, num_tiles), 8)
    rows = num_tiles * tile_r            # padding <= ~7 rows per tile

    const = jnp.asarray(_lane_constants(d_model, lanes, steps_per_row))

    flat = pl.pallas_call(
        _pe_fill_kernel,
        out_shape=jax.ShapeDtypeStruct((rows, lanes), jnp.float32),
        grid=(num_tiles,),
        in_specs=[pl.BlockSpec((8, lanes), lambda i: (0, 0))],
        out_specs=pl.BlockSpec((tile_r, lanes), lambda i: (i, 0)),
        compiler_params=pltpu.CompilerParams(
            dimension_semantics=(pltpu.PARALLEL,)),
    )(const)

    # Zero-cost reshape back to (time, feature); drop padded tail rows.
    return flat.reshape(rows * steps_per_row, d_model)[:max_len]


class PositionEmbeddingSine1D:
    """JAX/Pallas port of the PyTorch module."""

    def __init__(self, d_model: int, max_len: int = 500):
        pe2d = build_pe_table(max_len, d_model)
        # Buffer layout identical to PyTorch: (max_len, 1, d_model).
        self.pe = pe2d[:, None, :]

    def __call__(self, x: jax.Array, batch_first: bool = False) -> jax.Array:
        # forward() is a pure slice/transpose — no kernel needed.
        if batch_first:
            return jnp.transpose(self.pe, (1, 0, 2))[:, : x.shape[1], :]
        return self.pe[: x.shape[0], :]


def _reference_pe(max_len: int, d_model: int) -> np.ndarray:
    pe = np.zeros((max_len, d_model), dtype=np.float32)
    position = np.arange(0, max_len, dtype=np.float32)[:, None]
    div_term = np.exp(np.arange(0, d_model, 2).astype(np.float32)
                      * (-np.log(10000.0) / d_model))
    pe[:, 0::2] = np.sin(position * div_term)
    pe[:, 1::2] = np.cos(position * div_term)
    return pe[:, None, :]  # (max_len, 1, d_model)


if __name__ == "__main__":
    d_model = 32
    max_len = 500          # module default; exercises the row-padding path
    batch, seq = 2, 8

    key = jax.random.PRNGKey(0)
    # batch_first=False convention: x is (seq, batch, d_model)
    x_sb = jax.random.normal(key, (seq, batch, d_model), dtype=jnp.float32)
    # batch_first=True convention: x is (batch, seq, d_model)
    x_bs = jnp.transpose(x_sb, (1, 0, 2))

    module = PositionEmbeddingSine1D(d_model, max_len=max_len)
    jax.block_until_ready(module.pe)

    pos_sb = jax.block_until_ready(module(x_sb, batch_first=False))
    pos_bs = jax.block_until_ready(module(x_bs, batch_first=True))

    ref = _reference_pe(max_len, d_model)
    # Full buffer check + forward-slice checks.
    np.testing.assert_allclose(np.asarray(module.pe), ref, rtol=1e-5, atol=1e-4)
    np.testing.assert_allclose(np.asarray(pos_sb), ref[:seq], rtol=1e-5, atol=1e-4)
    np.testing.assert_allclose(np.asarray(pos_bs),
                               np.transpose(ref, (1, 0, 2))[:, :seq, :],
                               rtol=1e-5, atol=1e-4)
    assert module.pe.shape == (max_len, 1, d_model)
    assert pos_sb.shape == (seq, 1, d_model)
    assert pos_bs.shape == (1, seq, d_model)

    print("KERNEL_OK")
</pallas_src>

<mosaic_0001>
module attributes {stable_mosaic.version = 11 : i64} {
  func.func @_pe_fill_kernel(%arg0: i32, %arg1: memref<8x128xf32, #tpu.memory_space<vmem>>, %arg2: memref<128x128xf32, #tpu.memory_space<vmem>>) attributes {dimension_semantics = [#tpu.dimension_semantics<parallel>], iteration_bounds = array<i64: 1>, scalar_prefetch = 0 : i64, scratch_operands = 0 : i64, tpu.core_type = #tpu.core_type<tc>, window_params = [{pipeline_mode = #tpu.pipeline_mode<synchronous>, transform_indices = @transform_0, window_bounds = array<i64: 8, 128>}, {transform_indices = @transform_1, window_bounds = array<i64: 128, 128>}]} {
    %c128_i32 = arith.constant 128 : i32
    %0 = arith.muli %arg0, %c128_i32 : i32
    %1 = arith.sitofp %0 : i32 to f32
    %c0 = arith.constant 0 : index
    %c0_0 = arith.constant 0 : index
    %2 = vector.load %arg1[%c0, %c0_0] : memref<8x128xf32, #tpu.memory_space<vmem>>, vector<1x128xf32>
    %c1 = arith.constant 1 : index
    %c0_1 = arith.constant 0 : index
    %3 = vector.load %arg1[%c1, %c0_1] : memref<8x128xf32, #tpu.memory_space<vmem>>, vector<1x128xf32>
    %4 = tpu.iota {dimensions = array<i32: 0>} : vector<128x1xi32>
    %5 = arith.sitofp %4 : vector<128x1xi32> to vector<128x1xf32>
    %6 = vector.broadcast %1 : f32 to vector<128x1xf32>
    %7 = arith.addf %5, %6 : vector<128x1xf32>
    %8 = vector.broadcast %7 : vector<128x1xf32> to vector<128x128xf32>
    %9 = vector.broadcast %2 : vector<1x128xf32> to vector<128x128xf32>
    %10 = arith.mulf %8, %9 : vector<128x128xf32>
    %11 = vector.broadcast %3 : vector<1x128xf32> to vector<128x128xf32>
    %12 = arith.addf %10, %11 : vector<128x128xf32>
    %13 = math.sin %12 : vector<128x128xf32>
    %c0_2 = arith.constant 0 : index
    %c0_3 = arith.constant 0 : index
    %14 = vector.load %arg2[%c0_2, %c0_3] : memref<128x128xf32, #tpu.memory_space<vmem>>, vector<128x128xf32>
    tpu.vector_store %arg2[%c0_2, %c0_3], %13 {strides = array<i32>} : memref<128x128xf32, #tpu.memory_space<vmem>>, vector<128x128xf32>,
    return
  }
  func.func @transform_0(%arg0: i32) -> (i32, i32) {
    %c0_i32 = arith.constant 0 : i32
    %c0_i32_0 = arith.constant 0 : i32
    %c0_i32_1 = arith.constant 0 : i32
    return %c0_i32, %c0_i32_0 : i32, i32
  }
  func.func @transform_1(%arg0: i32) -> (i32, i32) {
    %c0_i32 = arith.constant 0 : i32
    %c0_i32_0 = arith.constant 0 : i32
    return %arg0, %c0_i32 : i32, i32
  }
}

</mosaic_0001>

<bundles_post_ra>
// kernel: tpu_custom_call.1
= control target key start
LH: loop header
LB: loop body
LE: loop exit
PB: predicated region body
PF: predicated region fallthrough
CT: control target
= control target key end

     0   :  { %6 = vsyncpa [#allocation3], 0  ;;  %s4525_s0 = inlined_call_operand.hbm [shape: f32[8,128], index: 0, kind: input, shape index: {}]   ;;  %s4526_s1 = inlined_call_operand.hbm [shape: f32[128,128], index: 1, kind: output, shape index: {}]  }
   0x1   :  { %7 = vsyncpa [#allocation4], 0  ;;  %s13_s8 = sshll.u32 %s4525_s0, 4  ;;  %s2739_s9 = smov [#allocation2]   ;;  %s14_s8 = int_to_ptr.hbm [resolvable:$true] %s13_s8 }
   0x2   :  { %s15_s10 = sshll.u32 %s2739_s9, 4  ;;  %s16_s10 = int_to_ptr.vmem [resolvable:$true] %s15_s10 }
   0x3   :  { %18 = dma.hbm_to_vmem [thread:$0]  %s14_s8, 128, %s16_s10, [#allocation3]  }
   0x4   :  { %2735 = dma.done.wait [#allocation3], 128  }
   0x5   :  { %2736 = vsyncadd [#allocation3], 4294967168  ;;  %v27_v0 = vlaneseq  ;;  %v2685_v22 = vld [vmem:[#allocation2] ss:$0 sm:$0xff]  ;;  %v2686_v35 = vld [vmem:[#allocation2 + $0x1] ss:$0 sm:$0xff] }
   0x6   :  { %s2747_s0 = smov [#allocation5]   ;;  %s2613_s14 = sshll.u32 %s4526_s1, 4  ;;  %s2614_s14 = int_to_ptr.hbm [resolvable:$true] %s2613_s14 }
   0x7   :  { %v28_v1 = vshrl.u32 %v27_v0, 7  ;;  %s2611_s11 = sshll.u32 %s2747_s0, 4  ;;  %s2748_s15 = smov 128   ;;  %s2612_s11 = int_to_ptr.vmem [resolvable:$true] %s2611_s11 }
   0x8   :  { %s2749_s16 = smov 8  }
   0x9   :  { %v29_v2 = vadd.s32 8, %v28_v1  ;;  %v30_v3 = vadd.s32 16, %v28_v1  ;;  %v31_v4 = vadd.s32 24, %v28_v1  ;;  %v32_v5 = vadd.s32 32, %v28_v1 }
   0xa   :  { %v33_v6 = vadd.s32 40, %v28_v1  ;;  %v34_v7 = vadd.s32 48, %v28_v1  ;;  %v35_v8 = vadd.s32 56, %v28_v1  ;;  %v36_v9 = vadd.s32 64, %v28_v1 }
   0xb   :  { %v37_v10 = vadd.s32 72, %v28_v1  ;;  %v38_v11 = vadd.s32 80, %v28_v1  ;;  %v39_v12 = vadd.s32 88, %v28_v1  ;;  %v40_v13 = vadd.s32 96, %v28_v1 }
   0xc   :  { %v41_v14 = vadd.s32 104, %v28_v1  ;;  %v42_v15 = vadd.s32 112, %v28_v1  ;;  %v44_v16 = vcvt.s32.f32 %v28_v1  ;;  %v45_v17 = vcvt.s32.f32 %v29_v2 }
   0xd   :  { %v43_v18 = vadd.s32 120, %v28_v1  ;;  %v46_v19 = vcvt.s32.f32 %v30_v3  ;;  %v47_v20 = vcvt.s32.f32 %v31_v4  ;;  %v48_v21 = vcvt.s32.f32 %v32_v5 }
   0xe   :  { %v49_v23 = vcvt.s32.f32 %v33_v6  ;;  %v50_v24 = vcvt.s32.f32 %v34_v7  ;;  %v51_v25 = vcvt.s32.f32 %v35_v8  ;;  %v52_v26 = vcvt.s32.f32 %v36_v9 }
   0xf   :  { %v53_v27 = vcvt.s32.f32 %v37_v10  ;;  %v54_v28 = vcvt.s32.f32 %v38_v11  ;;  %v55_v29 = vcvt.s32.f32 %v39_v12  ;;  %v56_v30 = vcvt.s32.f32 %v40_v13 }
  0x10   :  { %v57_v31 = vcvt.s32.f32 %v41_v14  ;;  %v58_v32 = vcvt.s32.f32 %v42_v15  ;;  %v59_v33 = vcvt.s32.f32 %v43_v18  ;;  %v78_v34 = vmul.f32 %v2685_v22, %v44_v16 }
  0x11   :  { %v79_v36 = vmul.f32 %v2685_v22, %v45_v17  ;;  %v80_v37 = vmul.f32 %v2685_v22, %v46_v19  ;;  %v81_v38 = vmul.f32 %v2685_v22, %v47_v20  ;;  %v82_v39 = vmul.f32 %v2685_v22, %v48_v21 }
  0x12   :  { %v83_v40 = vmul.f32 %v2685_v22, %v49_v23  ;;  %v84_v41 = vmul.f32 %v2685_v22, %v50_v24  ;;  %v85_v42 = vmul.f32 %v2685_v22, %v51_v25  ;;  %v86_v43 = vmul.f32 %v2685_v22, %v52_v26 }
  0x13   :  { %v87_v44 = vmul.f32 %v2685_v22, %v53_v27  ;;  %v88_v45 = vmul.f32 %v2685_v22, %v54_v28  ;;  %v89_v46 = vmul.f32 %v2685_v22, %v55_v29  ;;  %v90_v47 = vmul.f32 %v2685_v22, %v56_v30 }
  0x14   :  { %v91_v48 = vmul.f32 %v2685_v22, %v57_v31  ;;  %v92_v49 = vmul.f32 %v2685_v22, %v58_v32  ;;  %v93_v50 = vmul.f32 %v2685_v22, %v59_v33  ;;  %v2763_v51 = vadd.f32 %v2686_v35, %v78_v34 }
  0x15   :  { %v2765_v52 = vadd.f32 %v2686_v35, %v79_v36  ;;  %v2767_v53 = vadd.f32 %v2686_v35, %v80_v37  ;;  %v2769_v54 = vadd.f32 %v2686_v35, %v81_v38  ;;  %v2771_v55 = vadd.f32 %v2686_v35, %v82_v39 }
  0x16   :  { %v2773_v56 = vadd.f32 %v2686_v35, %v83_v40  ;;  %v2775_v57 = vadd.f32 %v2686_v35, %v84_v41  ;;  %v2777_v58 = vadd.f32 %v2686_v35, %v85_v42  ;;  %v2779_v59 = vadd.f32 %v2686_v35, %v86_v43 }
  0x17   :  { %v2781_v60 = vadd.f32 %v2686_v35, %v87_v44  ;;  %v2783_v61 = vadd.f32 %v2686_v35, %v88_v45  ;;  %v2785_v62 = vadd.f32 %v2686_v35, %v89_v46  ;;  %v2787_v63 = vadd.f32 %v2686_v35, %v90_v47 }
  0x18   :  { %v2789_v0 = vadd.f32 %v2686_v35, %v91_v48  ;;  %v2791_v1 = vadd.f32 %v2686_v35, %v92_v49  ;;  %v2793_v2 = vadd.f32 %v2686_v35, %v93_v50  ;;  %v111_v3 = vand.u32 2147483647, %v2763_v51 }
  0x19   :  { %v114_v4 = vand.u32 2139095040, %v2763_v51  ;;  %v266_v5 = vand.u32 2147483647, %v2765_v52  ;;  %v269_v7 = vand.u32 2139095040, %v2765_v52  ;;  %v424_v8 = vand.u32 2139095040, %v2767_v53 }
  0x1a   :  { %v118_v6 = vand.u32 8388607, %v111_v3  ;;  %v2740_v29 = vmov 683565275   ;;  %v2741_v31 = vmov 2475754826  }
  0x1b   :  { %v115_v9 = vshrl.u32 %v114_v4, 23  ;;  %v273_v10 = vand.u32 8388607, %v266_v5  ;;  %v270_v12 = vshrl.u32 %v269_v7, 23  ;;  %v425_v15 = vshrl.u32 %v424_v8, 23 }
  0x1c   :  { %v119_v11 = vor.u32 8388608, %v118_v6  ;;  %v2742_v33 = vmov 2131351028   ;;  %v2743_v35 = vmov 2102212464  }
  0x1d   :  { %v2626_v13 = vadd.s32 4294967169, %v115_v9  ;;  %v2629_v14 = vadd.s32 4294967169, %v270_v12  ;;  %v274_v17 = vor.u32 8388608, %v273_v10  ;;  %v2632_v21 = vadd.s32 4294967169, %v425_v15 }
  0x1e   :  { %v2804_v18 = vshll.u32 %v119_v11, 8  ;;  %v2744_v37 = vmov 920167782   ;;  %v2745_v46 = vmov 1326507024  }
  0x1f   :  { %v121_v16 = vadd.s32 1, %v2626_v13  ;;  %v276_v19 = vadd.s32 1, %v2629_v14  ;;  %v2806_v24 = vshll.u32 %v274_v17, 8  ;;  %v2819_v40 = vadd.s32 1, %v2632_v21 }
  0x20   :  { %v160_v26 = vand.u32 65535, %v2804_v18  ;;  %v161_v39 = vshrl.u32 %v2804_v18, 16 }
  0x21   :  { %vm122_vm0 = vcmp.gt.s32.totalorder %v121_v16, 0  ;;  %vm277_vm1 = vcmp.gt.s32.totalorder %v276_v19, 0  ;;  %v2825_v44 = vand.u32 65535, %v2806_v24  ;;  %vm432_vm14 = vcmp.gt.s32.totalorder %v2819_v40, 0 }
  0x22   :  { %v123_v20 = vsel %vm122_vm0, %v121_v16, 0  ;;  %v278_v23 = vsel %vm277_vm1, %v276_v19, 0 }
  0x23   :  { %v125_v22 = vand.u32 31, %v123_v20  ;;  %v2808_v25 = vshrl.u32 %v123_v20, 5  ;;  %v2811_v27 = vand.u32 31, %v278_v23  ;;  %v2841_v11 = vshrl.u32 %v278_v23, 5 }
  0x25   :  { %v126_v28 = vsub.s32 32, %v125_v22  ;;  %v128_v30 = vshll.u32 %v2740_v29, %v125_v22  ;;  %v131_v32 = vshll.u32 %v2741_v31, %v125_v22  ;;  %v134_v34 = vshll.u32 %v2742_v33, %v125_v22 }
  0x26   :  { %v137_v36 = vshll.u32 %v2743_v35, %v125_v22  ;;  %v140_v38 = vshll.u32 %v2744_v37, %v125_v22  ;;  %vm143_vm2 = vcmp.lt.s32.totalorder %v2808_v25, 1  ;;  %vm146_vm3 = vcmp.lt.s32.totalorder %v2808_v25, 4 }
  0x27   :  { %v129_v41 = vshrl.u32 %v2741_v31, %v126_v28  ;;  %v132_v42 = vshrl.u32 %v2742_v33, %v126_v28  ;;  %v135_v43 = vshrl.u32 %v2743_v35, %v126_v28  ;;  %v138_v45 = vshrl.u32 %v2744_v37, %v126_v28 }
  0x28   :  { %v141_v47 = vshrl.u32 %v2745_v46, %v126_v28  ;;  %v2832_v4 = vsub.s32 32, %v2811_v27  ;;  %v127_v6 = vshrl.u32 %v2740_v29, %v126_v28  ;;  %vm145_vm4 = vcmp.lt.s32.totalorder %v2808_v25, 3 }
  0x29   :  { %v130_v48 = vor.u32 %v129_v41, %v128_v30  ;;  %v133_v49 = vor.u32 %v132_v42, %v131_v32  ;;  %v136_v50 = vor.u32 %v135_v43, %v134_v34  ;;  %v139_v7 = vor.u32 %v138_v45, %v137_v36 }
  0x2a   :  { %v142_v8 = vor.u32 %v141_v47, %v140_v38  ;;  %vm144_vm5 = vcmp.lt.s32.totalorder %v2808_v25, 2  ;;  %v283_v14 = vshll.u32 %v2740_v29, %v2811_v27  ;;  %v286_v15 = vshll.u32 %v2741_v31, %v2811_v27 }
  0x2b   :  { %v151_v9 = vsel %vm143_vm2, %v130_v48, %v133_v49  ;;  %v155_v10 = vsel %vm143_vm2, %v133_v49, %v136_v50  ;;  %v152_v12 = vsel %vm146_vm3, %v139_v7, 920167782  ;;  %v148_v16 = vsel %vm146_vm3, %v136_v50, 2102212464 }
  0x2c   :  { %v156_v13 = vsel %vm146_vm3, %v142_v8, 1326507024  ;;  %v153_v17 = vsel %vm145_vm4, %v136_v50, %v152_v12  ;;  %v284_v20 = vshrl.u32 %v2741_v31, %v2832_v4  ;;  %v147_v21 = vsel %vm143_vm2, %v127_v6, %v130_v48 }
  0x2d   :  { %v157_v19 = vsel %vm145_vm4, %v139_v7, %v156_v13  ;;  %v154_v22 = vsel %vm144_vm5, %v151_v9, %v153_v17  ;;  %v287_v28 = vshrl.u32 %v2742_v33, %v2832_v4  ;;  %v149_v38 = vsel %vm145_vm4, %v133_v49, %v148_v16 }
  0x2e   :  { %v158_v23 = vsel %vm144_vm5, %v155_v10, %v157_v19  ;;  %v184_v34 = vand.u32 65535, %v154_v22  ;;  %v185_v36 = vshrl.u32 %v154_v22, 16  ;;  %v2869_v41 = vor.u32 %v284_v20, %v283_v14 }
  0x2f   :  { %v162_v30 = vand.u32 65535, %v158_v23  ;;  %v163_v32 = vshrl.u32 %v158_v23, 16  ;;  %v2871_v42 = vor.u32 %v287_v28, %v286_v15  ;;  %v289_v43 = vshll.u32 %v2742_v33, %v2811_v27 }
  0x30   :  { %v290_v50 = vshrl.u32 %v2743_v35, %v2832_v4  ;;  %v186_v7 = vmul.u32 %v184_v34, %v160_v26  ;;  %v187_v8 = vmul.u32 %v185_v36, %v160_v26  ;;  %v188_v9 = vmul.u32 %v184_v34, %v161_v39 }
  0x31   :  { %v164_v45 = vmul.u32 %v162_v30, %v160_v26  ;;  %v165_v47 = vmul.u32 %v163_v32, %v160_v26  ;;  %v166_v48 = vmul.u32 %v162_v30, %v161_v39  ;;  %v167_v6 = vmul.u32 %v163_v32, %v161_v39 }
  0x32   :  { %v189_v13 = vmul.u32 %v185_v36, %v161_v39  ;;  %v190_v15 = vshll.u32 %v187_v8, 16  ;;  %v191_v16 = vshrl.u32 %v187_v8, 16  ;;  %v192_v17 = vshll.u32 %v188_v9, 16 }
  0x33   :  { %v168_v10 = vshll.u32 %v165_v47, 16  ;;  %v169_v12 = vshrl.u32 %v165_v47, 16  ;;  %v170_v49 = vshll.u32 %v166_v48, 16  ;;  %v171_v14 = vshrl.u32 %v166_v48, 16 }
  0x34   :  { %v193_v20 = vshrl.u32 %v188_v9, 16  ;;  %v292_v22 = vshll.u32 %v2743_v35, %v2811_v27  ;;  %v2746_v23 = vmov 0   ;;  %vm194_vm7 = vc.u32 %v186_v7, %v190_v15 }
  0x35   :  { %vm172_vm6 = vc.u32 %v164_v45, %v168_v10  ;;  %v174_v19 = vadd.s32 %v168_v10, %v164_v45  ;;  %v196_v26 = vadd.s32 %v190_v15, %v186_v7  ;;  %v293_v30 = vshrl.u32 %v2744_v37, %v2832_v4 }
  0x36   :  { %v173_v28 = vsel %vm172_vm6, 1, %v2746_v23  ;;  %v195_v39 = vsel %vm194_vm7, 1, %v2746_v23  ;;  %v295_v34 = vshll.u32 %v2744_v37, %v2811_v27  ;;  %v291_v47 = vor.u32 %v290_v50, %v289_v43 }
  0x37   :  { %v175_v32 = vadd.s32 %v173_v28, %v167_v6  ;;  %vm176_vm8 = vc.u32 %v174_v19, %v170_v49  ;;  %v197_v45 = vadd.s32 %v195_v39, %v189_v13  ;;  %vm198_vm9 = vc.u32 %v196_v26, %v192_v17 }
  0x38   :  { %v177_v36 = vsel %vm176_vm8, 1, %v2746_v23  ;;  %v199_v8 = vsel %vm198_vm9, 1, %v2746_v23  ;;  %v294_v9 = vor.u32 %v293_v30, %v292_v22  ;;  %v296_v7 = vshrl.u32 %v2745_v46, %v2832_v4 }
  0x39   :  { %v179_v48 = vadd.s32 %v177_v36, %v175_v32  ;;  %v2889_v10 = vadd.s32 %v196_v26, %v192_v17  ;;  %v201_v6 = vadd.s32 %v199_v8, %v197_v45  ;;  %vm298_vm10 = vcmp.lt.s32.totalorder %v2841_v11, 1 }
  0x3a   :  { %vm300_vm11 = vcmp.lt.s32.totalorder %v2841_v11, 3  ;;  %v297_v49 = vor.u32 %v296_v7, %v295_v34  ;;  %vm299_vm12 = vcmp.lt.s32.totalorder %v2841_v11, 2  ;;  %vm301_vm13 = vcmp.lt.s32.totalorder %v2841_v11, 4 }
  0x3b   :  { %v180_v27 = vadd.s32 %v179_v48, %v169_v12  ;;  %v150_v43 = vsel %vm144_vm5, %v147_v21, %v149_v38  ;;  %v202_v50 = vadd.s32 %v201_v6, %v191_v16  ;;  %v306_v13 = vsel %vm298_vm10, %v2869_v41, %v2871_v42 }
  0x3c   :  { %v307_v15 = vsel %vm301_vm13, %v294_v9, 920167782  ;;  %v310_v19 = vsel %vm298_vm10, %v2871_v42, %v291_v47  ;;  %v316_v25 = vshrl.u32 %v2806_v24, 16  ;;  %v311_v16 = vsel %vm301_vm13, %v297_v49, 1326507024 }
  0x3d   :  { %v2903_v17 = vadd.s32 %v180_v27, %v171_v14  ;;  %v308_v12 = vsel %vm300_vm11, %v291_v47, %v307_v15  ;;  %v203_v21 = vadd.s32 %v202_v50, %v193_v20  ;;  %v204_v14 = vmul.u32 %v2804_v18, %v150_v43 }
  0x3e   :  { %v309_v38 = vsel %vm299_vm12, %v306_v13, %v308_v12  ;;  %v312_v22 = vsel %vm300_vm11, %v294_v9, %v311_v16  ;;  %v282_v20 = vshrl.u32 %v2740_v29, %v2832_v4  ;;  %v433_v36 = vsel %vm432_vm14, %v2819_v40, 0 }
  0x3f   :  { %vm206_vm15 = vc.u32 %v2903_v17, %v2889_v10  ;;  %v339_v28 = vand.u32 65535, %v309_v38  ;;  %v207_v26 = vadd.s32 1, %v203_v21  ;;  %v313_v30 = vsel %vm299_vm12, %v310_v19, %v312_v22 }
  0x40   :  { %v340_v32 = vshrl.u32 %v309_v38, 16  ;;  %v317_v39 = vand.u32 65535, %v313_v30  ;;  %v318_v34 = vshrl.u32 %v313_v30, 16  ;;  %v303_v45 = vsel %vm301_vm13, %v291_v47, 2102212464 }
  0x41   :  { %v208_v18 = vsel %vm206_vm15, %v207_v26, %v203_v21  ;;  %v343_v8 = vmul.u32 %v339_v28, %v316_v25  ;;  %v341_v6 = vmul.u32 %v339_v28, %v2825_v44  ;;  %v302_v27 = vsel %vm298_vm10, %v282_v20, %v2869_v41 }
  0x42   :  { %v342_v48 = vmul.u32 %v340_v32, %v2825_v44  ;;  %v209_v9 = vadd.s32 %v208_v18, %v204_v14  ;;  %v319_v7 = vmul.u32 %v317_v39, %v2825_v44  ;;  %v320_v4 = vmul.u32 %v318_v34, %v2825_v44 }
  0x43   :  { %v321_v49 = vmul.u32 %v317_v39, %v316_v25  ;;  %v4527_v43 = vand.u32 2147483647, %v2767_v53  ;;  %v304_v47 = vsel %vm300_vm11, %v2871_v42, %v303_v45  ;;  %v322_v13 = vmul.u32 %v318_v34, %v316_v25 }
  0x44   :  { %v345_v40 = vshll.u32 %v342_v48, 16  ;;  %v210_v50 = vadd.s32 536870912, %v209_v9  ;;  %v323_v15 = vshll.u32 %v320_v4, 16  ;;  %v344_v19 = vmul.u32 %v340_v32, %v316_v25 }
  0x45   :  { %v325_v12 = vshll.u32 %v321_v49, 16  ;;  %v347_v21 = vshll.u32 %v343_v8, 16  ;;  %v435_v38 = vand.u32 31, %v433_v36  ;;  %v305_v41 = vsel %vm299_vm12, %v302_v27, %v304_v47 }
  0x46   :  { %v211_v44 = vshrl.u32 %v210_v50, 30  ;;  %vm327_vm0 = vc.u32 %v319_v7, %v323_v15  ;;  %v329_v16 = vadd.s32 %v323_v15, %v319_v7  ;;  %vm349_vm1 = vc.u32 %v341_v6, %v345_v40 }
  0x47   :  { %v328_v14 = vsel %vm327_vm0, 1, %v2746_v23  ;;  %v350_v22 = vsel %vm349_vm1, 1, %v2746_v23  ;;  %v351_v28 = vadd.s32 %v345_v40, %v341_v6  ;;  %v324_v42 = vshrl.u32 %v320_v4, 16 }
  0x48   :  { %v212_v26 = vshll.u32 %v211_v44, 30  ;;  %v330_v20 = vadd.s32 %v328_v14, %v322_v13  ;;  %vm331_vm2 = vc.u32 %v329_v16, %v325_v12  ;;  %v346_v30 = vshrl.u32 %v342_v48, 16 }
  0x49   :  { %v332_v25 = vsel %vm331_vm2, 1, %v2746_v23  ;;  %v352_v32 = vadd.s32 %v350_v22, %v344_v19  ;;  %vm353_vm3 = vc.u32 %v351_v28, %v347_v21  ;;  %v326_v34 = vshrl.u32 %v321_v49, 16 }
  0x4a   :  { %v213_v39 = vsub.s32 %v209_v9, %v212_v26  ;;  %v334_v18 = vadd.s32 %v332_v25, %v330_v20  ;;  %v354_v11 = vsel %vm353_vm3, 1, %v2746_v23  ;;  %v235_v45 = vsub.s32 4, %v211_v44 }
  0x4b   :  { %v348_v7 = vshrl.u32 %v343_v8, 16  ;;  %v356_v27 = vadd.s32 %v354_v11, %v352_v32  ;;  %v2945_v50 = vsub.s32 32, %v435_v38  ;;  %v2947_v40 = vadd.s32 %v351_v28, %v347_v21 }
  0x4c   :  { %vm214_vm4 = vcmp.lt.s32.totalorder %v213_v39, 0  ;;  %v215_v6 = vsub.s32 0, %v213_v39  ;;  %v335_v4 = vadd.s32 %v334_v18, %v324_v42  ;;  %vm2951_vm5 = vcmp.le.f32.partialorder %v111_v3, 0.7853982 }
  0x4d   :  { %vm113_vm6 = vcmp.lt.s32.totalorder %v2763_v51, 0  ;;  %v357_v9 = vadd.s32 %v356_v27, %v346_v30  ;;  %v428_v8 = vand.u32 8388607, %v4527_v43  ;;  %v2960_v13 = vshrl.u32 %v433_v36, 5 }
  0x4e   :  { %v216_v49 = vsel %vm214_vm4, %v215_v6, %v213_v39  ;;  %v2956_v47 = vadd.s32 %v335_v4, %v326_v34  ;;  %v205_v15 = vadd.s32 %v2889_v10, %v2903_v17  ;;  %v359_v3 = vmul.u32 %v2806_v24, %v305_v41 }
  0x4f   :  { %v217_v12 = vclz %v216_v49  ;;  %v358_v19 = vadd.s32 %v357_v9, %v348_v7  ;;  %v236_v21 = vsel %vm113_vm6, %v235_v45, %v211_v44  ;;  %v438_v16 = vshll.u32 %v2740_v29, %v435_v38 }
  0x50   :  { %vm361_vm7 = vc.u32 %v2956_v47, %v2947_v40  ;;  %v439_v14 = vshrl.u32 %v2741_v31, %v2945_v50  ;;  %v447_v28 = vshll.u32 %v2743_v35, %v435_v38  ;;  %v448_v10 = vshrl.u32 %v2744_v37, %v2945_v50 }
  0x51   :  { %v2627_v36 = vadd.s32 4294967294, %v217_v12  ;;  %v362_v22 = vadd.s32 1, %v358_v19  ;;  %v441_v24 = vshll.u32 %v2741_v31, %v435_v38  ;;  %v442_v17 = vshrl.u32 %v2742_v33, %v2945_v50 }
  0x52   :  { %v444_v44 = vshll.u32 %v2742_v33, %v435_v38  ;;  %v445_v41 = vshrl.u32 %v2743_v35, %v2945_v50  ;;  %v450_v42 = vshll.u32 %v2744_v37, %v435_v38  ;;  %v451_v20 = vshrl.u32 %v2745_v46, %v2945_v50 }
  0x53   :  { %vm2628_vm8 = vcmp.lt.s32.totalorder %v2627_v36, 0  ;;  %v363_v26 = vsel %vm361_vm7, %v362_v22, %v358_v19  ;;  %v238_v30 = vsel %vm2951_vm5, 0, %v236_v21  ;;  %v440_v34 = vor.u32 %v439_v14, %v438_v16 }
  0x54   :  { %v220_v25 = vsel %vm2628_vm8, 0, %v2627_v36  ;;  %v364_v32 = vadd.s32 %v363_v26, %v359_v3  ;;  %v449_v7 = vor.u32 %v448_v10, %v447_v28  ;;  %v443_v6 = vor.u32 %v442_v17, %v441_v24 }
  0x55   :  { %v221_v18 = vsub.s32 32, %v220_v25  ;;  %v222_v11 = vshll.u32 %v213_v39, %v220_v25  ;;  %v225_v45 = vsub.s32 4294967266, %v220_v25  ;;  %v446_v4 = vor.u32 %v445_v41, %v444_v44 }
  0x56   :  { %v365_v27 = vadd.s32 536870912, %v364_v32  ;;  %vm456_vm9 = vcmp.lt.s32.totalorder %v2960_v13, 4  ;;  %v452_v49 = vor.u32 %v451_v20, %v450_v42  ;;  %vm453_vm10 = vcmp.lt.s32.totalorder %v2960_v13, 1 }
  0x57   :  { %v223_v9 = vshrl.u32 %v205_v15, %v221_v18  ;;  %v226_v38 = vadd.s32 127, %v225_v45  ;;  %v429_v19 = vor.u32 8388608, %v428_v8  ;;  %vm455_vm11 = vcmp.lt.s32.totalorder %v2960_v13, 3 }
  0x58   :  { %v2988_v12 = vshrl.u32 %v365_v27, 30  ;;  %v462_v39 = vsel %vm456_vm9, %v449_v7, 920167782  ;;  %v255_v16 = vadd.s32 3, %v238_v30  ;;  %vm454_vm12 = vcmp.lt.s32.totalorder %v2960_v13, 2 }
  0x59   :  { %v224_v21 = vor.u32 %v223_v9, %v222_v11  ;;  %v227_v3 = vshll.u32 %v226_v38, 23  ;;  %v461_v15 = vsel %vm453_vm10, %v440_v34, %v443_v6  ;;  %v465_v8 = vsel %vm453_vm10, %v443_v6, %v446_v4 }
  0x5a   :  { %v367_v14 = vshll.u32 %v2988_v12, 30  ;;  %v466_v28 = vsel %vm456_vm9, %v452_v49, 1326507024  ;;  %v463_v24 = vsel %vm455_vm11, %v446_v4, %v462_v39  ;;  %v3007_v44 = vshll.u32 %v429_v19, 8 }
  0x5b   :  { %v228_v36 = vor.u32 4788187, %v227_v3  ;;  %v231_v22 = vcvt.s32.f32 %v224_v21  ;;  %v467_v17 = vsel %vm455_vm11, %v449_v7, %v466_v28  ;;  %v437_v26 = vshrl.u32 %v2740_v29, %v2945_v50 }
  0x5c   :  { %v3001_v10 = vsub.s32 %v364_v32, %v367_v14  ;;  %v458_v42 = vsel %vm456_vm9, %v446_v4, 2102212464  ;;  %v468_v20 = vsel %vm454_vm12, %v465_v8, %v467_v17  ;;  %v470_v30 = vand.u32 65535, %v3007_v44 }
  0x5d   :  { %v229_v41 = vand.u32 2147483647, %v228_v36  ;;  %v471_v32 = vshrl.u32 %v3007_v44, 16  ;;  %v464_v11 = vsel %vm454_vm12, %v461_v15, %v463_v24  ;;  %v472_v45 = vand.u32 65535, %v468_v20 }
  0x5e   :  { %vm369_vm13 = vcmp.lt.s32.totalorder %v3001_v10, 0  ;;  %v370_v25 = vsub.s32 0, %v3001_v10  ;;  %v473_v50 = vshrl.u32 %v468_v20, 16  ;;  %v3021_v7 = vand.u32 3, %v255_v16 }
  0x5f   :  { %v232_v18 = vmul.f32 %v231_v22, %v229_v41  ;;  %v360_v27 = vadd.s32 %v2947_v40, %v2956_v47  ;;  %v474_v49 = vmul.u32 %v472_v45, %v470_v30  ;;  %v457_v21 = vsel %vm453_vm10, %v437_v26, %v440_v34 }
  0x60   :  { %v371_v4 = vsel %vm369_vm13, %v370_v25, %v3001_v10  ;;  %v475_v19 = vmul.u32 %v473_v50, %v470_v30  ;;  %v459_v3 = vsel %vm455_vm11, %v443_v6, %v458_v42  ;;  %v3030_v39 = vmul.u32 %v472_v45, %v471_v32 }
  0x61   :  { %v233_v9 = vxor.u32 2147483648, %v232_v18  ;;  %v372_v38 = vclz %v371_v4  ;;  %v495_v14 = vshrl.u32 %v464_v11, 16  ;;  %vm268_vm14 = vcmp.lt.s32.totalorder %v2765_v52, 0 }
  0x62   :  { %v390_v47 = vsub.s32 4, %v2988_v12  ;;  %v478_v15 = vshll.u32 %v475_v19, 16  ;;  %v477_v34 = vmul.u32 %v473_v50, %v471_v32  ;;  %v480_v6 = vshll.u32 %v3030_v39, 16 }
  0x63   :  { %v234_v16 = vsel %vm113_vm6, %v233_v9, %v232_v18  ;;  %v2630_v40 = vadd.s32 4294967294, %v372_v38  ;;  %v494_v22 = vand.u32 65535, %v464_v11  ;;  %v3046_v28 = vsel %vm454_vm12, %v457_v21, %v459_v3 }
  0x64   :  { %v3039_v36 = vsel %vm2951_vm5, %v2763_v51, %v234_v16  ;;  %vm482_vm0 = vc.u32 %v474_v49, %v478_v15  ;;  %vm3050_vm1 = vcmp.le.f32.partialorder %v266_v5, 0.7853982  ;;  %v484_v41 = vadd.s32 %v478_v15, %v474_v49 }
  0x65   :  { %v239_v8 = vmul.f32 %v3039_v36, %v3039_v36  ;;  %vm2631_vm15 = vcmp.lt.s32.totalorder %v2630_v40, 0  ;;  %v483_v17 = vsel %vm482_vm0, 1, %v2746_v23  ;;  %v497_v26 = vmul.u32 %v495_v14, %v470_v30 }
  0x66   :  { %v375_v48 = vsel %vm2631_vm15, 0, %v2630_v40  ;;  %v485_v11 = vadd.s32 %v483_v17, %v477_v34  ;;  %vm486_vm2 = vc.u32 %v484_v41, %v480_v6  ;;  %v498_v45 = vmul.u32 %v494_v22, %v471_v32 }
  0x67   :  { %v240_v42 = vmul.f32 -0.001358992, %v239_v8  ;;  %v247_v20 = vmul.f32 -0.00019511016, %v239_v8  ;;  %v376_v25 = vsub.s32 32, %v375_v48  ;;  %v377_v18 = vshll.u32 %v3001_v10, %v375_v48 }
  0x68   :  { %v380_v13 = vsub.s32 4294967266, %v375_v48  ;;  %v487_v9 = vsel %vm486_vm2, 1, %v2746_v23  ;;  %vm261_vm3 = vcmp.eq.s32.totalorder %v3021_v7, 2  ;;  %v479_v21 = vshrl.u32 %v475_v19, 16 }
  0x69   :  { %v241_v50 = vadd.f32 0.041655596, %v240_v42  ;;  %v248_v4 = vadd.f32 0.008332121, %v247_v20  ;;  %v378_v5 = vshrl.u32 %v360_v27, %v376_v25  ;;  %v496_v49 = vmul.u32 %v494_v22, %v470_v30 }
  0x6a   :  { %v381_v38 = vadd.s32 127, %v380_v13  ;;  %v500_v3 = vshll.u32 %v497_v26, 16  ;;  %v489_v43 = vadd.s32 %v487_v9, %v485_v11  ;;  %v391_v34 = vsel %vm268_vm14, %v390_v47, %v2988_v12 }
  0x6b   :  { %v242_v16 = vmul.f32 %v241_v50, %v239_v8  ;;  %v249_v40 = vmul.f32 %v248_v4, %v239_v8  ;;  %v379_v15 = vor.u32 %v378_v5, %v377_v18  ;;  %v499_v6 = vmul.u32 %v495_v14, %v471_v32 }
  0x6c   :  { %v382_v10 = vshll.u32 %v381_v38, 23  ;;  %v502_v48 = vshll.u32 %v498_v45, 16  ;;  %vm257_vm4 = vcmp.lt.s32.totalorder %v3021_v7, 2  ;;  %v481_v19 = vshrl.u32 %v3030_v39, 16 }
  0x6d   :  { %v243_v27 = vadd.f32 -0.4999988, %v242_v16  ;;  %v250_v17 = vadd.f32 -0.16666654, %v249_v40  ;;  %v386_v41 = vcvt.s32.f32 %v379_v15  ;;  %v490_v22 = vadd.s32 %v489_v43, %v479_v21 }
  0x6e   :  { %v383_v30 = vor.u32 4788187, %v382_v10  ;;  %vm504_vm5 = vc.u32 %v496_v49, %v500_v3  ;;  %v506_v42 = vadd.s32 %v500_v3, %v496_v49  ;;  %v393_v18 = vsel %vm3050_vm1, 0, %v391_v34 }
  0x6f   :  { %v244_v20 = vmul.f32 %v243_v27, %v239_v8  ;;  %v251_v25 = vmul.f32 %v250_v17, %v239_v8  ;;  %v505_v12 = vsel %vm504_vm5, 1, %v2746_v23  ;;  %v501_v14 = vshrl.u32 %v497_v26, 16 }
  0x70   :  { %v384_v32 = vand.u32 2147483647, %v383_v30  ;;  %v507_v47 = vadd.s32 %v505_v12, %v499_v6  ;;  %vm508_vm6 = vc.u32 %v506_v42, %v502_v48  ;;  %v579_v39 = vand.u32 2139095040, %v2769_v54 }
  0x71   :  { %v245_v13 = vadd.f32 1.0, %v244_v20  ;;  %v252_v11 = vadd.f32 1.0, %v251_v25  ;;  %v509_v50 = vsel %vm508_vm6, 1, %v2746_v23  ;;  %v491_v4 = vadd.s32 %v490_v22, %v481_v19 }
  0x72   :  { %v387_v43 = vmul.f32 %v386_v41, %v384_v32  ;;  %v503_v5 = vshrl.u32 %v498_v45, 16  ;;  %v511_v9 = vadd.s32 %v509_v50, %v507_v47  ;;  %v510_v21 = vadd.s32 %v506_v42, %v502_v48 }
  0x73   :  { %v253_v8 = vmul.f32 %v252_v11, %v3039_v36  ;;  %v262_v38 = vxor.u32 2147483648, %v245_v13  ;;  %v580_v49 = vshrl.u32 %v579_v39, 23  ;;  %vm258_vm7 = vcmp.eq.s32.totalorder %v3021_v7, 0 }
  0x74   :  { %v388_v26 = vxor.u32 2147483648, %v387_v43  ;;  %v410_v3 = vadd.s32 3, %v393_v18  ;;  %v512_v16 = vadd.s32 %v511_v9, %v501_v14  ;;  %v576_v10 = vand.u32 2147483647, %v2769_v54 }
  0x75   :  { %v259_v40 = vxor.u32 2147483648, %v253_v8  ;;  %v263_v15 = vsel %vm261_vm3, %v262_v38, %v253_v8  ;;  %v2635_v34 = vadd.s32 4294967169, %v580_v49  ;;  %vm254_vm8 = vweird.f32 %v2763_v51 }
  0x76   :  { %v389_v36 = vsel %vm268_vm14, %v388_v26, %v387_v43  ;;  %v513_v45 = vadd.s32 %v512_v16, %v503_v5  ;;  %v514_v6 = vmul.u32 %v3007_v44, %v3046_v28  ;;  %vm516_vm9 = vc.u32 %v491_v4, %v510_v21 }
  0x77   :  { %v260_v48 = vsel %vm258_vm7, %v245_v13, %v259_v40  ;;  %v392_v27 = vsel %vm3050_vm1, %v2765_v52, %v389_v36  ;;  %v586_v17 = vadd.s32 1, %v2635_v34  ;;  %v3083_v22 = vand.u32 3, %v410_v3 }
  0x78   :  { %v264_v41 = vsel %vm257_vm4, %v260_v48, %v263_v15  ;;  %v394_v19 = vmul.f32 %v392_v27, %v392_v27  ;;  %v517_v30 = vadd.s32 1, %v513_v45  ;;  %v583_v42 = vand.u32 8388607, %v576_v10 }
  0x79   :  { %v265_v51 = vsel %vm254_vm8, nan, %v264_v41  ;;  %vm587_vm10 = vcmp.gt.s32.totalorder %v586_v17, 0  ;;  %vm416_vm11 = vcmp.eq.s32.totalorder %v3083_v22, 2  ;;  %v3088_v7 = vadd.s32 %v510_v21, %v491_v4 }
  0x7a   :  { %v395_v44 = vmul.f32 -0.001358992, %v394_v19  ;;  %v402_v28 = vmul.f32 -0.00019511016, %v394_v19  ;;  %v518_v20 = vsel %vm516_vm9, %v517_v30, %v513_v45  ;;  %v588_v25 = vsel %vm587_vm10, %v586_v17, 0  ;;  %2591 = vst [vmem:[#allocation5] sm:$0xff] %v265_v51 }
  0x7b   :  { %v519_v24 = vadd.s32 %v518_v20, %v514_v6  ;;  %v590_v18 = vand.u32 31, %v588_v25  ;;  %v584_v50 = vor.u32 8388608, %v583_v42  ;;  %v734_v39 = vand.u32 2139095040, %v2771_v55 }
  0x7c   :  { %v396_v12 = vadd.f32 0.041655596, %v395_v44  ;;  %v403_v32 = vadd.f32 0.008332121, %v402_v28  ;;  %vm413_vm12 = vcmp.eq.s32.totalorder %v3083_v22, 0  ;;  %vm412_vm13 = vcmp.lt.s32.totalorder %v3083_v22, 2 }
  0x7d   :  { %v520_v14 = vadd.s32 536870912, %v519_v24  ;;  %v591_v47 = vsub.s32 32, %v590_v18  ;;  %v593_v5 = vshll.u32 %v2740_v29, %v590_v18  ;;  %v596_v9 = vshll.u32 %v2741_v31, %v590_v18 }
  0x7e   :  { %v397_v13 = vmul.f32 %v396_v12, %v394_v19  ;;  %v404_v11 = vmul.f32 %v403_v32, %v394_v19  ;;  %v599_v8 = vshll.u32 %v2742_v33, %v590_v18  ;;  %vm409_vm14 = vweird.f32 %v2765_v52 }
  0x7f   :  { %v3092_v43 = vshrl.u32 %v520_v14, 30  ;;  %v594_v21 = vshrl.u32 %v2741_v31, %v591_v47  ;;  %v597_v49 = vshrl.u32 %v2742_v33, %v591_v47  ;;  %v600_v3 = vshrl.u32 %v2743_v35, %v591_v47 }
  0x80   :  { %v398_v38 = vadd.f32 -0.4999988, %v397_v13  ;;  %v405_v4 = vadd.f32 -0.16666654, %v404_v11  ;;  %v602_v16 = vshll.u32 %v2743_v35, %v590_v18  ;;  %v603_v40 = vshrl.u32 %v2744_v37, %v591_v47 }
  0x81   :  { %v522_v26 = vshll.u32 %v3092_v43, 30  ;;  %v3105_v36 = vshrl.u32 %v588_v25, 5  ;;  %v735_v45 = vshrl.u32 %v734_v39, 23  ;;  %v605_v48 = vshll.u32 %v2744_v37, %v590_v18 }
  0x82   :  { %v399_v15 = vmul.f32 %v398_v38, %v394_v19  ;;  %v406_v34 = vmul.f32 %v405_v4, %v394_v19  ;;  %v606_v17 = vshrl.u32 %v2745_v46, %v591_v47  ;;  %v3111_v41 = vshll.u32 %v584_v50, 8 }
  0x83   :  { %v3107_v6 = vsub.s32 %v519_v24, %v522_v26  ;;  %v595_v42 = vor.u32 %v594_v21, %v593_v5  ;;  %v598_v44 = vor.u32 %v597_v49, %v596_v9  ;;  %v601_v19 = vor.u32 %v600_v3, %v599_v8 }
  0x84   :  { %v400_v30 = vadd.f32 1.0, %v399_v15  ;;  %v407_v51 = vadd.f32 1.0, %v406_v34  ;;  %v604_v20 = vor.u32 %v603_v40, %v602_v16  ;;  %vm423_vm0 = vcmp.lt.s32.totalorder %v2767_v53, 0 }
  0x85   :  { %vm524_vm15 = vcmp.lt.s32.totalorder %v3107_v6, 0  ;;  %v525_v28 = vsub.s32 0, %v3107_v6  ;;  %vm608_vm1 = vcmp.lt.s32.totalorder %v3105_v36, 1  ;;  %vm611_vm2 = vcmp.lt.s32.totalorder %v3105_v36, 4 }
  0x86   :  { %v408_v25 = vmul.f32 %v407_v51, %v392_v27  ;;  %v417_v12 = vxor.u32 2147483648, %v400_v30  ;;  %v607_v18 = vor.u32 %v606_v17, %v605_v48  ;;  %vm610_vm3 = vcmp.lt.s32.totalorder %v3105_v36, 3 }
  0x87   :  { %v526_v24 = vsel %vm524_vm15, %v525_v28, %v3107_v6  ;;  %v2638_v32 = vadd.s32 4294967169, %v735_v45  ;;  %v625_v27 = vand.u32 65535, %v3111_v41  ;;  %vm609_vm4 = vcmp.lt.s32.totalorder %v3105_v36, 2 }
  0x88   :  { %v414_v14 = vxor.u32 2147483648, %v408_v25  ;;  %v418_v13 = vsel %vm416_vm11, %v417_v12, %v408_v25  ;;  %v527_v11 = vclz %v526_v24  ;;  %v616_v50 = vsel %vm608_vm1, %v595_v42, %v598_v44 }
  0x89   :  { %v617_v39 = vsel %vm611_vm2, %v604_v20, 920167782  ;;  %v626_v5 = vshrl.u32 %v3111_v41, 16  ;;  %v620_v4 = vsel %vm608_vm1, %v598_v44, %v601_v19  ;;  %v545_v49 = vsub.s32 4, %v3092_v43 }
  0x8a   :  { %v415_v9 = vsel %vm413_vm12, %v400_v30, %v414_v14  ;;  %v2633_v8 = vadd.s32 4294967294, %v527_v11  ;;  %v618_v38 = vsel %vm610_vm3, %v601_v19, %v617_v39  ;;  %v592_v26 = vshrl.u32 %v2740_v29, %v591_v47 }
  0x8b   :  { %v419_v21 = vsel %vm412_vm13, %v415_v9, %v418_v13  ;;  %v621_v3 = vsel %vm611_vm2, %v607_v18, 1326507024  ;;  %v619_v40 = vsel %vm609_vm4, %v616_v50, %v618_v38  ;;  %v613_v22 = vsel %vm611_vm2, %v601_v19, 2102212464 }
  0x8c   :  { %v420_v16 = vsel %vm409_vm14, nan, %v419_v21  ;;  %vm2634_vm5 = vcmp.lt.s32.totalorder %v2633_v8, 0  ;;  %v622_v15 = vsel %vm610_vm3, %v604_v20, %v621_v3  ;;  %v649_v45 = vand.u32 65535, %v619_v40 }
  0x8d   :  { %v530_v34 = vsel %vm2634_vm5, 0, %v2633_v8  ;;  %v623_v47 = vsel %vm609_vm4, %v620_v4, %v622_v15  ;;  %2592 = vst [vmem:[#allocation5 + $0x8] sm:$0xff] %v420_v16  ;;  %v3155_v51 = vsel %vm423_vm0, %v545_v49, %v3092_v43  ;;  %v731_v20 = vand.u32 2147483647, %v2771_v55 }
  0x8e   :  { %v531_v48 = vsub.s32 32, %v530_v34  ;;  %v532_v52 = vshll.u32 %v3107_v6, %v530_v34  ;;  %v535_v17 = vsub.s32 4294967266, %v530_v34  ;;  %v627_v30 = vand.u32 65535, %v623_v47 }
  0x8f   :  { %v628_v28 = vshrl.u32 %v623_v47, 16  ;;  %v741_v25 = vadd.s32 1, %v2638_v32  ;;  %v612_v24 = vsel %vm608_vm1, %v592_v26, %v595_v42  ;;  %v614_v6 = vsel %vm610_vm3, %v598_v44, %v613_v22 }
  0x90   :  { %v533_v19 = vshrl.u32 %v3088_v7, %v531_v48  ;;  %v536_v12 = vadd.s32 127, %v535_v17  ;;  %v631_v18 = vmul.u32 %v627_v30, %v626_v5  ;;  %v629_v14 = vmul.u32 %v627_v30, %v625_v27 }
  0x91   :  { %v630_v13 = vmul.u32 %v628_v28, %v625_v27  ;;  %v650_v11 = vshrl.u32 %v619_v40, 16  ;;  %v4532_v43 = vand.u32 2147483647, %v2767_v53  ;;  %v632_v7 = vmul.u32 %v628_v28, %v626_v5 }
  0x92   :  { %v534_v32 = vor.u32 %v533_v19, %v532_v52  ;;  %v537_v39 = vshll.u32 %v536_v12, 23  ;;  %v651_v9 = vmul.u32 %v649_v45, %v625_v27  ;;  %v635_v38 = vshll.u32 %v631_v18, 16 }
  0x93   :  { %vm3165_vm6 = vcmp.le.f32.partialorder %v4532_v43, 0.7853982  ;;  %v633_v8 = vshll.u32 %v630_v13, 16  ;;  %v652_v42 = vmul.u32 %v650_v11, %v625_v27  ;;  %v653_v4 = vmul.u32 %v649_v45, %v626_v5 }
  0x94   :  { %v538_v21 = vor.u32 4788187, %v537_v39  ;;  %v541_v49 = vcvt.s32.f32 %v534_v32  ;;  %v615_v44 = vsel %vm609_vm4, %v612_v24, %v614_v6  ;;  %v636_v26 = vshrl.u32 %v631_v18, 16 }
  0x95   :  { %vm637_vm7 = vc.u32 %v629_v14, %v633_v8  ;;  %v639_v3 = vadd.s32 %v633_v8, %v629_v14  ;;  %v654_v16 = vmul.u32 %v650_v11, %v626_v5  ;;  %v655_v40 = vshll.u32 %v652_v42, 16 }
  0x96   :  { %v539_v15 = vand.u32 2147483647, %v538_v21  ;;  %v634_v34 = vshrl.u32 %v630_v13, 16  ;;  %v638_v22 = vsel %vm637_vm7, 1, %v2746_v23  ;;  %v657_v47 = vshll.u32 %v653_v4, 16 }
  0x97   :  { %v640_v48 = vadd.s32 %v638_v22, %v632_v7  ;;  %vm641_vm8 = vc.u32 %v639_v3, %v635_v38  ;;  %vm659_vm9 = vc.u32 %v651_v9, %v655_v40  ;;  %v661_v27 = vadd.s32 %v655_v40, %v651_v9 }
  0x98   :  { %v542_v45 = vmul.f32 %v541_v49, %v539_v15  ;;  %v642_v52 = vsel %vm641_vm8, 1, %v2746_v23  ;;  %v660_v36 = vsel %vm659_vm9, 1, %v2746_v23  ;;  %vm742_vm10 = vcmp.gt.s32.totalorder %v741_v25, 0 }
  0x99   :  { %v644_v17 = vadd.s32 %v642_v52, %v640_v48  ;;  %v656_v30 = vshrl.u32 %v652_v42, 16  ;;  %v662_v28 = vadd.s32 %v660_v36, %v654_v16  ;;  %vm663_vm11 = vc.u32 %v661_v27, %v657_v47 }
  0x9a   :  { %v543_v5 = vxor.u32 2147483648, %v542_v45  ;;  %v658_v19 = vshrl.u32 %v653_v4, 16  ;;  %v664_v12 = vsel %vm663_vm11, 1, %v2746_v23  ;;  %v743_v24 = vsel %vm742_vm10, %v741_v25, 0 }
  0x9b   :  { %v645_v18 = vadd.s32 %v644_v17, %v634_v34  ;;  %v3175_v6 = vadd.s32 %v661_v27, %v657_v47  ;;  %v666_v14 = vadd.s32 %v664_v12, %v662_v28  ;;  %v745_v13 = vand.u32 31, %v743_v24 }
  0x9c   :  { %v544_v11 = vsel %vm423_vm0, %v543_v5, %v542_v45  ;;  %v738_v43 = vand.u32 8388607, %v731_v20  ;;  %v548_v25 = vsel %vm3165_vm6, 0, %v3155_v51  ;;  %v669_v38 = vmul.u32 %v3111_v41, %v615_v44 }
  0x9d   :  { %v547_v32 = vsel %vm3165_vm6, %v2767_v53, %v544_v11  ;;  %v3184_v39 = vadd.s32 %v645_v18, %v636_v26  ;;  %v667_v7 = vadd.s32 %v666_v14, %v656_v30  ;;  %v3186_v9 = vsub.s32 32, %v745_v13 }
  0x9e   :  { %v549_v8 = vmul.f32 %v547_v32, %v547_v32  ;;  %v748_v42 = vshll.u32 %v2740_v29, %v745_v13  ;;  %v751_v21 = vshll.u32 %v2741_v31, %v745_v13  ;;  %v754_v49 = vshll.u32 %v2742_v33, %v745_v13 }
  0x9f   :  { %v668_v4 = vadd.s32 %v667_v7, %v658_v19  ;;  %vm671_vm12 = vc.u32 %v3184_v39, %v3175_v6  ;;  %v749_v16 = vshrl.u32 %v2741_v31, %v3186_v9  ;;  %v752_v51 = vshrl.u32 %v2742_v33, %v3186_v9 }
  0xa0   :  { %v550_v26 = vmul.f32 -0.001358992, %v549_v8  ;;  %v557_v3 = vmul.f32 -0.00019511016, %v549_v8  ;;  %v755_v41 = vshrl.u32 %v2743_v35, %v3186_v9  ;;  %v757_v44 = vshll.u32 %v2743_v35, %v745_v13 }
  0xa1   :  { %v672_v50 = vadd.s32 1, %v668_v4  ;;  %v758_v40 = vshrl.u32 %v2744_v37, %v3186_v9  ;;  %v3206_v22 = vshrl.u32 %v743_v24, 5  ;;  %v565_v47 = vadd.s32 3, %v548_v25 }
  0xa2   :  { %v551_v15 = vadd.f32 0.041655596, %v550_v26  ;;  %v558_v34 = vadd.f32 0.008332121, %v557_v3  ;;  %v739_v27 = vor.u32 8388608, %v738_v43  ;;  %v760_v45 = vshll.u32 %v2744_v37, %v745_v13 }
  0xa3   :  { %v673_v48 = vsel %vm671_vm12, %v672_v50, %v668_v4  ;;  %v750_v30 = vor.u32 %v749_v16, %v748_v42  ;;  %v3209_v28 = vor.u32 %v752_v51, %v751_v21  ;;  %v756_v5 = vor.u32 %v755_v41, %v754_v49 }
  0xa4   :  { %v552_v52 = vmul.f32 %v551_v15, %v549_v8  ;;  %v559_v36 = vmul.f32 %v558_v34, %v549_v8  ;;  %v674_v17 = vadd.s32 %v673_v48, %v669_v38  ;;  %v759_v19 = vor.u32 %v758_v40, %v757_v44 }
  0xa5   :  { %v761_v12 = vshrl.u32 %v2745_v46, %v3186_v9  ;;  %vm763_vm13 = vcmp.lt.s32.totalorder %v3206_v22, 1  ;;  %v566_v11 = vand.u32 3, %v565_v47  ;;  %vm766_vm14 = vcmp.lt.s32.totalorder %v3206_v22, 4 }
  0xa6   :  { %v553_v18 = vadd.f32 -0.4999988, %v552_v52  ;;  %v560_v14 = vadd.f32 -0.16666654, %v559_v36  ;;  %v675_v24 = vadd.s32 536870912, %v674_v17  ;;  %v3215_v13 = vshll.u32 %v739_v27, 8 }
  0xa7   :  { %v762_v43 = vor.u32 %v761_v12, %v760_v45  ;;  %vm765_vm15 = vcmp.lt.s32.totalorder %v3206_v22, 3  ;;  %vm764_vm0 = vcmp.lt.s32.totalorder %v3206_v22, 2  ;;  %v771_v42 = vsel %vm763_vm13, %v750_v30, %v3209_v28 }
  0xa8   :  { %v554_v7 = vmul.f32 %v553_v18, %v549_v8  ;;  %v561_v25 = vmul.f32 %v560_v14, %v549_v8  ;;  %v3217_v38 = vshrl.u32 %v675_v24, 30  ;;  %v772_v4 = vsel %vm766_vm14, %v759_v19, 920167782 }
  0xa9   :  { %v776_v21 = vsel %vm766_vm14, %v762_v43, 1326507024  ;;  %v775_v3 = vsel %vm763_vm13, %v3209_v28, %v756_v5  ;;  %vm567_vm1 = vcmp.lt.s32.totalorder %v566_v11, 2  ;;  %vm571_vm2 = vcmp.eq.s32.totalorder %v566_v11, 2 }
  0xaa   :  { %v555_v49 = vadd.f32 1.0, %v554_v7  ;;  %v562_v26 = vadd.f32 1.0, %v561_v25  ;;  %v677_v8 = vshll.u32 %v3217_v38, 30  ;;  %v773_v16 = vsel %vm765_vm15, %v756_v5, %v772_v4 }
  0xab   :  { %v777_v51 = vsel %vm765_vm15, %v759_v19, %v776_v21  ;;  %vm568_vm3 = vcmp.eq.s32.totalorder %v566_v11, 0  ;;  %v774_v40 = vsel %vm764_vm0, %v771_v42, %v773_v16  ;;  %v780_v34 = vand.u32 65535, %v3215_v13 }
  0xac   :  { %v563_v50 = vmul.f32 %v562_v26, %v547_v32  ;;  %v572_v41 = vxor.u32 2147483648, %v555_v49  ;;  %v678_v44 = vsub.s32 %v674_v17, %v677_v8  ;;  %v778_v15 = vsel %vm764_vm0, %v775_v3, %v777_v51 }
  0xad   :  { %v781_v47 = vshrl.u32 %v3215_v13, 16  ;;  %vm564_vm5 = vweird.f32 %v2767_v53  ;;  %v747_v32 = vshrl.u32 %v2740_v29, %v3186_v9  ;;  %v782_v52 = vand.u32 65535, %v778_v15 }
  0xae   :  { %v569_v48 = vxor.u32 2147483648, %v563_v50  ;;  %v573_v27 = vsel %vm571_vm2, %v572_v41, %v563_v50  ;;  %vm679_vm4 = vcmp.lt.s32.totalorder %v678_v44, 0  ;;  %v680_v45 = vsub.s32 0, %v678_v44 }
  0xaf   :  { %v783_v36 = vshrl.u32 %v778_v15, 16  ;;  %v768_v12 = vsel %vm766_vm14, %v756_v5, 2102212464  ;;  %v805_v18 = vshrl.u32 %v774_v40, 16  ;;  %vm578_vm6 = vcmp.lt.s32.totalorder %v2769_v54, 0 }
  0xb0   :  { %v570_v17 = vsel %vm568_vm3, %v555_v49, %v569_v48  ;;  %v681_v19 = vsel %vm679_vm4, %v680_v45, %v678_v44  ;;  %v784_v43 = vmul.u32 %v782_v52, %v780_v34  ;;  %v670_v53 = vadd.s32 %v3175_v6, %v3184_v39 }
  0xb1   :  { %v574_v14 = vsel %vm567_vm1, %v570_v17, %v573_v27  ;;  %v682_v24 = vclz %v681_v19  ;;  %v785_v7 = vmul.u32 %v783_v36, %v780_v34  ;;  %v786_v9 = vmul.u32 %v782_v52, %v781_v47 }
  0xb2   :  { %v575_v25 = vsel %vm564_vm5, nan, %v574_v14  ;;  %v804_v42 = vand.u32 65535, %v774_v40  ;;  %v767_v21 = vsel %vm763_vm13, %v747_v32, %v750_v30  ;;  %v787_v49 = vmul.u32 %v783_v36, %v781_v47 }
  0xb3   :  { %v2636_v4 = vadd.s32 4294967294, %v682_v24  ;;  %v788_v5 = vshll.u32 %v785_v7, 16  ;;  %2593 = vst [vmem:[#allocation5 + $0x10] sm:$0xff] %v575_v25  ;;  %v700_v11 = vsub.s32 4, %v3217_v38  ;;  %v769_v26 = vsel %vm765_vm15, %v3209_v28, %v768_v12 }
  0xb4   :  { %v790_v8 = vshll.u32 %v786_v9, 16  ;;  %v889_v3 = vand.u32 2139095040, %v2773_v56  ;;  %v807_v39 = vmul.u32 %v805_v18, %v780_v34  ;;  %v806_v30 = vmul.u32 %v804_v42, %v780_v34 }
  0xb5   :  { %vm2637_vm7 = vcmp.lt.s32.totalorder %v2636_v4, 0  ;;  %vm792_vm8 = vc.u32 %v784_v43, %v788_v5  ;;  %v794_v6 = vadd.s32 %v788_v5, %v784_v43  ;;  %v808_v50 = vmul.u32 %v804_v42, %v781_v47 }
  0xb6   :  { %v685_v16 = vsel %vm2637_vm7, 0, %v2636_v4  ;;  %v793_v51 = vsel %vm792_vm8, 1, %v2746_v23  ;;  %v789_v27 = vshrl.u32 %v785_v7, 16  ;;  %v809_v45 = vmul.u32 %v805_v18, %v781_v47 }
  0xb7   :  { %v686_v41 = vsub.s32 32, %v685_v16  ;;  %v687_v40 = vshll.u32 %v678_v44, %v685_v16  ;;  %v690_v15 = vsub.s32 4294967266, %v685_v16  ;;  %v795_v48 = vadd.s32 %v793_v51, %v787_v49 }
  0xb8   :  { %vm796_vm9 = vc.u32 %v794_v6, %v790_v8  ;;  %v890_v28 = vshrl.u32 %v889_v3, 23  ;;  %v810_v17 = vshll.u32 %v807_v39, 16  ;;  %v701_v19 = vsel %vm578_vm6, %v700_v11, %v3217_v38 }
  0xb9   :  { %v688_v32 = vshrl.u32 %v670_v53, %v686_v41  ;;  %v691_v52 = vadd.s32 127, %v690_v15  ;;  %v797_v36 = vsel %vm796_vm9, 1, %v2746_v23  ;;  %v791_v12 = vshrl.u32 %v786_v9, 16 }
  0xba   :  { %v799_v34 = vadd.s32 %v797_v36, %v795_v48  ;;  %v812_v14 = vshll.u32 %v808_v50, 16  ;;  %vm814_vm10 = vc.u32 %v806_v30, %v810_v17  ;;  %v816_v43 = vadd.s32 %v810_v17, %v806_v30 }
  0xbb   :  { %v689_v24 = vor.u32 %v688_v32, %v687_v40  ;;  %v692_v44 = vshll.u32 %v691_v52, 23  ;;  %v811_v25 = vshrl.u32 %v807_v39, 16  ;;  %v815_v47 = vsel %vm814_vm10, 1, %v2746_v23 }
  0xbc   :  { %v800_v7 = vadd.s32 %v799_v34, %v789_v27  ;;  %v2641_v18 = vadd.s32 4294967169, %v890_v28  ;;  %v817_v4 = vadd.s32 %v815_v47, %v809_v45  ;;  %vm818_vm11 = vc.u32 %v816_v43, %v812_v14 }
  0xbd   :  { %v693_v53 = vor.u32 4788187, %v692_v44  ;;  %v696_v42 = vcvt.s32.f32 %v689_v24  ;;  %vm3266_vm12 = vcmp.le.f32.partialorder %v576_v10, 0.7853982  ;;  %v819_v9 = vsel %vm818_vm11, 1, %v2746_v23 }
  0xbe   :  { %v886_v49 = vand.u32 2147483647, %v2773_v56  ;;  %v896_v5 = vadd.s32 1, %v2641_v18  ;;  %v770_v8 = vsel %vm764_vm0, %v767_v21, %v769_v26  ;;  %v813_v3 = vshrl.u32 %v808_v50, 16 }
  0xbf   :  { %v694_v11 = vand.u32 2147483647, %v693_v53  ;;  %v821_v6 = vadd.s32 %v819_v9, %v817_v4  ;;  %v703_v39 = vsel %vm3266_vm12, 0, %v701_v19  ;;  %v3276_v16 = vadd.s32 %v800_v7, %v791_v12 }
  0xc0   :  { %v3278_v10 = vadd.s32 %v816_v43, %v812_v14  ;;  %vm897_vm13 = vcmp.gt.s32.totalorder %v896_v5, 0  ;;  %v824_v40 = vmul.u32 %v3215_v13, %v770_v8  ;;  %v720_v27 = vadd.s32 3, %v703_v39 }
  0xc1   :  { %v697_v51 = vmul.f32 %v696_v42, %v694_v11  ;;  %v822_v30 = vadd.s32 %v821_v6, %v811_v25  ;;  %v898_v41 = vsel %vm897_vm13, %v896_v5, 0  ;;  %v893_v21 = vand.u32 8388607, %v886_v49 }
  0xc2   :  { %v900_v15 = vand.u32 31, %v898_v41  ;;  %vm826_vm14 = vc.u32 %v3276_v16, %v3278_v10  ;;  %v3285_v26 = vshrl.u32 %v898_v41, 5  ;;  %v3306_v43 = vand.u32 3, %v720_v27 }
  0xc3   :  { %v698_v48 = vxor.u32 2147483648, %v697_v51  ;;  %v823_v22 = vadd.s32 %v822_v30, %v813_v3  ;;  %v894_v25 = vor.u32 8388608, %v893_v21  ;;  %vm733_vm8 = vcmp.lt.s32.totalorder %v2771_v55, 0 }
  0xc4   :  { %v3287_v50 = vsub.s32 32, %v900_v15  ;;  %v903_v45 = vshll.u32 %v2740_v29, %v900_v15  ;;  %v906_v32 = vshll.u32 %v2741_v31, %v900_v15  ;;  %v909_v52 = vshll.u32 %v2742_v33, %v900_v15 }
  0xc5   :  { %v699_v28 = vsel %vm578_vm6, %v698_v48, %v697_v51  ;;  %v827_v13 = vadd.s32 1, %v823_v22  ;;  %v912_v12 = vshll.u32 %v2743_v35, %v900_v15  ;;  %v915_v42 = vshll.u32 %v2744_v37, %v900_v15 }
  0xc6   :  { %v702_v36 = vsel %vm3266_vm12, %v2769_v54, %v699_v28  ;;  %v904_v17 = vshrl.u32 %v2741_v31, %v3287_v50  ;;  %v907_v19 = vshrl.u32 %v2742_v33, %v3287_v50  ;;  %v910_v24 = vshrl.u32 %v2743_v35, %v3287_v50 }
  0xc7   :  { %v704_v34 = vmul.f32 %v702_v36, %v702_v36  ;;  %v828_v14 = vsel %vm826_vm14, %v827_v13, %v823_v22  ;;  %v913_v44 = vshrl.u32 %v2744_v37, %v3287_v50  ;;  %v916_v5 = vshrl.u32 %v2745_v46, %v3287_v50 }
  0xc8   :  { %v829_v7 = vadd.s32 %v828_v14, %v824_v40  ;;  %v3308_v53 = vor.u32 %v904_v17, %v903_v45  ;;  %v3311_v38 = vor.u32 %v907_v19, %v906_v32  ;;  %v3315_v3 = vor.u32 %v910_v24, %v909_v52 }
  0xc9   :  { %v705_v47 = vmul.f32 -0.001358992, %v704_v34  ;;  %v712_v18 = vmul.f32 -0.00019511016, %v704_v34  ;;  %v914_v9 = vor.u32 %v913_v44, %v912_v12  ;;  %vm918_vm15 = vcmp.lt.s32.totalorder %v3285_v26, 1 }
  0xca   :  { %v830_v4 = vadd.s32 536870912, %v829_v7  ;;  %vm920_vm0 = vcmp.lt.s32.totalorder %v3285_v26, 3  ;;  %vm921_vm1 = vcmp.lt.s32.totalorder %v3285_v26, 4  ;;  %v3322_v39 = vshll.u32 %v894_v25, 8 }
  0xcb   :  { %v706_v11 = vadd.f32 0.041655596, %v705_v47  ;;  %v713_v8 = vadd.f32 0.008332121, %v712_v18  ;;  %v917_v41 = vor.u32 %v916_v5, %v915_v42  ;;  %vm723_vm2 = vcmp.eq.s32.totalorder %v3306_v43, 0 }
  0xcc   :  { %v3318_v6 = vshrl.u32 %v830_v4, 30  ;;  %vm919_vm3 = vcmp.lt.s32.totalorder %v3285_v26, 2  ;;  %v926_v15 = vsel %vm918_vm15, %v3308_v53, %v3311_v38  ;;  %v927_v48 = vsel %vm921_vm1, %v914_v9, 920167782 }
  0xcd   :  { %v707_v51 = vmul.f32 %v706_v11, %v704_v34  ;;  %v714_v30 = vmul.f32 %v713_v8, %v704_v34  ;;  %vm722_vm4 = vcmp.lt.s32.totalorder %v3306_v43, 2  ;;  %vm726_vm5 = vcmp.eq.s32.totalorder %v3306_v43, 2 }
  0xce   :  { %v832_v40 = vshll.u32 %v3318_v6, 30  ;;  %v928_v21 = vsel %vm920_vm0, %v3315_v3, %v927_v48  ;;  %vm719_vm6 = vweird.f32 %v2769_v54  ;;  %v930_v28 = vsel %vm918_vm15, %v3311_v38, %v3315_v3 }
  0xcf   :  { %v708_v27 = vadd.f32 -0.4999988, %v707_v51  ;;  %v715_v22 = vadd.f32 -0.16666654, %v714_v30  ;;  %v935_v13 = vand.u32 65535, %v3322_v39  ;;  %v929_v19 = vsel %vm919_vm3, %v926_v15, %v928_v21 }
  0xd0   :  { %v3339_v45 = vsub.s32 %v829_v7, %v832_v40  ;;  %v1041_v32 = vand.u32 2147483647, %v2775_v57  ;;  %v931_v12 = vsel %vm921_vm1, %v917_v41, 1326507024  ;;  %v936_v44 = vshrl.u32 %v3322_v39, 16 }
  0xd1   :  { %v709_v52 = vmul.f32 %v708_v27, %v704_v34  ;;  %v716_v17 = vmul.f32 %v715_v22, %v704_v34  ;;  %v932_v24 = vsel %vm920_vm0, %v914_v9, %v931_v12  ;;  %v1044_v47 = vand.u32 2139095040, %v2775_v57 }
  0xd2   :  { %vm834_vm7 = vcmp.lt.s32.totalorder %v3339_v45, 0  ;;  %v835_v14 = vsub.s32 0, %v3339_v45  ;;  %v933_v34 = vsel %vm919_vm3, %v930_v28, %v932_v24  ;;  %v960_v5 = vshrl.u32 %v929_v19, 16 }
  0xd3   :  { %v710_v7 = vadd.f32 1.0, %v709_v52  ;;  %v717_v25 = vadd.f32 1.0, %v716_v17  ;;  %v937_v42 = vand.u32 65535, %v933_v34  ;;  %v938_v4 = vshrl.u32 %v933_v34, 16 }
  0xd4   :  { %v836_v18 = vsel %vm834_vm7, %v835_v14, %v3339_v45  ;;  %v959_v9 = vand.u32 65535, %v929_v19  ;;  %v825_v30 = vadd.s32 %v3278_v10, %v3276_v16  ;;  %v1045_v21 = vshrl.u32 %v1044_v47, 23 }
  0xd5   :  { %v718_v11 = vmul.f32 %v717_v25, %v702_v36  ;;  %v727_v8 = vxor.u32 2147483648, %v710_v7  ;;  %v837_v51 = vclz %v836_v18  ;;  %v939_v41 = vmul.u32 %v937_v42, %v935_v13 }
  0xd6   :  { %v940_v40 = vmul.u32 %v938_v4, %v935_v13  ;;  %v941_v15 = vmul.u32 %v937_v42, %v936_v44  ;;  %v855_v28 = vsub.s32 4, %v3318_v6  ;;  %v902_v36 = vshrl.u32 %v2740_v29, %v3287_v50 }
  0xd7   :  { %v724_v48 = vxor.u32 2147483648, %v718_v11  ;;  %v728_v27 = vsel %vm726_vm5, %v727_v8, %v718_v11  ;;  %v2639_v22 = vadd.s32 4294967294, %v837_v51  ;;  %v962_v17 = vmul.u32 %v960_v5, %v935_v13 }
  0xd8   :  { %v943_v52 = vshll.u32 %v940_v40, 16  ;;  %v942_v16 = vmul.u32 %v938_v4, %v936_v44  ;;  %v963_v10 = vmul.u32 %v959_v9, %v936_v44  ;;  %v945_v24 = vshll.u32 %v941_v15, 16 }
  0xd9   :  { %v725_v19 = vsel %vm723_vm2, %v710_v7, %v724_v48  ;;  %vm2640_vm9 = vcmp.lt.s32.totalorder %v2639_v22, 0  ;;  %vm3376_vm11 = vcmp.le.f32.partialorder %v731_v20, 0.7853982  ;;  %v922_v43 = vsel %vm918_vm15, %v902_v36, %v3308_v53 }
  0xda   :  { %v729_v12 = vsel %vm722_vm4, %v725_v19, %v728_v27  ;;  %v840_v14 = vsel %vm2640_vm9, 0, %v2639_v22  ;;  %vm947_vm10 = vc.u32 %v939_v41, %v943_v52  ;;  %v923_v18 = vsel %vm921_vm1, %v3315_v3, 2102212464 }
  0xdb   :  { %v730_v25 = vsel %vm719_vm6, nan, %v729_v12  ;;  %v841_v34 = vsub.s32 32, %v840_v14  ;;  %v842_v7 = vshll.u32 %v3339_v45, %v840_v14  ;;  %v845_v47 = vsub.s32 4294967266, %v840_v14 }
  0xdc   :  { %v948_v54 = vsel %vm947_vm10, 1, %v2746_v23  ;;  %v961_v42 = vmul.u32 %v959_v9, %v935_v13  ;;  %2594 = vst [vmem:[#allocation5 + $0x18] sm:$0xff] %v730_v25  ;;  %v949_v11 = vadd.s32 %v943_v52, %v939_v41  ;;  %v856_v45 = vsel %vm733_vm8, %v855_v28, %v3318_v6 }
  0xdd   :  { %v843_v20 = vshrl.u32 %v825_v30, %v841_v34  ;;  %v846_v4 = vadd.s32 127, %v845_v47  ;;  %v950_v8 = vadd.s32 %v948_v54, %v942_v16  ;;  %v964_v51 = vmul.u32 %v960_v5, %v936_v44 }
  0xde   :  { %v965_v48 = vshll.u32 %v962_v17, 16  ;;  %v967_v27 = vshll.u32 %v963_v10, 16  ;;  %v944_v36 = vshrl.u32 %v940_v40, 16  ;;  %vm951_vm12 = vc.u32 %v949_v11, %v945_v24 }
  0xdf   :  { %v844_v53 = vor.u32 %v843_v20, %v842_v7  ;;  %v847_v22 = vshll.u32 %v846_v4, 23  ;;  %v946_v3 = vshrl.u32 %v941_v15, 16  ;;  %v952_v19 = vsel %vm951_vm12, 1, %v2746_v23 }
  0xe0   :  { %vm969_vm13 = vc.u32 %v961_v42, %v965_v48  ;;  %v971_v13 = vadd.s32 %v965_v48, %v961_v42  ;;  %v954_v41 = vadd.s32 %v952_v19, %v950_v8  ;;  %v966_v16 = vshrl.u32 %v962_v17, 16 }
  0xe1   :  { %v848_v9 = vor.u32 4788187, %v847_v22  ;;  %v851_v30 = vcvt.s32.f32 %v844_v53  ;;  %v970_v52 = vsel %vm969_vm13, 1, %v2746_v23  ;;  %v2644_v6 = vadd.s32 4294967169, %v1045_v21 }
  0xe2   :  { %v972_v12 = vadd.s32 %v970_v52, %v964_v51  ;;  %vm973_vm14 = vc.u32 %v971_v13, %v967_v27  ;;  %v924_v5 = vsel %vm920_vm0, %v3311_v38, %v923_v18  ;;  %v955_v40 = vadd.s32 %v954_v41, %v944_v36 }
  0xe3   :  { %v849_v44 = vand.u32 2147483647, %v848_v9  ;;  %v974_v15 = vsel %vm973_vm14, 1, %v2746_v23  ;;  %v858_v28 = vsel %vm3376_vm11, 0, %v856_v45  ;;  %v968_v14 = vshrl.u32 %v963_v10, 16 }
  0xe4   :  { %v976_v24 = vadd.s32 %v974_v15, %v972_v12  ;;  %v1051_v25 = vadd.s32 1, %v2644_v6  ;;  %v3399_v7 = vadd.s32 %v955_v40, %v946_v3  ;;  %v3401_v17 = vadd.s32 %v971_v13, %v967_v27 }
  0xe5   :  { %v852_v34 = vmul.f32 %v851_v30, %v849_v44  ;;  %v925_v21 = vsel %vm919_vm3, %v922_v43, %v924_v5  ;;  %v875_v18 = vadd.s32 3, %v858_v28  ;;  %v1048_v20 = vand.u32 8388607, %v1041_v32 }
  0xe6   :  { %v977_v47 = vadd.s32 %v976_v24, %v966_v16  ;;  %vm1052_vm15 = vcmp.gt.s32.totalorder %v1051_v25, 0  ;;  %v979_v11 = vmul.u32 %v3322_v39, %v925_v21  ;;  %vm981_vm0 = vc.u32 %v3399_v7, %v3401_v17 }
  0xe7   :  { %v853_v38 = vxor.u32 2147483648, %v852_v34  ;;  %v1053_v54 = vsel %vm1052_vm15, %v1051_v25, 0  ;;  %v3417_v51 = vand.u32 3, %v875_v18  ;;  %v1049_v27 = vor.u32 8388608, %v1048_v20 }
  0xe8   :  { %v978_v42 = vadd.s32 %v977_v47, %v968_v14  ;;  %v1055_v10 = vand.u32 31, %v1053_v54  ;;  %v3419_v53 = vshrl.u32 %v1053_v54, 5  ;;  %v1196_v22 = vand.u32 2147483647, %v2777_v58 }
  0xe9   :  { %v854_v4 = vsel %vm733_vm8, %v853_v38, %v852_v34  ;;  %vm881_vm1 = vcmp.eq.s32.totalorder %v3417_v51, 2  ;;  %vm878_vm2 = vcmp.eq.s32.totalorder %v3417_v51, 0  ;;  %v1199_v21 = vand.u32 2139095040, %v2777_v58 }
  0xea   :  { %v857_v26 = vsel %vm3376_vm11, %v2771_v55, %v854_v4  ;;  %v982_v43 = vadd.s32 1, %v978_v42  ;;  %v3415_v8 = vsub.s32 32, %v1055_v10  ;;  %v1067_v19 = vshll.u32 %v2743_v35, %v1055_v10 }
  0xeb   :  { %v859_v45 = vmul.f32 %v857_v26, %v857_v26  ;;  %v1061_v50 = vshll.u32 %v2741_v31, %v1055_v10  ;;  %v1064_v9 = vshll.u32 %v2742_v33, %v1055_v10  ;;  %v1058_v6 = vshll.u32 %v2740_v29, %v1055_v10 }
  0xec   :  { %v983_v48 = vsel %vm981_vm0, %v982_v43, %v978_v42  ;;  %v1062_v13 = vshrl.u32 %v2742_v33, %v3415_v8  ;;  %v1065_v30 = vshrl.u32 %v2743_v35, %v3415_v8  ;;  %v1068_v12 = vshrl.u32 %v2744_v37, %v3415_v8 }
  0xed   :  { %v860_v39 = vmul.f32 -0.001358992, %v859_v45  ;;  %v867_v36 = vmul.f32 -0.00019511016, %v859_v45  ;;  %v984_v3 = vadd.s32 %v983_v48, %v979_v11  ;;  %v1059_v44 = vshrl.u32 %v2741_v31, %v3415_v8 }
  0xee   :  { %v1070_v5 = vshll.u32 %v2744_v37, %v1055_v10  ;;  %v1071_v40 = vshrl.u32 %v2745_v46, %v3415_v8  ;;  %v1069_v24 = vor.u32 %v1068_v12, %v1067_v19  ;;  %v3441_v25 = vor.u32 %v1062_v13, %v1061_v50 }
  0xef   :  { %v861_v41 = vadd.f32 0.041655596, %v860_v39  ;;  %v868_v52 = vadd.f32 0.008332121, %v867_v36  ;;  %v985_v16 = vadd.s32 536870912, %v984_v3  ;;  %v3443_v34 = vor.u32 %v1065_v30, %v1064_v9 }
  0xf0   :  { %vm1076_vm3 = vcmp.lt.s32.totalorder %v3419_v53, 4  ;;  %vm877_vm4 = vcmp.lt.s32.totalorder %v3417_v51, 2  ;;  %vm1073_vm5 = vcmp.lt.s32.totalorder %v3419_v53, 1  ;;  %vm874_vm6 = vweird.f32 %v2771_v55 }
  0xf1   :  { %v862_v15 = vmul.f32 %v861_v41, %v859_v45  ;;  %v869_v28 = vmul.f32 %v868_v52, %v859_v45  ;;  %v3438_v14 = vshrl.u32 %v985_v16, 30  ;;  %v1060_v54 = vor.u32 %v1059_v44, %v1058_v6 }
  0xf2   :  { %v1072_v42 = vor.u32 %v1071_v40, %v1070_v5  ;;  %vm1075_vm7 = vcmp.lt.s32.totalorder %v3419_v53, 3  ;;  %v3452_v20 = vshll.u32 %v1049_v27, 8  ;;  %v1082_v43 = vsel %vm1076_vm3, %v1069_v24, 920167782 }
  0xf3   :  { %v863_v47 = vadd.f32 -0.4999988, %v862_v15  ;;  %v870_v38 = vadd.f32 -0.16666654, %v869_v28  ;;  %v987_v18 = vshll.u32 %v3438_v14, 30  ;;  %vm1074_vm8 = vcmp.lt.s32.totalorder %v3419_v53, 2 }
  0xf4   :  { %v1085_v48 = vsel %vm1073_vm5, %v3441_v25, %v3443_v34  ;;  %v1200_v39 = vshrl.u32 %v1199_v21, 23  ;;  %v3463_v36 = vand.u32 8388607, %v1196_v22  ;;  %vm888_vm10 = vcmp.lt.s32.totalorder %v2773_v56, 0 }
  0xf5   :  { %v864_v10 = vmul.f32 %v863_v47, %v859_v45  ;;  %v871_v4 = vmul.f32 %v870_v38, %v859_v45  ;;  %v988_v11 = vsub.s32 %v984_v3, %v987_v18  ;;  %v1081_v3 = vsel %vm1073_vm5, %v1060_v54, %v3441_v25 }
  0xf6   :  { %v1083_v50 = vsel %vm1075_vm7, %v3443_v34, %v1082_v43  ;;  %v1086_v13 = vsel %vm1076_vm3, %v1072_v42, 1326507024  ;;  %v1090_v9 = vand.u32 65535, %v3452_v20  ;;  %v1057_v6 = vshrl.u32 %v2740_v29, %v3415_v8 }
  0xf7   :  { %v865_v27 = vadd.f32 1.0, %v864_v10  ;;  %v872_v19 = vadd.f32 1.0, %v871_v4  ;;  %vm989_vm9 = vcmp.lt.s32.totalorder %v988_v11, 0  ;;  %v990_v45 = vsub.s32 0, %v988_v11 }
  0xf8   :  { %v1087_v16 = vsel %vm1075_vm7, %v1069_v24, %v1086_v13  ;;  %v1091_v5 = vshrl.u32 %v3452_v20, 16  ;;  %v980_v21 = vadd.s32 %v3401_v17, %v3399_v7  ;;  %v1084_v24 = vsel %vm1074_vm8, %v1081_v3, %v1083_v50 }
  0xf9   :  { %v873_v30 = vmul.f32 %v872_v19, %v857_v26  ;;  %v882_v41 = vxor.u32 2147483648, %v865_v27  ;;  %v991_v52 = vsel %vm989_vm9, %v990_v45, %v988_v11  ;;  %v1088_v44 = vsel %vm1074_vm8, %v1085_v48, %v1087_v16 }
  0xfa   :  { %v992_v12 = vclz %v991_v52  ;;  %v1092_v28 = vand.u32 65535, %v1088_v44  ;;  %v1093_v26 = vshrl.u32 %v1088_v44, 16  ;;  %v2647_v38 = vadd.s32 4294967169, %v1200_v39 }
  0xfb   :  { %v879_v40 = vxor.u32 2147483648, %v873_v30  ;;  %v883_v15 = vsel %vm881_vm1, %v882_v41, %v873_v30  ;;  %vm3492_vm11 = vcmp.le.f32.partialorder %v886_v49, 0.7853982  ;;  %v1010_v42 = vsub.s32 4, %v3438_v14 }
  0xfc   :  { %v2642_v47 = vadd.s32 4294967294, %v992_v12  ;;  %v1095_v10 = vmul.u32 %v1093_v26, %v1090_v9  ;;  %v1114_v4 = vand.u32 65535, %v1084_v24  ;;  %v1077_v17 = vsel %vm1073_vm5, %v1057_v6, %v1060_v54 }
  0xfd   :  { %v880_v8 = vsel %vm878_vm2, %v865_v27, %v879_v40  ;;  %v1096_v43 = vmul.u32 %v1092_v28, %v1091_v5  ;;  %v1094_v49 = vmul.u32 %v1092_v28, %v1090_v9  ;;  %v1115_v27 = vshrl.u32 %v1084_v24, 16 }
  0xfe   :  { %v884_v7 = vsel %vm877_vm4, %v880_v8, %v883_v15  ;;  %vm2643_vm12 = vcmp.lt.s32.totalorder %v2642_v47, 0  ;;  %v1098_v50 = vshll.u32 %v1095_v10, 16  ;;  %v1011_v51 = vsel %vm888_vm10, %v1010_v42, %v3438_v14 }
  0xff   :  { %v885_v48 = vsel %vm874_vm6, nan, %v884_v7  ;;  %v995_v39 = vsel %vm2643_vm12, 0, %v2642_v47  ;;  %v1078_v54 = vsel %vm1076_vm3, %v3443_v34, 2102212464  ;;  %v1097_v13 = vmul.u32 %v1093_v26, %v1091_v5 }
 0x100   :  { %v996_v19 = vsub.s32 32, %v995_v39  ;;  %v997_v45 = vshll.u32 %v988_v11, %v995_v39  ;;  %v1000_v3 = vsub.s32 4294967266, %v995_v39  ;;  %2595 = vst [vmem:[#allocation5 + $0x20] sm:$0xff] %v885_v48  ;;  %v1118_v30 = vmul.u32 %v1114_v4, %v1091_v5 }
 0x101   :  { %v1100_v52 = vshll.u32 %v1096_v43, 16  ;;  %v1116_v16 = vmul.u32 %v1114_v4, %v1090_v9  ;;  %v1099_v12 = vshrl.u32 %v1095_v10, 16  ;;  %vm1102_vm13 = vc.u32 %v1094_v49, %v1098_v50 }
 0x102   :  { %v998_v55 = vshrl.u32 %v980_v21, %v996_v19  ;;  %v1001_v41 = vadd.s32 127, %v1000_v3  ;;  %v1104_v11 = vadd.s32 %v1098_v50, %v1094_v49  ;;  %v1117_v6 = vmul.u32 %v1115_v27, %v1090_v9 }
 0x103   :  { %v1103_v15 = vsel %vm1102_vm13, 1, %v2746_v23  ;;  %v1119_v28 = vmul.u32 %v1115_v27, %v1091_v5  ;;  %v1122_v24 = vshll.u32 %v1118_v30, 16  ;;  %v1013_v21 = vsel %vm3492_vm11, 0, %v1011_v51 }
 0x104   :  { %v999_v44 = vor.u32 %v998_v55, %v997_v45  ;;  %v1002_v40 = vshll.u32 %v1001_v41, 23  ;;  %v1105_v14 = vadd.s32 %v1103_v15, %v1097_v13  ;;  %vm1106_vm14 = vc.u32 %v1104_v11, %v1100_v52 }
 0x105   :  { %v1120_v47 = vshll.u32 %v1117_v6, 16  ;;  %v1107_v8 = vsel %vm1106_vm14, 1, %v2746_v23  ;;  %v1079_v9 = vsel %vm1075_vm7, %v3441_v25, %v1078_v54  ;;  %v1101_v5 = vshrl.u32 %v1096_v43, 16 }
 0x106   :  { %v1003_v34 = vor.u32 4788187, %v1002_v40  ;;  %v1006_v26 = vcvt.s32.f32 %v999_v44  ;;  %v1109_v42 = vadd.s32 %v1107_v8, %v1105_v14  ;;  %v1206_v48 = vadd.s32 1, %v2647_v38 }
 0x107   :  { %vm1124_vm15 = vc.u32 %v1116_v16, %v1120_v47  ;;  %v1126_v10 = vadd.s32 %v1120_v47, %v1116_v16  ;;  %v1121_v49 = vshrl.u32 %v1117_v6, 16  ;;  %v1030_v45 = vadd.s32 3, %v1013_v21 }
 0x108   :  { %v1004_v4 = vand.u32 2147483647, %v1003_v34  ;;  %v1125_v7 = vsel %vm1124_vm15, 1, %v2746_v23  ;;  %v1110_v39 = vadd.s32 %v1109_v42, %v1099_v12  ;;  %vm1207_vm1 = vcmp.gt.s32.totalorder %v1206_v48, 0 }
 0x109   :  { %v1127_v27 = vadd.s32 %v1125_v7, %v1119_v28  ;;  %vm1128_vm0 = vc.u32 %v1126_v10, %v1122_v24  ;;  %v1080_v25 = vsel %vm1074_vm8, %v1077_v17, %v1079_v9  ;;  %v1123_v50 = vshrl.u32 %v1118_v30, 16 }
 0x10a   :  { %v1007_v19 = vmul.f32 %v1006_v26, %v1004_v4  ;;  %v1129_v3 = vsel %vm1128_vm0, 1, %v2746_v23  ;;  %v1208_v54 = vsel %vm1207_vm1, %v1206_v48, 0  ;;  %v3520_v43 = vadd.s32 %v1110_v39, %v1101_v5 }
 0x10b   :  { %v1131_v51 = vadd.s32 %v1129_v3, %v1127_v27  ;;  %v3522_v55 = vadd.s32 %v1126_v10, %v1122_v24  ;;  %v1210_v38 = vand.u32 31, %v1208_v54  ;;  %v3526_v16 = vand.u32 3, %v1030_v45 }
 0x10c   :  { %v1008_v13 = vxor.u32 2147483648, %v1007_v19  ;;  %v1204_v12 = vor.u32 8388608, %v3463_v36  ;;  %v1134_v30 = vmul.u32 %v3452_v20, %v1080_v25  ;;  %v3533_v6 = vshrl.u32 %v1208_v54, 5 }
 0x10d   :  { %v1132_v41 = vadd.s32 %v1131_v51, %v1121_v49  ;;  %v1211_v11 = vsub.s32 32, %v1210_v38  ;;  %vm1136_vm2 = vc.u32 %v3520_v43, %v3522_v55  ;;  %v1216_v40 = vshll.u32 %v2741_v31, %v1210_v38 }
 0x10e   :  { %v1009_v52 = vsel %vm888_vm10, %v1008_v13, %v1007_v19  ;;  %v1222_v15 = vshll.u32 %v2743_v35, %v1210_v38  ;;  %v1225_v18 = vshll.u32 %v2744_v37, %v1210_v38  ;;  %v1219_v20 = vshll.u32 %v2742_v33, %v1210_v38 }
 0x10f   :  { %v1012_v53 = vsel %vm3492_vm11, %v2773_v56, %v1009_v52  ;;  %v1133_v17 = vadd.s32 %v1132_v41, %v1123_v50  ;;  %v1217_v36 = vshrl.u32 %v2742_v33, %v1211_v11  ;;  %v1223_v14 = vshrl.u32 %v2744_v37, %v1211_v11 }
 0x110   :  { %v1014_v44 = vmul.f32 %v1012_v53, %v1012_v53  ;;  %v1220_v34 = vshrl.u32 %v2743_v35, %v1211_v11  ;;  %v1213_v21 = vshll.u32 %v2740_v29, %v1210_v38  ;;  %v1214_v8 = vshrl.u32 %v2741_v31, %v1211_v11 }
 0x111   :  { %v1137_v28 = vadd.s32 1, %v1133_v17  ;;  %v1226_v9 = vshrl.u32 %v2745_v46, %v1211_v11  ;;  %v3547_v5 = vor.u32 %v1217_v36, %v1216_v40  ;;  %v1224_v7 = vor.u32 %v1223_v14, %v1222_v15 }
 0x112   :  { %v1015_v47 = vmul.f32 -0.001358992, %v1014_v44  ;;  %v1022_v24 = vmul.f32 -0.00019511016, %v1014_v44  ;;  %v1221_v19 = vor.u32 %v1220_v34, %v1219_v20  ;;  %vm1033_vm3 = vcmp.eq.s32.totalorder %v3526_v16, 0 }
 0x113   :  { %v1138_v26 = vsel %vm1136_vm2, %v1137_v28, %v1133_v17  ;;  %v1227_v48 = vor.u32 %v1226_v9, %v1225_v18  ;;  %v1215_v45 = vor.u32 %v1214_v8, %v1213_v21  ;;  %vm1228_vm4 = vcmp.lt.s32.totalorder %v3533_v6, 1 }
 0x114   :  { %v1016_v42 = vadd.f32 0.041655596, %v1015_v47  ;;  %v1023_v10 = vadd.f32 0.008332121, %v1022_v24  ;;  %v1139_v4 = vadd.s32 %v1138_v26, %v1134_v30  ;;  %vm1231_vm5 = vcmp.lt.s32.totalorder %v3533_v6, 4 }
 0x115   :  { %v3552_v3 = vshll.u32 %v1204_v12, 8  ;;  %vm1032_vm6 = vcmp.lt.s32.totalorder %v3526_v16, 2  ;;  %vm1230_vm7 = vcmp.lt.s32.totalorder %v3533_v6, 3  ;;  %vm1029_vm8 = vweird.f32 %v2773_v56 }
 0x116   :  { %v1017_v39 = vmul.f32 %v1016_v42, %v1014_v44  ;;  %v1024_v49 = vmul.f32 %v1023_v10, %v1014_v44  ;;  %v1140_v27 = vadd.s32 536870912, %v1139_v4  ;;  %vm1036_vm9 = vcmp.eq.s32.totalorder %v3526_v16, 2 }
 0x117   :  { %vm1229_vm10 = vcmp.lt.s32.totalorder %v3533_v6, 2  ;;  %v1237_v54 = vsel %vm1231_vm5, %v1224_v7, 920167782  ;;  %v1241_v13 = vsel %vm1231_vm5, %v1227_v48, 1326507024  ;;  %v1240_v12 = vsel %vm1228_vm4, %v3547_v5, %v1221_v19 }
 0x118   :  { %v1018_v25 = vadd.f32 -0.4999988, %v1017_v39  ;;  %v1025_v50 = vadd.f32 -0.16666654, %v1024_v49  ;;  %v3555_v51 = vshrl.u32 %v1140_v27, 30  ;;  %v1212_v17 = vshrl.u32 %v2740_v29, %v1211_v11 }
 0x119   :  { %v1236_v30 = vsel %vm1228_vm4, %v1215_v45, %v3547_v5  ;;  %v1242_v40 = vsel %vm1230_vm7, %v1224_v7, %v1241_v13  ;;  %v1245_v15 = vand.u32 65535, %v3552_v3  ;;  %v1238_v14 = vsel %vm1230_vm7, %v1221_v19, %v1237_v54 }
 0x11a   :  { %v1019_v38 = vmul.f32 %v1018_v25, %v1014_v44  ;;  %v1026_v41 = vmul.f32 %v1025_v50, %v1014_v44  ;;  %v1142_v52 = vshll.u32 %v3555_v51, 30  ;;  %v1135_v18 = vadd.s32 %v3522_v55, %v3520_v43 }
 0x11b   :  { %v1243_v11 = vsel %vm1229_vm10, %v1240_v12, %v1242_v40  ;;  %v1246_v47 = vshrl.u32 %v3552_v3, 16  ;;  %v1351_v24 = vand.u32 2147483647, %v2779_v59  ;;  %v1239_v21 = vsel %vm1229_vm10, %v1236_v30, %v1238_v14 }
 0x11c   :  { %v1020_v28 = vadd.f32 1.0, %v1019_v38  ;;  %v1027_v36 = vadd.f32 1.0, %v1026_v41  ;;  %v1143_v44 = vsub.s32 %v1139_v4, %v1142_v52  ;;  %v1247_v8 = vand.u32 65535, %v1243_v11 }
 0x11d   :  { %v1248_v9 = vshrl.u32 %v1243_v11, 16  ;;  %v1354_v42 = vand.u32 2139095040, %v2779_v59  ;;  %v1232_v4 = vsel %vm1228_vm4, %v1212_v17, %v1215_v45  ;;  %vm1043_vm12 = vcmp.lt.s32.totalorder %v2775_v57, 0 }
 0x11e   :  { %v1028_v20 = vmul.f32 %v1027_v36, %v1012_v53  ;;  %v1037_v34 = vxor.u32 2147483648, %v1020_v28  ;;  %vm1144_vm11 = vcmp.lt.s32.totalorder %v1143_v44, 0  ;;  %v1145_v26 = vsub.s32 0, %v1143_v44 }
 0x11f   :  { %v1249_v53 = vmul.u32 %v1247_v8, %v1245_v15  ;;  %v1250_v48 = vmul.u32 %v1248_v9, %v1245_v15  ;;  %v1251_v39 = vmul.u32 %v1247_v8, %v1246_v47  ;;  %v1233_v27 = vsel %vm1231_vm5, %v1221_v19, 2102212464 }
 0x120   :  { %v1034_v10 = vxor.u32 2147483648, %v1028_v20  ;;  %v1038_v43 = vsel %vm1036_vm9, %v1037_v34, %v1028_v20  ;;  %v1146_v55 = vsel %vm1144_vm11, %v1145_v26, %v1143_v44  ;;  %v1269_v25 = vand.u32 65535, %v1239_v21 }
 0x121   :  { %v1147_v7 = vclz %v1146_v55  ;;  %v1270_v50 = vshrl.u32 %v1239_v21, 16  ;;  %v1252_v38 = vmul.u32 %v1248_v9, %v1246_v47  ;;  %v1253_v45 = vshll.u32 %v1250_v48, 16 }
 0x122   :  { %v1035_v49 = vsel %vm1033_vm3, %v1020_v28, %v1034_v10  ;;  %v1165_v52 = vsub.s32 4, %v3555_v51  ;;  %v1255_v12 = vshll.u32 %v1251_v39, 16  ;;  %v1355_v17 = vshrl.u32 %v1354_v42, 23 }
 0x123   :  { %v1039_v54 = vsel %vm1032_vm6, %v1035_v49, %v1038_v43  ;;  %v2645_v13 = vadd.s32 4294967294, %v1147_v7  ;;  %v1234_v19 = vsel %vm1230_vm7, %v3547_v5, %v1233_v27  ;;  %vm1257_vm14 = vc.u32 %v1249_v53, %v1253_v45 }
 0x124   :  { %v1040_v41 = vsel %vm1029_vm8, nan, %v1039_v54  ;;  %v1259_v30 = vadd.s32 %v1253_v45, %v1249_v53  ;;  %vm3606_vm15 = vcmp.le.f32.partialorder %v1041_v32, 0.7853982  ;;  %v1258_v40 = vsel %vm1257_vm14, 1, %v2746_v23 }
 0x125   :  { %vm2646_vm13 = vcmp.lt.s32.totalorder %v2645_v13, 0  ;;  %2596 = vst [vmem:[#allocation5 + $0x28] sm:$0xff] %v1040_v41  ;;  %v1272_v28 = vmul.u32 %v1270_v50, %v1245_v15  ;;  %v1273_v36 = vmul.u32 %v1269_v25, %v1246_v47  ;;  %v1260_v34 = vadd.s32 %v1258_v40, %v1252_v38 }
 0x126   :  { %v1150_v56 = vsel %vm2646_vm13, 0, %v2645_v13  ;;  %v1254_v26 = vshrl.u32 %v1250_v48, 16  ;;  %vm1261_vm0 = vc.u32 %v1259_v30, %v1255_v12  ;;  %v1271_v5 = vmul.u32 %v1269_v25, %v1245_v15 }
 0x127   :  { %v1151_v14 = vsub.s32 32, %v1150_v56  ;;  %v1152_v11 = vshll.u32 %v1143_v44, %v1150_v56  ;;  %v1155_v20 = vsub.s32 4294967266, %v1150_v56  ;;  %v2650_v21 = vadd.s32 4294967169, %v1355_v17 }
 0x128   :  { %v1256_v42 = vshrl.u32 %v1251_v39, 16  ;;  %v1262_v32 = vsel %vm1261_vm0, 1, %v2746_v23  ;;  %v1274_v43 = vmul.u32 %v1270_v50, %v1246_v47  ;;  %v1275_v55 = vshll.u32 %v1272_v28, 16 }
 0x129   :  { %v1153_v8 = vshrl.u32 %v1135_v18, %v1151_v14  ;;  %v1156_v9 = vadd.s32 127, %v1155_v20  ;;  %v1264_v10 = vadd.s32 %v1262_v32, %v1260_v34  ;;  %v1277_v7 = vshll.u32 %v1273_v36, 16 }
 0x12a   :  { %v1166_v44 = vsel %vm1043_vm12, %v1165_v52, %v3555_v51  ;;  %v1235_v48 = vsel %vm1229_vm10, %v1232_v4, %v1234_v19  ;;  %vm1279_vm1 = vc.u32 %v1271_v5, %v1275_v55  ;;  %v1281_v18 = vadd.s32 %v1275_v55, %v1271_v5 }
 0x12b   :  { %v1154_v53 = vor.u32 %v1153_v8, %v1152_v11  ;;  %v1157_v49 = vshll.u32 %v1156_v9, 23  ;;  %v1265_v15 = vadd.s32 %v1264_v10, %v1254_v26  ;;  %v1361_v27 = vadd.s32 1, %v2650_v21 }
 0x12c   :  { %v1276_v54 = vshrl.u32 %v1272_v28, 16  ;;  %v1280_v47 = vsel %vm1279_vm1, 1, %v2746_v23  ;;  %vm1283_vm2 = vc.u32 %v1281_v18, %v1277_v7  ;;  %v3620_v38 = vadd.s32 %v1281_v18, %v1277_v7 }
 0x12d   :  { %v1158_v39 = vor.u32 4788187, %v1157_v49  ;;  %v1161_v25 = vcvt.s32.f32 %v1154_v53  ;;  %v3618_v50 = vadd.s32 %v1265_v15, %v1256_v42  ;;  %v1282_v13 = vadd.s32 %v1280_v47, %v1274_v43 }
 0x12e   :  { %v1168_v6 = vsel %vm3606_vm15, 0, %v1166_v44  ;;  %v1284_v51 = vsel %vm1283_vm2, 1, %v2746_v23  ;;  %vm1362_vm3 = vcmp.gt.s32.totalorder %v1361_v27, 0  ;;  %v1278_v4 = vshrl.u32 %v1273_v36, 16 }
 0x12f   :  { %v1159_v45 = vand.u32 2147483647, %v1158_v39  ;;  %v1286_v41 = vadd.s32 %v1284_v51, %v1282_v13  ;;  %v1363_v52 = vsel %vm1362_vm3, %v1361_v27, 0  ;;  %v1289_v17 = vmul.u32 %v3552_v3, %v1235_v48 }
 0x130   :  { %v1365_v19 = vand.u32 31, %v1363_v52  ;;  %v1185_v30 = vadd.s32 3, %v1168_v6  ;;  %vm1291_vm4 = vc.u32 %v3618_v50, %v3620_v38  ;;  %v1358_v40 = vand.u32 8388607, %v1351_v24 }
 0x131   :  { %v1162_v12 = vmul.f32 %v1161_v25, %v1159_v45  ;;  %v1287_v56 = vadd.s32 %v1286_v41, %v1276_v54  ;;  %v3630_v14 = vshrl.u32 %v1363_v52, 5  ;;  %vm1198_vm11 = vcmp.lt.s32.totalorder %v2777_v58, 0 }
 0x132   :  { %v1366_v11 = vsub.s32 32, %v1365_v19  ;;  %v1368_v36 = vshll.u32 %v2740_v29, %v1365_v19  ;;  %v1371_v34 = vshll.u32 %v2741_v31, %v1365_v19  ;;  %v1374_v3 = vshll.u32 %v2742_v33, %v1365_v19 }
 0x133   :  { %v1163_v28 = vxor.u32 2147483648, %v1162_v12  ;;  %v1288_v20 = vadd.s32 %v1287_v56, %v1278_v4  ;;  %v1377_v26 = vshll.u32 %v2743_v35, %v1365_v19  ;;  %v1380_v9 = vshll.u32 %v2744_v37, %v1365_v19 }
 0x134   :  { %v1369_v21 = vshrl.u32 %v2741_v31, %v1366_v11  ;;  %v1372_v8 = vshrl.u32 %v2742_v33, %v1366_v11  ;;  %v1375_v10 = vshrl.u32 %v2743_v35, %v1366_v11  ;;  %v1378_v43 = vshrl.u32 %v2744_v37, %v1366_v11 }
 0x135   :  { %v1164_v5 = vsel %vm1043_vm12, %v1163_v28, %v1162_v12  ;;  %v1292_v32 = vadd.s32 1, %v1288_v20  ;;  %v3646_v7 = vand.u32 3, %v1185_v30  ;;  %v1381_v53 = vshrl.u32 %v2745_v46, %v1366_v11 }
 0x136   :  { %v1167_v42 = vsel %vm3606_vm15, %v2775_v57, %v1164_v5  ;;  %v1359_v44 = vor.u32 8388608, %v1358_v40  ;;  %v3652_v48 = vor.u32 %v1369_v21, %v1368_v36  ;;  %v1379_v15 = vor.u32 %v1378_v43, %v1377_v26 }
 0x137   :  { %v1169_v55 = vmul.f32 %v1167_v42, %v1167_v42  ;;  %v1293_v49 = vsel %vm1291_vm4, %v1292_v32, %v1288_v20  ;;  %v3654_v39 = vor.u32 %v1372_v8, %v1371_v34  ;;  %v1376_v25 = vor.u32 %v1375_v10, %v1374_v3 }
 0x138   :  { %v1294_v27 = vadd.s32 %v1293_v49, %v1289_v17  ;;  %v1382_v54 = vor.u32 %v1381_v53, %v1380_v9  ;;  %vm1383_vm5 = vcmp.lt.s32.totalorder %v3630_v14, 1  ;;  %vm1385_vm6 = vcmp.lt.s32.totalorder %v3630_v14, 3 }
 0x139   :  { %v1170_v16 = vmul.f32 -0.001358992, %v1169_v55  ;;  %v1177_v18 = vmul.f32 -0.00019511016, %v1169_v55  ;;  %vm1386_vm7 = vcmp.lt.s32.totalorder %v3630_v14, 4  ;;  %vm1384_vm8 = vcmp.lt.s32.totalorder %v3630_v14, 2 }
 0x13a   :  { %v1295_v45 = vadd.s32 536870912, %v1294_v27  ;;  %v1392_v6 = vsel %vm1386_vm7, %v1379_v15, 920167782  ;;  %v3662_v51 = vshll.u32 %v1359_v44, 8  ;;  %v1391_v12 = vsel %vm1383_vm5, %v3652_v48, %v3654_v39 }
 0x13b   :  { %v1171_v47 = vadd.f32 0.041655596, %v1170_v16  ;;  %v1178_v13 = vadd.f32 0.008332121, %v1177_v18  ;;  %vm1188_vm9 = vcmp.eq.s32.totalorder %v3646_v7, 0  ;;  %v1393_v17 = vsel %vm1385_vm6, %v1376_v25, %v1392_v6 }
 0x13c   :  { %v1296_v52 = vshrl.u32 %v1295_v45, 30  ;;  %v1396_v19 = vsel %vm1386_vm7, %v1382_v54, 1326507024  ;;  %vm1187_vm10 = vcmp.lt.s32.totalorder %v3646_v7, 2  ;;  %v1395_v28 = vsel %vm1383_vm5, %v3654_v39, %v1376_v25 }
 0x13d   :  { %v1172_v4 = vmul.f32 %v1171_v47, %v1169_v55  ;;  %v1179_v41 = vmul.f32 %v1178_v13, %v1169_v55  ;;  %vm1184_vm12 = vweird.f32 %v2775_v57  ;;  %vm1191_vm13 = vcmp.eq.s32.totalorder %v3646_v7, 2 }
 0x13e   :  { %v1297_v40 = vshll.u32 %v1296_v52, 30  ;;  %v1290_v36 = vadd.s32 %v3620_v38, %v3618_v50  ;;  %v1394_v20 = vsel %vm1384_vm8, %v1391_v12, %v1393_v17  ;;  %v1397_v34 = vsel %vm1385_vm6, %v1379_v15, %v1396_v19 }
 0x13f   :  { %v1173_v30 = vadd.f32 -0.4999988, %v1172_v4  ;;  %v1180_v56 = vadd.f32 -0.16666654, %v1179_v41  ;;  %v1400_v21 = vand.u32 65535, %v3662_v51  ;;  %v1367_v8 = vshrl.u32 %v2740_v29, %v1366_v11 }
 0x140   :  { %v1298_v5 = vsub.s32 %v1294_v27, %v1297_v40  ;;  %v1398_v9 = vsel %vm1384_vm8, %v1395_v28, %v1397_v34  ;;  %v1401_v32 = vshrl.u32 %v3662_v51, 16  ;;  %v1425_v10 = vshrl.u32 %v1394_v20, 16 }
 0x141   :  { %v1174_v3 = vmul.f32 %v1173_v30, %v1169_v55  ;;  %v1181_v26 = vmul.f32 %v1180_v56, %v1169_v55  ;;  %v1320_v53 = vsub.s32 4, %v1296_v52  ;;  %v1402_v49 = vand.u32 65535, %v1398_v9 }
 0x142   :  { %vm1299_vm14 = vcmp.lt.s32.totalorder %v1298_v5, 0  ;;  %v1300_v43 = vsub.s32 0, %v1298_v5  ;;  %v1403_v44 = vshrl.u32 %v1398_v9, 16  ;;  %v1509_v55 = vand.u32 2139095040, %v2781_v60 }
 0x143   :  { %v1175_v50 = vadd.f32 1.0, %v1174_v3  ;;  %v1182_v38 = vadd.f32 1.0, %v1181_v26  ;;  %v1424_v27 = vand.u32 65535, %v1394_v20  ;;  %vm3694_vm15 = vcmp.le.f32.partialorder %v1196_v22, 0.7853982 }
 0x144   :  { %v1301_v18 = vsel %vm1299_vm14, %v1300_v43, %v1298_v5  ;;  %v1404_v47 = vmul.u32 %v1402_v49, %v1400_v21  ;;  %v1405_v13 = vmul.u32 %v1403_v44, %v1400_v21  ;;  %v1406_v45 = vmul.u32 %v1402_v49, %v1401_v32 }
 0x145   :  { %v1183_v15 = vmul.f32 %v1182_v38, %v1167_v42  ;;  %v1192_v16 = vxor.u32 2147483648, %v1175_v50  ;;  %v1302_v54 = vclz %v1301_v18  ;;  %v1387_v42 = vsel %vm1383_vm5, %v1367_v8, %v3652_v48 }
 0x146   :  { %v1427_v41 = vmul.u32 %v1425_v10, %v1400_v21  ;;  %v1321_v22 = vsel %vm1198_vm11, %v1320_v53, %v1296_v52  ;;  %v1388_v17 = vsel %vm1386_vm7, %v1376_v25, 2102212464  ;;  %v1408_v19 = vshll.u32 %v1405_v13, 16 }
 0x147   :  { %v1189_v6 = vxor.u32 2147483648, %v1183_v15  ;;  %v1193_v4 = vsel %vm1191_vm13, %v1192_v16, %v1183_v15  ;;  %v2648_v12 = vadd.s32 4294967294, %v1302_v54  ;;  %v1407_v56 = vmul.u32 %v1403_v44, %v1401_v32 }
 0x148   :  { %v1426_v40 = vmul.u32 %v1424_v27, %v1400_v21  ;;  %v1428_v28 = vmul.u32 %v1424_v27, %v1401_v32  ;;  %v1410_v48 = vshll.u32 %v1406_v45, 16  ;;  %vm1412_vm1 = vc.u32 %v1404_v47, %v1408_v19 }
 0x149   :  { %v1190_v30 = vsel %vm1188_vm9, %v1175_v50, %v1189_v6  ;;  %vm2649_vm0 = vcmp.lt.s32.totalorder %v2648_v12, 0  ;;  %v1413_v3 = vsel %vm1412_vm1, 1, %v2746_v23  ;;  %v1430_v25 = vshll.u32 %v1427_v41, 16 }
 0x14a   :  { %v1194_v20 = vsel %vm1187_vm10, %v1190_v30, %v1193_v4  ;;  %v1305_v52 = vsel %vm2649_vm0, 0, %v2648_v12  ;;  %v1414_v50 = vadd.s32 %v1408_v19, %v1404_v47  ;;  %v1389_v7 = vsel %vm1385_vm6, %v3654_v39, %v1388_v17 }
 0x14b   :  { %v1195_v34 = vsel %vm1184_vm12, nan, %v1194_v20  ;;  %v1306_v26 = vsub.s32 32, %v1305_v52  ;;  %v1307_v8 = vshll.u32 %v1298_v5, %v1305_v52  ;;  %v1310_v9 = vsub.s32 4294967266, %v1305_v52 }
 0x14c   :  { %2597 = vst [vmem:[#allocation5 + $0x30] sm:$0xff] %v1195_v34  ;;  %v1415_v21 = vadd.s32 %v1413_v3, %v1407_v56  ;;  %v1429_v38 = vmul.u32 %v1425_v10, %v1401_v32  ;;  %v1510_v43 = vshrl.u32 %v1509_v55, 23  ;;  %v1409_v57 = vshrl.u32 %v1405_v13, 16 }
 0x14d   :  { %v1308_v53 = vshrl.u32 %v1290_v36, %v1306_v26  ;;  %v1311_v49 = vadd.s32 127, %v1310_v9  ;;  %vm1416_vm2 = vc.u32 %v1414_v50, %v1410_v48  ;;  %v1323_v44 = vsel %vm3694_vm15, 0, %v1321_v22 }
 0x14e   :  { %v1417_v15 = vsel %vm1416_vm2, 1, %v2746_v23  ;;  %v1432_v5 = vshll.u32 %v1428_v28, 16  ;;  %vm1434_vm3 = vc.u32 %v1426_v40, %v1430_v25  ;;  %v1411_v39 = vshrl.u32 %v1406_v45, 16 }
 0x14f   :  { %v1309_v16 = vor.u32 %v1308_v53, %v1307_v8  ;;  %v1312_v18 = vshll.u32 %v1311_v49, 23  ;;  %v1419_v27 = vadd.s32 %v1417_v15, %v1415_v21  ;;  %v1435_v54 = vsel %vm1434_vm3, 1, %v2746_v23 }
 0x150   :  { %v1436_v47 = vadd.s32 %v1430_v25, %v1426_v40  ;;  %v1437_v32 = vadd.s32 %v1435_v54, %v1429_v38  ;;  %v2653_v10 = vadd.s32 4294967169, %v1510_v43  ;;  %v1506_v6 = vand.u32 2147483647, %v2781_v60 }
 0x151   :  { %v1313_v36 = vor.u32 4788187, %v1312_v18  ;;  %v1316_v55 = vcvt.s32.f32 %v1309_v16  ;;  %v1420_v13 = vadd.s32 %v1419_v27, %v1409_v57  ;;  %v1390_v4 = vsel %vm1384_vm8, %v1387_v42, %v1389_v7 }
 0x152   :  { %v1431_v12 = vshrl.u32 %v1427_v41, 16  ;;  %vm1438_vm4 = vc.u32 %v1436_v47, %v1432_v5  ;;  %v1516_v22 = vadd.s32 1, %v2653_v10  ;;  %v1340_v19 = vadd.s32 3, %v1323_v44 }
 0x153   :  { %v1314_v17 = vand.u32 2147483647, %v1313_v36  ;;  %v1433_v30 = vshrl.u32 %v1428_v28, 16  ;;  %v1439_v56 = vsel %vm1438_vm4, 1, %v2746_v23  ;;  %v1421_v45 = vadd.s32 %v1420_v13, %v1411_v39 }
 0x154   :  { %v1440_v40 = vadd.s32 %v1436_v47, %v1432_v5  ;;  %v1441_v20 = vadd.s32 %v1439_v56, %v1437_v32  ;;  %vm1517_vm5 = vcmp.gt.s32.totalorder %v1516_v22, 0  ;;  %v3725_v26 = vand.u32 3, %v1340_v19 }
 0x155   :  { %v1317_v48 = vmul.f32 %v1316_v55, %v1314_v17  ;;  %v1518_v34 = vsel %vm1517_vm5, %v1516_v22, 0  ;;  %v1444_v14 = vmul.u32 %v3662_v51, %v1390_v4  ;;  %v1513_v41 = vand.u32 8388607, %v1506_v6 }
 0x156   :  { %v1442_v52 = vadd.s32 %v1441_v20, %v1431_v12  ;;  %v1520_v3 = vand.u32 31, %v1518_v34  ;;  %vm1446_vm6 = vc.u32 %v1421_v45, %v1440_v40  ;;  %v3732_v9 = vshrl.u32 %v1518_v34, 5 }
 0x157   :  { %v1318_v25 = vxor.u32 2147483648, %v1317_v48  ;;  %v1514_v39 = vor.u32 8388608, %v1513_v41  ;;  %v1661_v10 = vand.u32 2147483647, %v2783_v61  ;;  %vm1346_vm7 = vcmp.eq.s32.totalorder %v3725_v26, 2 }
 0x158   :  { %v1443_v42 = vadd.s32 %v1442_v52, %v1433_v30  ;;  %v1521_v28 = vsub.s32 32, %v1520_v3  ;;  %v1523_v50 = vshll.u32 %v2740_v29, %v1520_v3  ;;  %v1526_v7 = vshll.u32 %v2741_v31, %v1520_v3 }
 0x159   :  { %v1319_v8 = vsel %vm1198_vm11, %v1318_v25, %v1317_v48  ;;  %v1532_v43 = vshll.u32 %v2743_v35, %v1520_v3  ;;  %v1529_v57 = vshll.u32 %v2742_v33, %v1520_v3  ;;  %v1535_v11 = vshll.u32 %v2744_v37, %v1520_v3 }
 0x15a   :  { %v3739_v21 = vsel %vm3694_vm15, %v2777_v58, %v1319_v8  ;;  %v1447_v51 = vadd.s32 1, %v1443_v42  ;;  %v1524_v38 = vshrl.u32 %v2741_v31, %v1521_v28  ;;  %v1527_v49 = vshrl.u32 %v2742_v33, %v1521_v28 }
 0x15b   :  { %v1324_v53 = vmul.f32 %v3739_v21, %v3739_v21  ;;  %v1533_v44 = vshrl.u32 %v2744_v37, %v1521_v28  ;;  %v1530_v5 = vshrl.u32 %v2743_v35, %v1521_v28  ;;  %v1536_v16 = vshrl.u32 %v2745_v46, %v1521_v28 }
 0x15c   :  { %v1448_v15 = vsel %vm1446_vm6, %v1447_v51, %v1443_v42  ;;  %v1525_v47 = vor.u32 %v1524_v38, %v1523_v50  ;;  %v1528_v4 = vor.u32 %v1527_v49, %v1526_v7  ;;  %vm1538_vm8 = vcmp.lt.s32.totalorder %v3732_v9, 1 }
 0x15d   :  { %v1325_v18 = vmul.f32 -0.001358992, %v1324_v53  ;;  %v1332_v27 = vmul.f32 -0.00019511016, %v1324_v53  ;;  %v1449_v54 = vadd.s32 %v1448_v15, %v1444_v14  ;;  %v1534_v32 = vor.u32 %v1533_v44, %v1532_v43 }
 0x15e   :  { %v1531_v12 = vor.u32 %v1530_v5, %v1529_v57  ;;  %v1537_v22 = vor.u32 %v1536_v16, %v1535_v11  ;;  %vm1541_vm9 = vcmp.lt.s32.totalorder %v3732_v9, 4  ;;  %vm1540_vm10 = vcmp.lt.s32.totalorder %v3732_v9, 3 }
 0x15f   :  { %v1326_v36 = vadd.f32 0.041655596, %v1325_v18  ;;  %v1333_v55 = vadd.f32 0.008332121, %v1332_v27  ;;  %v1450_v13 = vadd.s32 536870912, %v1449_v54  ;;  %vm1343_vm11 = vcmp.eq.s32.totalorder %v3725_v26, 0 }
 0x160   :  { %vm1539_vm12 = vcmp.lt.s32.totalorder %v3732_v9, 2  ;;  %v1547_v56 = vsel %vm1541_vm9, %v1534_v32, 920167782  ;;  %v3762_v20 = vshll.u32 %v1514_v39, 8  ;;  %v1664_v48 = vand.u32 2139095040, %v2783_v61 }
 0x161   :  { %v1327_v17 = vmul.f32 %v1326_v36, %v1324_v53  ;;  %v1334_v19 = vmul.f32 %v1333_v55, %v1324_v53  ;;  %v3755_v30 = vshrl.u32 %v1450_v13, 30  ;;  %vm1342_vm13 = vcmp.lt.s32.totalorder %v3725_v26, 2 }
 0x162   :  { %v1546_v25 = vsel %vm1538_vm8, %v1525_v47, %v1528_v4  ;;  %vm1339_vm14 = vweird.f32 %v2777_v58  ;;  %v1445_v14 = vadd.s32 %v1440_v40, %v1421_v45  ;;  %v1548_v42 = vsel %vm1540_vm10, %v1531_v12, %v1547_v56 }
 0x163   :  { %v1328_v34 = vadd.f32 -0.4999988, %v1327_v17  ;;  %v1335_v52 = vadd.f32 -0.16666654, %v1334_v19  ;;  %v1452_v3 = vshll.u32 %v3755_v30, 30  ;;  %v1556_v8 = vshrl.u32 %v3762_v20, 16 }
 0x164   :  { %v1551_v41 = vsel %vm1541_vm9, %v1537_v22, 1326507024  ;;  %v1550_v38 = vsel %vm1538_vm8, %v1528_v4, %v1531_v12  ;;  %v1522_v43 = vshrl.u32 %v2740_v29, %v1521_v28  ;;  %v1543_v49 = vsel %vm1541_vm9, %v1531_v12, 2102212464 }
 0x165   :  { %v1329_v50 = vmul.f32 %v1328_v34, %v1324_v53  ;;  %v1336_v7 = vmul.f32 %v1335_v52, %v1324_v53  ;;  %v1453_v51 = vsub.s32 %v1449_v54, %v1452_v3  ;;  %v1549_v45 = vsel %vm1539_vm12, %v1546_v25, %v1548_v42 }
 0x166   :  { %v1552_v40 = vsel %vm1540_vm10, %v1534_v32, %v1551_v41  ;;  %vm1353_vm0 = vcmp.lt.s32.totalorder %v2779_v59, 0  ;;  %v1555_v28 = vand.u32 65535, %v3762_v20  ;;  %v1580_v5 = vshrl.u32 %v1549_v45, 16 }
 0x167   :  { %v1330_v57 = vadd.f32 1.0, %v1329_v50  ;;  %v1337_v44 = vadd.f32 1.0, %v1336_v7  ;;  %vm1454_vm15 = vcmp.lt.s32.totalorder %v1453_v51, 0  ;;  %v1455_v15 = vsub.s32 0, %v1453_v51 }
 0x168   :  { %v1553_v53 = vsel %vm1539_vm12, %v1550_v38, %v1552_v40  ;;  %v1665_v11 = vshrl.u32 %v1664_v48, 23  ;;  %v1542_v32 = vsel %vm1538_vm8, %v1522_v43, %v1525_v47  ;;  %v1544_v36 = vsel %vm1540_vm10, %v1528_v4, %v1543_v49 }
 0x169   :  { %v1338_v16 = vmul.f32 %v1337_v44, %v3739_v21  ;;  %v1347_v18 = vxor.u32 2147483648, %v1330_v57  ;;  %v1456_v27 = vsel %vm1454_vm15, %v1455_v15, %v1453_v51  ;;  %v1557_v54 = vand.u32 65535, %v1553_v53 }
 0x16a   :  { %v1457_v39 = vclz %v1456_v27  ;;  %v1558_v55 = vshrl.u32 %v1553_v53, 16  ;;  %v1579_v17 = vand.u32 65535, %v1549_v45  ;;  %v1475_v21 = vsub.s32 4, %v3755_v30 }
 0x16b   :  { %v1344_v13 = vxor.u32 2147483648, %v1338_v16  ;;  %v1348_v12 = vsel %vm1346_vm7, %v1347_v18, %v1338_v16  ;;  %v1561_v22 = vmul.u32 %v1557_v54, %v1556_v8  ;;  %v1559_v56 = vmul.u32 %v1557_v54, %v1555_v28 }
 0x16c   :  { %v2651_v19 = vadd.s32 4294967294, %v1457_v39  ;;  %v1560_v48 = vmul.u32 %v1558_v55, %v1555_v28  ;;  %v3800_v47 = vsel %vm1539_vm12, %v1542_v32, %v1544_v36  ;;  %v1582_v4 = vmul.u32 %v1580_v5, %v1555_v28 }
 0x16d   :  { %v1345_v34 = vsel %vm1343_vm11, %v1330_v57, %v1344_v13  ;;  %v2656_v52 = vadd.s32 4294967169, %v1665_v11  ;;  %v1562_v25 = vmul.u32 %v1558_v55, %v1556_v8  ;;  %v1565_v7 = vshll.u32 %v1561_v22, 16 }
 0x16e   :  { %v1349_v3 = vsel %vm1342_vm13, %v1345_v34, %v1348_v12  ;;  %vm2652_vm1 = vcmp.lt.s32.totalorder %v2651_v19, 0  ;;  %v1563_v42 = vshll.u32 %v1560_v48, 16  ;;  %v1583_v38 = vmul.u32 %v1579_v17, %v1556_v8 }
 0x16f   :  { %v1350_v41 = vsel %vm1339_vm14, nan, %v1349_v3  ;;  %v1460_v50 = vsel %vm2652_vm1, 0, %v2651_v19  ;;  %v1476_v9 = vsel %vm1353_vm0, %v1475_v21, %v3755_v30  ;;  %v1581_v40 = vmul.u32 %v1579_v17, %v1555_v28 }
 0x170   :  { %v1461_v43 = vsub.s32 32, %v1460_v50  ;;  %v1462_v49 = vshll.u32 %v1453_v51, %v1460_v50  ;;  %v1465_v45 = vsub.s32 4294967266, %v1460_v50  ;;  %vm1567_vm2 = vc.u32 %v1559_v56, %v1563_v42  ;;  %2598 = vst [vmem:[#allocation5 + $0x38] sm:$0xff] %v1350_v41 }
 0x171   :  { %v1568_v26 = vsel %vm1567_vm2, 1, %v2746_v23  ;;  %v1671_v57 = vadd.s32 1, %v2656_v52  ;;  %v1569_v58 = vadd.s32 %v1563_v42, %v1559_v56  ;;  %v1566_v11 = vshrl.u32 %v1561_v22, 16 }
 0x172   :  { %v1463_v44 = vshrl.u32 %v1445_v14, %v1461_v43  ;;  %v1466_v15 = vadd.s32 127, %v1465_v45  ;;  %v1570_v53 = vadd.s32 %v1568_v26, %v1562_v25  ;;  %v1584_v16 = vmul.u32 %v1580_v5, %v1556_v8 }
 0x173   :  { %v1585_v18 = vshll.u32 %v1582_v4, 16  ;;  %v1587_v27 = vshll.u32 %v1583_v38, 16  ;;  %v1564_v39 = vshrl.u32 %v1560_v48, 16  ;;  %vm1571_vm3 = vc.u32 %v1569_v58, %v1565_v7 }
 0x174   :  { %v1464_v51 = vor.u32 %v1463_v44, %v1462_v49  ;;  %v1467_v54 = vshll.u32 %v1466_v15, 23  ;;  %v1572_v32 = vsel %vm1571_vm3, 1, %v2746_v23  ;;  %vm1672_vm5 = vcmp.gt.s32.totalorder %v1671_v57, 0 }
 0x175   :  { %vm1589_vm4 = vc.u32 %v1581_v40, %v1585_v18  ;;  %v1591_v30 = vadd.s32 %v1585_v18, %v1581_v40  ;;  %v1574_v55 = vadd.s32 %v1572_v32, %v1570_v53  ;;  %v1586_v13 = vshrl.u32 %v1582_v4, 16 }
 0x176   :  { %v1468_v36 = vor.u32 4788187, %v1467_v54  ;;  %v1471_v28 = vcvt.s32.f32 %v1464_v51  ;;  %v1590_v14 = vsel %vm1589_vm4, 1, %v2746_v23  ;;  %v1673_v8 = vsel %vm1672_vm5, %v1671_v57, 0 }
 0x177   :  { %v1592_v12 = vadd.s32 %v1590_v14, %v1584_v16  ;;  %vm1593_vm6 = vc.u32 %v1591_v30, %v1587_v27  ;;  %v1575_v22 = vadd.s32 %v1574_v55, %v1564_v39  ;;  %v3813_v19 = vadd.s32 %v1591_v30, %v1587_v27 }
 0x178   :  { %v1469_v5 = vand.u32 2147483647, %v1468_v36  ;;  %v1594_v17 = vsel %vm1593_vm6, 1, %v2746_v23  ;;  %vm3817_vm7 = vcmp.le.f32.partialorder %v1351_v24, 0.7853982  ;;  %v1588_v56 = vshrl.u32 %v1583_v38, 16 }
 0x179   :  { %v1596_v48 = vadd.s32 %v1594_v17, %v1592_v12  ;;  %v1675_v34 = vand.u32 31, %v1673_v8  ;;  %v1478_v4 = vsel %vm3817_vm7, 0, %v1476_v9  ;;  %v1576_v3 = vadd.s32 %v1575_v22, %v1566_v11 }
 0x17a   :  { %v1472_v52 = vmul.f32 %v1471_v28, %v1469_v5  ;;  %v1668_v25 = vand.u32 8388607, %v1661_v10  ;;  %v1599_v41 = vmul.u32 %v3762_v20, %v3800_v47  ;;  %v3827_v50 = vshrl.u32 %v1673_v8, 5 }
 0x17b   :  { %v1597_v42 = vadd.s32 %v1596_v48, %v1586_v13  ;;  %v1676_v24 = vsub.s32 32, %v1675_v34  ;;  %vm1601_vm8 = vc.u32 %v1576_v3, %v3813_v19  ;;  %v1678_v38 = vshll.u32 %v2740_v29, %v1675_v34 }
 0x17c   :  { %v1473_v7 = vxor.u32 2147483648, %v1472_v52  ;;  %v1681_v43 = vshll.u32 %v2741_v31, %v1675_v34  ;;  %v1684_v26 = vshll.u32 %v2742_v33, %v1675_v34  ;;  %v1687_v40 = vshll.u32 %v2743_v35, %v1675_v34 }
 0x17d   :  { %v1598_v49 = vadd.s32 %v1597_v42, %v1588_v56  ;;  %v1679_v45 = vshrl.u32 %v2741_v31, %v1676_v24  ;;  %v1682_v9 = vshrl.u32 %v2742_v33, %v1676_v24  ;;  %v1685_v47 = vshrl.u32 %v2743_v35, %v1676_v24 }
 0x17e   :  { %v1474_v20 = vsel %vm1353_vm0, %v1473_v7, %v1472_v52  ;;  %v1688_v57 = vshrl.u32 %v2744_v37, %v1676_v24  ;;  %v1495_v15 = vadd.s32 3, %v1478_v4  ;;  %vm1693_vm9 = vcmp.lt.s32.totalorder %v3827_v50, 1 }
 0x17f   :  { %v1477_v44 = vsel %vm3817_vm7, %v2779_v59, %v1474_v20  ;;  %v1602_v58 = vadd.s32 1, %v1598_v49  ;;  %v3844_v11 = vor.u32 %v1679_v45, %v1678_v38  ;;  %v3846_v16 = vor.u32 %v1682_v9, %v1681_v43 }
 0x180   :  { %v1479_v53 = vmul.f32 %v1477_v44, %v1477_v44  ;;  %v1690_v18 = vshll.u32 %v2744_v37, %v1675_v34  ;;  %v1686_v51 = vor.u32 %v1685_v47, %v1684_v26  ;;  %v1689_v54 = vor.u32 %v1688_v57, %v1687_v40 }
 0x181   :  { %v1603_v27 = vsel %vm1601_vm8, %v1602_v58, %v1598_v49  ;;  %v1691_v39 = vshrl.u32 %v2745_v46, %v1676_v24  ;;  %vm1696_vm10 = vcmp.lt.s32.totalorder %v3827_v50, 4  ;;  %v3853_v28 = vand.u32 3, %v1495_v15 }
 0x182   :  { %v1480_v32 = vmul.f32 -0.001358992, %v1479_v53  ;;  %v1487_v30 = vmul.f32 -0.00019511016, %v1479_v53  ;;  %v1604_v36 = vadd.s32 %v1603_v27, %v1599_v41  ;;  %v1669_v55 = vor.u32 8388608, %v1668_v25 }
 0x183   :  { %v1692_v14 = vor.u32 %v1691_v39, %v1690_v18  ;;  %vm1695_vm11 = vcmp.lt.s32.totalorder %v3827_v50, 3  ;;  %vm1694_vm12 = vcmp.lt.s32.totalorder %v3827_v50, 2  ;;  %v1701_v5 = vsel %vm1693_vm9, %v3844_v11, %v3846_v16 }
 0x184   :  { %v1481_v13 = vadd.f32 0.041655596, %v1480_v32  ;;  %v1488_v12 = vadd.f32 0.008332121, %v1487_v30  ;;  %v1605_v8 = vadd.s32 536870912, %v1604_v36  ;;  %vm1498_vm13 = vcmp.eq.s32.totalorder %v3853_v28, 0 }
 0x185   :  { %v1702_v22 = vsel %vm1696_vm10, %v1689_v54, 920167782  ;;  %v1705_v34 = vsel %vm1693_vm9, %v3846_v16, %v1686_v51  ;;  %v1706_v52 = vsel %vm1696_vm10, %v1692_v14, 1326507024  ;;  %v3871_v4 = vshll.u32 %v1669_v55, 8 }
 0x186   :  { %v1482_v17 = vmul.f32 %v1481_v13, %v1479_v53  ;;  %v1489_v21 = vmul.f32 %v1488_v12, %v1479_v53  ;;  %v1606_v56 = vshrl.u32 %v1605_v8, 30  ;;  %v1703_v48 = vsel %vm1695_vm11, %v1686_v51, %v1702_v22 }
 0x187   :  { %vm1497_vm14 = vcmp.lt.s32.totalorder %v3853_v28, 2  ;;  %vm1508_vm15 = vcmp.lt.s32.totalorder %v2781_v60, 0  ;;  %v1704_v7 = vsel %vm1694_vm12, %v1701_v5, %v1703_v48  ;;  %vm1494_vm0 = vweird.f32 %v2779_v59 }
 0x188   :  { %v1483_v25 = vadd.f32 -0.4999988, %v1482_v17  ;;  %v1490_v42 = vadd.f32 -0.16666654, %v1489_v21  ;;  %v1607_v41 = vshll.u32 %v1606_v56, 30  ;;  %vm1501_vm1 = vcmp.eq.s32.totalorder %v3853_v28, 2 }
 0x189   :  { %v1600_v38 = vadd.s32 %v3813_v19, %v1576_v3  ;;  %v1707_v43 = vsel %vm1695_vm11, %v1689_v54, %v1706_v52  ;;  %v1816_v49 = vand.u32 2147483647, %v2785_v62  ;;  %v1677_v20 = vshrl.u32 %v2740_v29, %v1676_v24 }
 0x18a   :  { %v1484_v45 = vmul.f32 %v1483_v25, %v1479_v53  ;;  %v1491_v9 = vmul.f32 %v1490_v42, %v1479_v53  ;;  %v1608_v26 = vsub.s32 %v1604_v36, %v1607_v41  ;;  %v1708_v47 = vsel %vm1694_vm12, %v1705_v34, %v1707_v43 }
 0x18b   :  { %v1710_v40 = vand.u32 65535, %v3871_v4  ;;  %v1711_v57 = vshrl.u32 %v3871_v4, 16  ;;  %v1735_v15 = vshrl.u32 %v1704_v7, 16  ;;  %v1630_v18 = vsub.s32 4, %v1606_v56 }
 0x18c   :  { %v1485_v58 = vadd.f32 1.0, %v1484_v45  ;;  %v1492_v19 = vadd.f32 1.0, %v1491_v9  ;;  %vm1609_vm2 = vcmp.lt.s32.totalorder %v1608_v26, 0  ;;  %v1610_v3 = vsub.s32 0, %v1608_v26 }
 0x18d   :  { %v1698_v27 = vsel %vm1696_vm10, %v1686_v51, 2102212464  ;;  %v1712_v53 = vand.u32 65535, %v1708_v47  ;;  %v1713_v54 = vshrl.u32 %v1708_v47, 16  ;;  %v1734_v30 = vand.u32 65535, %v1704_v7 }
 0x18e   :  { %v1493_v39 = vmul.f32 %v1492_v19, %v1477_v44  ;;  %v1502_v24 = vxor.u32 2147483648, %v1485_v58  ;;  %v1611_v32 = vsel %vm1609_vm2, %v1610_v3, %v1608_v26  ;;  %v1697_v5 = vsel %vm1693_vm9, %v1677_v20, %v3844_v11 }
 0x18f   :  { %v1612_v36 = vclz %v1611_v32  ;;  %v1714_v55 = vmul.u32 %v1712_v53, %v1710_v40  ;;  %v1715_v14 = vmul.u32 %v1713_v54, %v1710_v40  ;;  %v1716_v13 = vmul.u32 %v1712_v53, %v1711_v57 }
 0x190   :  { %v1499_v12 = vxor.u32 2147483648, %v1493_v39  ;;  %v1503_v8 = vsel %vm1501_vm1, %v1502_v24, %v1493_v39  ;;  %v1737_v22 = vmul.u32 %v1735_v15, %v1710_v40  ;;  %v1631_v44 = vsel %vm1508_vm15, %v1630_v18, %v1606_v56 }
 0x191   :  { %v2654_v51 = vadd.s32 4294967294, %v1612_v36  ;;  %v1699_v17 = vsel %vm1695_vm11, %v3846_v16, %v1698_v27  ;;  %v1718_v21 = vshll.u32 %v1715_v14, 16  ;;  %v1717_v34 = vmul.u32 %v1713_v54, %v1711_v57 }
 0x192   :  { %v1500_v48 = vsel %vm1498_vm13, %v1485_v58, %v1499_v12  ;;  %v1736_v52 = vmul.u32 %v1734_v30, %v1710_v40  ;;  %v1738_v25 = vmul.u32 %v1734_v30, %v1711_v57  ;;  %v1720_v11 = vshll.u32 %v1716_v13, 16 }
 0x193   :  { %v1504_v42 = vsel %vm1497_vm14, %v1500_v48, %v1503_v8  ;;  %vm2655_vm3 = vcmp.lt.s32.totalorder %v2654_v51, 0  ;;  %vm1722_vm4 = vc.u32 %v1714_v55, %v1718_v21  ;;  %v1740_v16 = vshll.u32 %v1737_v22, 16 }
 0x194   :  { %v1505_v56 = vsel %vm1494_vm0, nan, %v1504_v42  ;;  %v1615_v41 = vsel %vm2655_vm3, 0, %v2654_v51  ;;  %v1723_v7 = vsel %vm1722_vm4, 1, %v2746_v23  ;;  %v1724_v20 = vadd.s32 %v1718_v21, %v1714_v55 }
 0x195   :  { %v1616_v43 = vsub.s32 32, %v1615_v41  ;;  %v1617_v45 = vshll.u32 %v1608_v26, %v1615_v41  ;;  %v1620_v9 = vsub.s32 4294967266, %v1615_v41  ;;  %2599 = vst [vmem:[#allocation5 + $0x40] sm:$0xff] %v1505_v56  ;;  %v1719_v47 = vshrl.u32 %v1715_v14, 16 }
 0x196   :  { %v1725_v40 = vadd.s32 %v1723_v7, %v1717_v34  ;;  %v1739_v58 = vmul.u32 %v1735_v15, %v1711_v57  ;;  %v1742_v28 = vshll.u32 %v1738_v25, 16  ;;  %v1721_v18 = vshrl.u32 %v1716_v13, 16 }
 0x197   :  { %v1618_v19 = vshrl.u32 %v1600_v38, %v1616_v43  ;;  %v1621_v3 = vadd.s32 127, %v1620_v9  ;;  %vm1726_vm5 = vc.u32 %v1724_v20, %v1720_v11  ;;  %vm1744_vm6 = vc.u32 %v1736_v52, %v1740_v16 }
 0x198   :  { %v1727_v59 = vsel %vm1726_vm5, 1, %v2746_v23  ;;  %v1746_v27 = vadd.s32 %v1740_v16, %v1736_v52  ;;  %v1819_v53 = vand.u32 2139095040, %v2785_v62  ;;  %v1745_v24 = vsel %vm1744_vm6, 1, %v2746_v23 }
 0x199   :  { %v1619_v54 = vor.u32 %v1618_v19, %v1617_v45  ;;  %v1622_v39 = vshll.u32 %v1621_v3, 23  ;;  %v1729_v26 = vadd.s32 %v1727_v59, %v1725_v40  ;;  %v1741_v32 = vshrl.u32 %v1737_v22, 16 }
 0x19a   :  { %v1747_v30 = vadd.s32 %v1745_v24, %v1739_v58  ;;  %vm1748_vm7 = vc.u32 %v1746_v27, %v1742_v28  ;;  %v1820_v57 = vshrl.u32 %v1819_v53, 23  ;;  %vm3913_vm8 = vcmp.le.f32.partialorder %v1506_v6, 0.7853982 }
 0x19b   :  { %v1623_v15 = vor.u32 4788187, %v1622_v39  ;;  %v1626_v38 = vcvt.s32.f32 %v1619_v54  ;;  %v1730_v36 = vadd.s32 %v1729_v26, %v1719_v47  ;;  %v1749_v55 = vsel %vm1748_vm7, 1, %v2746_v23 }
 0x19c   :  { %v1743_v13 = vshrl.u32 %v1738_v25, 16  ;;  %v1751_v12 = vadd.s32 %v1749_v55, %v1747_v30  ;;  %v2659_v8 = vadd.s32 4294967169, %v1820_v57  ;;  %v1700_v22 = vsel %vm1694_vm12, %v1697_v5, %v1699_v17 }
 0x19d   :  { %v1624_v51 = vand.u32 2147483647, %v1623_v15  ;;  %v3919_v21 = vadd.s32 %v1730_v36, %v1721_v18  ;;  %v3921_v48 = vadd.s32 %v1746_v27, %v1742_v28  ;;  %v1633_v34 = vsel %vm3913_vm8, 0, %v1631_v44 }
 0x19e   :  { %v1752_v52 = vadd.s32 %v1751_v12, %v1741_v32  ;;  %v1823_v6 = vand.u32 8388607, %v1816_v49  ;;  %v1826_v42 = vadd.s32 1, %v2659_v8  ;;  %v1754_v56 = vmul.u32 %v3871_v4, %v1700_v22 }
 0x19f   :  { %v1627_v11 = vmul.f32 %v1626_v38, %v1624_v51  ;;  %v1650_v50 = vadd.s32 3, %v1633_v34  ;;  %vm1756_vm10 = vc.u32 %v3919_v21, %v3921_v48  ;;  %v1974_v44 = vand.u32 2139095040, %v2787_v63 }
 0x1a0   :  { %v1753_v25 = vadd.s32 %v1752_v52, %v1743_v13  ;;  %vm1827_vm9 = vcmp.gt.s32.totalorder %v1826_v42, 0  ;;  %v1824_v7 = vor.u32 8388608, %v1823_v6  ;;  %v1971_v19 = vand.u32 2147483647, %v2787_v63 }
 0x1a1   :  { %v1628_v41 = vxor.u32 2147483648, %v1627_v11  ;;  %v1828_v5 = vsel %vm1827_vm9, %v1826_v42, 0  ;;  %v3942_v47 = vand.u32 3, %v1650_v50  ;;  %v1975_v3 = vshrl.u32 %v1974_v44, 23 }
 0x1a2   :  { %v1757_v17 = vadd.s32 1, %v1753_v25  ;;  %v1830_v16 = vand.u32 31, %v1828_v5  ;;  %v3944_v58 = vshrl.u32 %v1828_v5, 5  ;;  %v3946_v28 = vshll.u32 %v1824_v7, 8 }
 0x1a3   :  { %v1629_v43 = vsel %vm1508_vm15, %v1628_v41, %v1627_v11  ;;  %vm1656_vm11 = vcmp.eq.s32.totalorder %v3942_v47, 2  ;;  %v2662_v51 = vadd.s32 4294967169, %v1975_v3  ;;  %vm1653_vm12 = vcmp.eq.s32.totalorder %v3942_v47, 0 }
 0x1a4   :  { %v3936_v45 = vsel %vm3913_vm8, %v2781_v60, %v1629_v43  ;;  %v1758_v4 = vsel %vm1756_vm10, %v1757_v17, %v1753_v25  ;;  %v3938_v9 = vsub.s32 32, %v1830_v16  ;;  %v1836_v53 = vshll.u32 %v2741_v31, %v1830_v16 }
 0x1a5   :  { %v1634_v20 = vmul.f32 %v3936_v45, %v3936_v45  ;;  %v1759_v40 = vadd.s32 %v1758_v4, %v1754_v56  ;;  %v1839_v39 = vshll.u32 %v2742_v33, %v1830_v16  ;;  %v1842_v24 = vshll.u32 %v2743_v35, %v1830_v16 }
 0x1a6   :  { %v1837_v54 = vshrl.u32 %v2742_v33, %v3938_v9  ;;  %v1840_v26 = vshrl.u32 %v2743_v35, %v3938_v9  ;;  %v1843_v15 = vshrl.u32 %v2744_v37, %v3938_v9  ;;  %v1833_v38 = vshll.u32 %v2740_v29, %v1830_v16 }
 0x1a7   :  { %v1635_v18 = vmul.f32 -0.001358992, %v1634_v20  ;;  %v1642_v59 = vmul.f32 -0.00019511016, %v1634_v20  ;;  %v1760_v27 = vadd.s32 536870912, %v1759_v40  ;;  %v1834_v36 = vshrl.u32 %v2741_v31, %v3938_v9 }
 0x1a8   :  { %v1845_v55 = vshll.u32 %v2744_v37, %v1830_v16  ;;  %v1846_v14 = vshrl.u32 %v2745_v46, %v3938_v9  ;;  %v3966_v22 = vor.u32 %v1837_v54, %v1836_v53  ;;  %v3968_v34 = vor.u32 %v1840_v26, %v1839_v39 }
 0x1a9   :  { %v1636_v32 = vadd.f32 0.041655596, %v1635_v18  ;;  %v1643_v30 = vadd.f32 0.008332121, %v1642_v59  ;;  %v1761_v57 = vshrl.u32 %v1760_v27, 30  ;;  %v1844_v52 = vor.u32 %v1843_v15, %v1842_v24 }
 0x1aa   :  { %v1847_v6 = vor.u32 %v1846_v14, %v1845_v55  ;;  %vm1652_vm13 = vcmp.lt.s32.totalorder %v3942_v47, 2  ;;  %vm1663_vm14 = vcmp.lt.s32.totalorder %v2783_v61, 0  ;;  %vm1848_vm15 = vcmp.lt.s32.totalorder %v3944_v58, 1 }
 0x1ab   :  { %v1637_v13 = vmul.f32 %v1636_v32, %v1634_v20  ;;  %v1644_v12 = vmul.f32 %v1643_v30, %v1634_v20  ;;  %v1762_v8 = vshll.u32 %v1761_v57, 30  ;;  %vm1649_vm0 = vweird.f32 %v2781_v60 }
 0x1ac   :  { %v3974_v56 = vor.u32 %v1834_v36, %v1833_v38  ;;  %vm1850_vm1 = vcmp.lt.s32.totalorder %v3944_v58, 3  ;;  %vm1851_vm2 = vcmp.lt.s32.totalorder %v3944_v58, 4  ;;  %v1865_v41 = vand.u32 65535, %v3946_v28 }
 0x1ad   :  { %v1638_v42 = vadd.f32 -0.4999988, %v1637_v13  ;;  %v1645_v11 = vadd.f32 -0.16666654, %v1644_v12  ;;  %v1763_v25 = vsub.s32 %v1759_v40, %v1762_v8  ;;  %vm1849_vm4 = vcmp.lt.s32.totalorder %v3944_v58, 2 }
 0x1ae   :  { %v1857_v7 = vsel %vm1851_vm2, %v1844_v52, 920167782  ;;  %v1860_v16 = vsel %vm1848_vm15, %v3966_v22, %v3968_v34  ;;  %v1861_v44 = vsel %vm1851_vm2, %v1847_v6, 1326507024  ;;  %vm3991_vm5 = vcmp.le.f32.partialorder %v1661_v10, 0.7853982 }
 0x1af   :  { %v1639_v50 = vmul.f32 %v1638_v42, %v1634_v20  ;;  %v1646_v5 = vmul.f32 %v1645_v11, %v1634_v20  ;;  %vm1764_vm3 = vcmp.lt.s32.totalorder %v1763_v25, 0  ;;  %v1765_v17 = vsub.s32 0, %v1763_v25 }
 0x1b0   :  { %v1866_v20 = vshrl.u32 %v3946_v28, 16  ;;  %v1785_v59 = vsub.s32 4, %v1761_v57  ;;  %v1856_v27 = vsel %vm1848_vm15, %v3974_v56, %v3966_v22  ;;  %v1862_v53 = vsel %vm1850_vm1, %v1844_v52, %v1861_v44 }
 0x1b1   :  { %v1640_v43 = vadd.f32 1.0, %v1639_v50  ;;  %v1647_v4 = vadd.f32 1.0, %v1646_v5  ;;  %v1766_v40 = vsel %vm1764_vm3, %v1765_v17, %v1763_v25  ;;  %v1858_v10 = vsel %vm1850_vm1, %v3968_v34, %v1857_v7 }
 0x1b2   :  { %v1767_v18 = vclz %v1766_v40  ;;  %v1863_v26 = vsel %vm1849_vm4, %v1860_v16, %v1862_v53  ;;  %v4009_v15 = vand.u32 8388607, %v1971_v19  ;;  %v1981_v55 = vadd.s32 1, %v2662_v51 }
 0x1b3   :  { %v1648_v54 = vmul.f32 %v1647_v4, %v3936_v45  ;;  %v1657_v39 = vxor.u32 2147483648, %v1640_v43  ;;  %v1867_v32 = vand.u32 65535, %v1863_v26  ;;  %v1868_v30 = vshrl.u32 %v1863_v26, 16 }
 0x1b4   :  { %v2657_v24 = vadd.s32 4294967294, %v1767_v18  ;;  %v1755_v45 = vadd.s32 %v3921_v48, %v3919_v21  ;;  %v1786_v14 = vsel %vm1663_vm14, %v1785_v59, %v1761_v57  ;;  %v1859_v13 = vsel %vm1849_vm4, %v1856_v27, %v1858_v10 }
 0x1b5   :  { %v1654_v38 = vxor.u32 2147483648, %v1648_v54  ;;  %v1658_v36 = vsel %vm1656_vm11, %v1657_v39, %v1648_v54  ;;  %v1870_v12 = vmul.u32 %v1868_v30, %v1865_v41  ;;  %v1869_v6 = vmul.u32 %v1867_v32, %v1865_v41 }
 0x1b6   :  { %vm2658_vm6 = vcmp.lt.s32.totalorder %v2657_v24, 0  ;;  %v1871_v42 = vmul.u32 %v1867_v32, %v1866_v20  ;;  %v1832_v57 = vshrl.u32 %v2740_v29, %v3938_v9  ;;  %v1889_v5 = vand.u32 65535, %v1859_v13 }
 0x1b7   :  { %v1655_v8 = vsel %vm1653_vm12, %v1640_v43, %v1654_v38  ;;  %v1770_v52 = vsel %vm2658_vm6, 0, %v2657_v24  ;;  %v1890_v17 = vshrl.u32 %v1859_v13, 16  ;;  %v1872_v44 = vmul.u32 %v1868_v30, %v1866_v20 }
 0x1b8   :  { %v1659_v11 = vsel %vm1652_vm13, %v1655_v8, %v1658_v36  ;;  %v1771_v50 = vsub.s32 32, %v1770_v52  ;;  %v1772_v21 = vshll.u32 %v1763_v25, %v1770_v52  ;;  %v1775_v48 = vsub.s32 4294967266, %v1770_v52 }
 0x1b9   :  { %v1660_v51 = vsel %vm1649_vm0, nan, %v1659_v11  ;;  %v1873_v43 = vshll.u32 %v1870_v12, 16  ;;  %v1788_v47 = vsel %vm3991_vm5, 0, %v1786_v14  ;;  %v1853_v25 = vsel %vm1851_vm2, %v3968_v34, 2102212464 }
 0x1ba   :  { %v1773_v7 = vshrl.u32 %v1755_v45, %v1771_v50  ;;  %v1776_v16 = vadd.s32 127, %v1775_v48  ;;  %2600 = vst [vmem:[#allocation5 + $0x48] sm:$0xff] %v1660_v51  ;;  %v1874_v4 = vshrl.u32 %v1870_v12, 16  ;;  %v1875_v60 = vshll.u32 %v1871_v42, 16 }
 0x1bb   :  { %vm1877_vm7 = vc.u32 %v1869_v6, %v1873_v43  ;;  %v1879_v9 = vadd.s32 %v1873_v43, %v1869_v6  ;;  %v1891_v27 = vmul.u32 %v1889_v5, %v1865_v41  ;;  %v1892_v53 = vmul.u32 %v1890_v17, %v1865_v41 }
 0x1bc   :  { %v1774_v40 = vor.u32 %v1773_v7, %v1772_v21  ;;  %v1777_v18 = vshll.u32 %v1776_v16, 23  ;;  %v1878_v59 = vsel %vm1877_vm7, 1, %v2746_v23  ;;  %v1893_v54 = vmul.u32 %v1889_v5, %v1866_v20 }
 0x1bd   :  { %v1880_v26 = vadd.s32 %v1878_v59, %v1872_v44  ;;  %vm1881_vm8 = vc.u32 %v1879_v9, %v1875_v60  ;;  %v1894_v32 = vmul.u32 %v1890_v17, %v1866_v20  ;;  %v1895_v30 = vshll.u32 %v1892_v53, 16 }
 0x1be   :  { %v1778_v39 = vor.u32 4788187, %v1777_v18  ;;  %v1781_v10 = vcvt.s32.f32 %v1774_v40  ;;  %v1882_v24 = vsel %vm1881_vm8, 1, %v2746_v23  ;;  %v1897_v34 = vshll.u32 %v1893_v54, 16 }
 0x1bf   :  { %v1852_v36 = vsel %vm1848_vm15, %v1832_v57, %v3974_v56  ;;  %v1854_v45 = vsel %vm1850_vm1, %v3966_v22, %v1853_v25  ;;  %v1884_v41 = vadd.s32 %v1882_v24, %v1880_v26  ;;  %v1876_v14 = vshrl.u32 %v1871_v42, 16 }
 0x1c0   :  { %v1779_v38 = vand.u32 2147483647, %v1778_v39  ;;  %vm1899_vm9 = vc.u32 %v1891_v27, %v1895_v30  ;;  %v1901_v13 = vadd.s32 %v1895_v30, %v1891_v27  ;;  %vm1982_vm10 = vcmp.gt.s32.totalorder %v1981_v55, 0 }
 0x1c1   :  { %v1885_v8 = vadd.s32 %v1884_v41, %v1874_v4  ;;  %v1900_v20 = vsel %vm1899_vm9, 1, %v2746_v23  ;;  %v1983_v52 = vsel %vm1982_vm10, %v1981_v55, 0  ;;  %v1896_v6 = vshrl.u32 %v1892_v53, 16 }
 0x1c2   :  { %v1782_v12 = vmul.f32 %v1781_v10, %v1779_v38  ;;  %v1902_v11 = vadd.s32 %v1900_v20, %v1894_v32  ;;  %vm1903_vm11 = vc.u32 %v1901_v13, %v1897_v34  ;;  %v1979_v21 = vor.u32 8388608, %v4009_v15 }
 0x1c3   :  { %v1904_v56 = vsel %vm1903_vm11, 1, %v2746_v23  ;;  %v1985_v48 = vand.u32 31, %v1983_v52  ;;  %v1805_v22 = vadd.s32 3, %v1788_v47  ;;  %v1855_v42 = vsel %vm1849_vm4, %v1852_v36, %v1854_v45 }
 0x1c4   :  { %v1783_v50 = vxor.u32 2147483648, %v1782_v12  ;;  %v1898_v51 = vshrl.u32 %v1893_v54, 16  ;;  %v1906_v57 = vadd.s32 %v1904_v56, %v1902_v11  ;;  %v4047_v17 = vadd.s32 %v1885_v8, %v1876_v14 }
 0x1c5   :  { %v4049_v55 = vadd.s32 %v1901_v13, %v1897_v34  ;;  %v4051_v7 = vsub.s32 32, %v1985_v48  ;;  %v4056_v44 = vshrl.u32 %v1983_v52, 5  ;;  %v1988_v58 = vshll.u32 %v2740_v29, %v1985_v48 }
 0x1c6   :  { %v1784_v5 = vsel %vm1663_vm14, %v1783_v50, %v1782_v12  ;;  %v1907_v16 = vadd.s32 %v1906_v57, %v1896_v6  ;;  %v1991_v25 = vshll.u32 %v2741_v31, %v1985_v48  ;;  %v1994_v40 = vshll.u32 %v2742_v33, %v1985_v48 }
 0x1c7   :  { %v1787_v15 = vsel %vm3991_vm5, %v2783_v61, %v1784_v5  ;;  %v1989_v47 = vshrl.u32 %v2741_v31, %v4051_v7  ;;  %v1992_v4 = vshrl.u32 %v2742_v33, %v4051_v7  ;;  %v1995_v3 = vshrl.u32 %v2743_v35, %v4051_v7 }
 0x1c8   :  { %v1789_v43 = vmul.f32 %v1787_v15, %v1787_v15  ;;  %v1908_v60 = vadd.s32 %v1907_v16, %v1898_v51  ;;  %v1997_v18 = vshll.u32 %v2743_v35, %v1985_v48  ;;  %v1909_v27 = vmul.u32 %v3946_v28, %v1855_v42 }
 0x1c9   :  { %vm1911_vm12 = vc.u32 %v4047_v17, %v4049_v55  ;;  %v4071_v54 = vor.u32 %v1989_v47, %v1988_v58  ;;  %v1998_v39 = vshrl.u32 %v2744_v37, %v4051_v7  ;;  %v2000_v10 = vshll.u32 %v2744_v37, %v1985_v48 }
 0x1ca   :  { %v1790_v9 = vmul.f32 -0.001358992, %v1789_v43  ;;  %v1797_v59 = vmul.f32 -0.00019511016, %v1789_v43  ;;  %v1912_v53 = vadd.s32 1, %v1908_v60  ;;  %v4076_v32 = vor.u32 %v1992_v4, %v1991_v25 }
 0x1cb   :  { %v2001_v30 = vshrl.u32 %v2745_v46, %v4051_v7  ;;  %v4080_v28 = vor.u32 %v1995_v3, %v1994_v40  ;;  %v1999_v38 = vor.u32 %v1998_v39, %v1997_v18  ;;  %vm2003_vm13 = vcmp.lt.s32.totalorder %v4056_v44, 1 }
 0x1cc   :  { %v1791_v26 = vadd.f32 0.041655596, %v1790_v9  ;;  %v1798_v24 = vadd.f32 0.008332121, %v1797_v59  ;;  %v1913_v34 = vsel %vm1911_vm12, %v1912_v53, %v1908_v60  ;;  %vm2006_vm14 = vcmp.lt.s32.totalorder %v4056_v44, 4 }
 0x1cd   :  { %v1914_v41 = vadd.s32 %v1913_v34, %v1909_v27  ;;  %v1806_v14 = vand.u32 3, %v1805_v22  ;;  %v2002_v13 = vor.u32 %v2001_v30, %v2000_v10  ;;  %vm2004_vm15 = vcmp.lt.s32.totalorder %v4056_v44, 2 }
 0x1ce   :  { %v1792_v36 = vmul.f32 %v1791_v26, %v1789_v43  ;;  %v1799_v45 = vmul.f32 %v1798_v24, %v1789_v43  ;;  %vm2005_vm0 = vcmp.lt.s32.totalorder %v4056_v44, 3  ;;  %v2011_v52 = vsel %vm2003_vm13, %v4071_v54, %v4076_v32 }
 0x1cf   :  { %v1915_v20 = vadd.s32 536870912, %v1914_v41  ;;  %v2012_v6 = vsel %vm2006_vm14, %v1999_v38, 920167782  ;;  %v2015_v11 = vsel %vm2003_vm13, %v4076_v32, %v4080_v28  ;;  %v2016_v50 = vsel %vm2006_vm14, %v2002_v13, 1326507024 }
 0x1d0   :  { %v1793_v12 = vadd.f32 -0.4999988, %v1792_v36  ;;  %v1800_v8 = vadd.f32 -0.16666654, %v1799_v45  ;;  %v4098_v56 = vshll.u32 %v1979_v21, 8  ;;  %v2013_v51 = vsel %vm2005_vm0, %v4080_v28, %v2012_v6 }
 0x1d1   :  { %v4100_v42 = vshrl.u32 %v1915_v20, 30  ;;  %v2014_v57 = vsel %vm2004_vm15, %v2011_v52, %v2013_v51  ;;  %v2017_v5 = vsel %vm2005_vm0, %v1999_v38, %v2016_v50  ;;  %vm1811_vm1 = vcmp.eq.s32.totalorder %v1806_v14, 2 }
 0x1d2   :  { %v1794_v48 = vmul.f32 %v1793_v12, %v1789_v43  ;;  %v1801_v22 = vmul.f32 %v1800_v8, %v1789_v43  ;;  %v2018_v21 = vsel %vm2004_vm15, %v2015_v11, %v2017_v5  ;;  %v2020_v43 = vand.u32 65535, %v4098_v56 }
 0x1d3   :  { %v1917_v47 = vshll.u32 %v4100_v42, 30  ;;  %v2021_v25 = vshrl.u32 %v4098_v56, 16  ;;  %v2045_v3 = vshrl.u32 %v2014_v57, 16  ;;  %vm1807_vm2 = vcmp.lt.s32.totalorder %v1806_v14, 2 }
 0x1d4   :  { %v1795_v16 = vadd.f32 1.0, %v1794_v48  ;;  %v1802_v58 = vadd.f32 1.0, %v1801_v22  ;;  %vm1808_vm3 = vcmp.eq.s32.totalorder %v1806_v14, 0  ;;  %v2022_v18 = vand.u32 65535, %v2018_v21 }
 0x1d5   :  { %v1918_v40 = vsub.s32 %v1914_v41, %v1917_v47  ;;  %v2023_v9 = vshrl.u32 %v2018_v21, 16  ;;  %vm1804_vm5 = vweird.f32 %v2783_v61  ;;  %v4117_v34 = vmul.u32 %v2045_v3, %v2020_v43 }
 0x1d6   :  { %v1803_v4 = vmul.f32 %v1802_v58, %v1787_v15  ;;  %v1812_v60 = vxor.u32 2147483648, %v1795_v16  ;;  %v2024_v39 = vmul.u32 %v2022_v18, %v2020_v43  ;;  %v4115_v26 = vmul.u32 %v2022_v18, %v2021_v25 }
 0x1d7   :  { %vm1919_vm4 = vcmp.lt.s32.totalorder %v1918_v40, 0  ;;  %v1920_v53 = vsub.s32 0, %v1918_v40  ;;  %v2025_v10 = vmul.u32 %v2023_v9, %v2020_v43  ;;  %v2044_v15 = vand.u32 65535, %v2014_v57 }
 0x1d8   :  { %v1809_v59 = vxor.u32 2147483648, %v1803_v4  ;;  %v1813_v27 = vsel %vm1811_vm1, %v1812_v60, %v1803_v4  ;;  %v2027_v45 = vmul.u32 %v2023_v9, %v2021_v25  ;;  %v1910_v12 = vadd.s32 %v4049_v55, %v4047_v17 }
 0x1d9   :  { %v1921_v30 = vsel %vm1919_vm4, %v1920_v53, %v1918_v40  ;;  %v2028_v41 = vshll.u32 %v2025_v10, 16  ;;  %v2030_v61 = vshll.u32 %v4115_v26, 16  ;;  %v1987_v20 = vshrl.u32 %v2740_v29, %v4051_v7 }
 0x1da   :  { %v1810_v24 = vsel %vm1808_vm3, %v1795_v16, %v1809_v59  ;;  %v1922_v36 = vclz %v1921_v30  ;;  %v2046_v14 = vmul.u32 %v2044_v15, %v2020_v43  ;;  %v2048_v11 = vmul.u32 %v2044_v15, %v2021_v25 }
 0x1db   :  { %v1814_v38 = vsel %vm1807_vm2, %v1810_v24, %v1813_v27  ;;  %vm2032_vm6 = vc.u32 %v2024_v39, %v2028_v41  ;;  %v2034_v52 = vadd.s32 %v2028_v41, %v2024_v39  ;;  %v2050_v50 = vshll.u32 %v4117_v34, 16 }
 0x1dc   :  { %v1815_v13 = vsel %vm1804_vm5, nan, %v1814_v38  ;;  %v2660_v8 = vadd.s32 4294967294, %v1922_v36  ;;  %v2033_v6 = vsel %vm2032_vm6, 1, %v2746_v23  ;;  %v2008_v17 = vsel %vm2006_vm14, %v4080_v28, 2102212464 }
 0x1dd   :  { %2601 = vst [vmem:[#allocation5 + $0x50] sm:$0xff] %v1815_v13  ;;  %v2035_v55 = vadd.s32 %v2033_v6, %v2027_v45  ;;  %vm2036_vm8 = vc.u32 %v2034_v52, %v2030_v61  ;;  %v2029_v22 = vshrl.u32 %v2025_v10, 16  ;;  %v2049_v51 = vmul.u32 %v2045_v3, %v2021_v25 }
 0x1de   :  { %vm2661_vm7 = vcmp.lt.s32.totalorder %v2660_v8, 0  ;;  %v2037_v7 = vsel %vm2036_vm8, 1, %v2746_v23  ;;  %vm1818_vm9 = vcmp.lt.s32.totalorder %v2785_v62, 0  ;;  %v2007_v47 = vsel %vm2003_vm13, %v1987_v20, %v4071_v54 }
 0x1df   :  { %v1925_v48 = vsel %vm2661_vm7, 0, %v2660_v8  ;;  %v2039_v58 = vadd.s32 %v2037_v7, %v2035_v55  ;;  %v2052_v21 = vshll.u32 %v2048_v11, 16  ;;  %vm2054_vm10 = vc.u32 %v2046_v14, %v2050_v50 }
 0x1e0   :  { %v1926_v57 = vsub.s32 32, %v1925_v48  ;;  %v1927_v5 = vshll.u32 %v1918_v40, %v1925_v48  ;;  %v1930_v16 = vsub.s32 4294967266, %v1925_v48  ;;  %v1940_v4 = vsub.s32 4, %v4100_v42 }
 0x1e1   :  { %v2055_v60 = vsel %vm2054_vm10, 1, %v2746_v23  ;;  %v2009_v25 = vsel %vm2005_vm0, %v4076_v32, %v2008_v17  ;;  %v2056_v40 = vadd.s32 %v2050_v50, %v2046_v14  ;;  %v2129_v18 = vand.u32 2139095040, %v2789_v0 }
 0x1e2   :  { %v1928_v28 = vshrl.u32 %v1910_v12, %v1926_v57  ;;  %v1931_v43 = vadd.s32 127, %v1930_v16  ;;  %v2057_v3 = vadd.s32 %v2055_v60, %v2049_v51  ;;  %v2031_v54 = vshrl.u32 %v4115_v26, 16 }
 0x1e3   :  { %v2040_v27 = vadd.s32 %v2039_v58, %v2029_v22  ;;  %v2051_v53 = vshrl.u32 %v4117_v34, 16  ;;  %vm2058_vm11 = vc.u32 %v2056_v40, %v2052_v21  ;;  %v2126_v39 = vand.u32 2147483647, %v2789_v0 }
 0x1e4   :  { %v1929_v9 = vor.u32 %v1928_v28, %v1927_v5  ;;  %v1932_v59 = vshll.u32 %v1931_v43, 23  ;;  %v2130_v10 = vshrl.u32 %v2129_v18, 23  ;;  %v1941_v32 = vsel %vm1818_vm9, %v1940_v4, %v4100_v42 }
 0x1e5   :  { %v2059_v15 = vsel %vm2058_vm11, 1, %v2746_v23  ;;  %vm4150_vm12 = vcmp.le.f32.partialorder %v1816_v49, 0.7853982  ;;  %v2053_v26 = vshrl.u32 %v2048_v11, 16  ;;  %v2010_v41 = vsel %vm2004_vm15, %v2007_v47, %v2009_v25 }
 0x1e6   :  { %v1933_v24 = vor.u32 4788187, %v1932_v59  ;;  %v1936_v30 = vcvt.s32.f32 %v1929_v9  ;;  %v2061_v34 = vadd.s32 %v2059_v15, %v2057_v3  ;;  %v2665_v36 = vadd.s32 4294967169, %v2130_v10 }
 0x1e7   :  { %v2041_v13 = vadd.s32 %v2040_v27, %v2031_v54  ;;  %v2060_v12 = vadd.s32 %v2056_v40, %v2052_v21  ;;  %v1943_v42 = vsel %vm4150_vm12, 0, %v1941_v32  ;;  %v2133_v8 = vand.u32 8388607, %v2126_v39 }
 0x1e8   :  { %v1934_v45 = vand.u32 2147483647, %v1933_v24  ;;  %v2062_v61 = vadd.s32 %v2061_v34, %v2051_v53  ;;  %v2136_v49 = vadd.s32 1, %v2665_v36  ;;  %v2064_v6 = vmul.u32 %v4098_v56, %v2010_v41 }
 0x1e9   :  { %v1960_v11 = vadd.s32 3, %v1943_v42  ;;  %vm2066_vm14 = vc.u32 %v2041_v13, %v2060_v12  ;;  %v2134_v17 = vor.u32 8388608, %v2133_v8  ;;  %v2284_v48 = vand.u32 2139095040, %v2791_v1 }
 0x1ea   :  { %v1937_v20 = vmul.f32 %v1936_v30, %v1934_v45  ;;  %v2063_v52 = vadd.s32 %v2062_v61, %v2053_v26  ;;  %vm2137_vm13 = vcmp.gt.s32.totalorder %v2136_v49, 0  ;;  %v2281_v58 = vand.u32 2147483647, %v2791_v1 }
 0x1eb   :  { %v2138_v44 = vsel %vm2137_vm13, %v2136_v49, 0  ;;  %v4173_v5 = vand.u32 3, %v1960_v11  ;;  %v4176_v47 = vadd.s32 %v2060_v12, %v2041_v13  ;;  %v4180_v28 = vshll.u32 %v2134_v17, 8 }
 0x1ec   :  { %v1938_v14 = vxor.u32 2147483648, %v1937_v20  ;;  %v2067_v50 = vadd.s32 1, %v2063_v52  ;;  %v2140_v55 = vand.u32 31, %v2138_v44  ;;  %v4178_v21 = vshrl.u32 %v2138_v44, 5 }
 0x1ed   :  { %v2285_v43 = vshrl.u32 %v2284_v48, 23  ;;  %vm1966_vm15 = vcmp.eq.s32.totalorder %v4173_v5, 2  ;;  %v4202_v36 = vand.u32 65535, %v4180_v28  ;;  %vm1963_vm0 = vcmp.eq.s32.totalorder %v4173_v5, 0 }
 0x1ee   :  { %v1939_v22 = vsel %vm1818_vm9, %v1938_v14, %v1937_v20  ;;  %v2068_v51 = vsel %vm2066_vm14, %v2067_v50, %v2063_v52  ;;  %v4169_v56 = vsub.s32 32, %v2140_v55  ;;  %v2146_v40 = vshll.u32 %v2741_v31, %v2140_v55 }
 0x1ef   :  { %v4167_v7 = vsel %vm4150_vm12, %v2785_v62, %v1939_v22  ;;  %v2069_v16 = vadd.s32 %v2068_v51, %v2064_v6  ;;  %v2149_v18 = vshll.u32 %v2742_v33, %v2140_v55  ;;  %v2152_v59 = vshll.u32 %v2743_v35, %v2140_v55 }
 0x1f0   :  { %v1944_v57 = vmul.f32 %v4167_v7, %v4167_v7  ;;  %v2147_v3 = vshrl.u32 %v2742_v33, %v4169_v56  ;;  %v2150_v9 = vshrl.u32 %v2743_v35, %v4169_v56  ;;  %v2153_v10 = vshrl.u32 %v2744_v37, %v4169_v56 }
 0x1f1   :  { %v2070_v25 = vadd.s32 536870912, %v2069_v16  ;;  %v2143_v24 = vshll.u32 %v2740_v29, %v2140_v55  ;;  %v2144_v30 = vshrl.u32 %v2741_v31, %v4169_v56  ;;  %v2155_v32 = vshll.u32 %v2744_v37, %v2140_v55 }
 0x1f2   :  { %v1945_v4 = vmul.f32 -0.001358992, %v1944_v57  ;;  %v1952_v60 = vmul.f32 -0.00019511016, %v1944_v57  ;;  %v2156_v15 = vshrl.u32 %v2745_v46, %v4169_v56  ;;  %v4205_v45 = vor.u32 %v2147_v3, %v2146_v40 }
 0x1f3   :  { %v4189_v53 = vshrl.u32 %v2070_v25, 30  ;;  %v2151_v41 = vor.u32 %v2150_v9, %v2149_v18  ;;  %v2154_v13 = vor.u32 %v2153_v10, %v2152_v59  ;;  %vm1962_vm1 = vcmp.lt.s32.totalorder %v4173_v5, 2 }
 0x1f4   :  { %v1946_v54 = vadd.f32 0.041655596, %v1945_v4  ;;  %v1953_v27 = vadd.f32 0.008332121, %v1952_v60  ;;  %v2157_v12 = vor.u32 %v2156_v15, %v2155_v32  ;;  %vm2158_vm2 = vcmp.lt.s32.totalorder %v4178_v21, 1 }
 0x1f5   :  { %v2072_v34 = vshll.u32 %v4189_v53, 30  ;;  %vm1959_vm3 = vweird.f32 %v2785_v62  ;;  %v2145_v49 = vor.u32 %v2144_v30, %v2143_v24  ;;  %vm2160_vm4 = vcmp.lt.s32.totalorder %v4178_v21, 3 }
 0x1f6   :  { %v1947_v38 = vmul.f32 %v1946_v54, %v1944_v57  ;;  %v1954_v26 = vmul.f32 %v1953_v27, %v1944_v57  ;;  %vm2161_vm5 = vcmp.lt.s32.totalorder %v4178_v21, 4  ;;  %v2668_v20 = vadd.s32 4294967169, %v2285_v43 }
 0x1f7   :  { %v4208_v8 = vsub.s32 %v2069_v16, %v2072_v34  ;;  %vm1973_vm7 = vcmp.lt.s32.totalorder %v2787_v63, 0  ;;  %vm2159_vm8 = vcmp.lt.s32.totalorder %v4178_v21, 2  ;;  %v2167_v11 = vsel %vm2161_vm5, %v2154_v13, 920167782 }
 0x1f8   :  { %v1948_v42 = vadd.f32 -0.4999988, %v1947_v38  ;;  %v1955_v61 = vadd.f32 -0.16666654, %v1954_v26  ;;  %v2170_v44 = vsel %vm2158_vm2, %v4205_v45, %v2151_v41  ;;  %v2171_v50 = vsel %vm2161_vm5, %v2157_v12, 1326507024 }
 0x1f9   :  { %vm2074_vm6 = vcmp.lt.s32.totalorder %v4208_v8, 0  ;;  %v2075_v14 = vsub.s32 0, %v4208_v8  ;;  %v2176_v22 = vshrl.u32 %v4180_v28, 16  ;;  %v2172_v16 = vsel %vm2160_vm4, %v2154_v13, %v2171_v50 }
 0x1fa   :  { %v1949_v52 = vmul.f32 %v1948_v42, %v1944_v57  ;;  %v1956_v6 = vmul.f32 %v1955_v61, %v1944_v57  ;;  %v2166_v57 = vsel %vm2158_vm2, %v2145_v49, %v4205_v45  ;;  %v4232_v43 = vadd.s32 1, %v2668_v20 }
 0x1fb   :  { %v2076_v48 = vsel %vm2074_vm6, %v2075_v14, %v4208_v8  ;;  %v2168_v25 = vsel %vm2160_vm4, %v2151_v41, %v2167_v11  ;;  %v2173_v40 = vsel %vm2159_vm8, %v2170_v44, %v2172_v16  ;;  %v4241_v59 = vand.u32 8388607, %v2281_v58 }
 0x1fc   :  { %v1950_v17 = vadd.f32 1.0, %v1949_v52  ;;  %v1957_v55 = vadd.f32 1.0, %v1956_v6  ;;  %v2077_v51 = vclz %v2076_v48  ;;  %v2177_v18 = vand.u32 65535, %v2173_v40 }
 0x1fd   :  { %v2178_v9 = vshrl.u32 %v2173_v40, 16  ;;  %v2142_v10 = vshrl.u32 %v2740_v29, %v4169_v56  ;;  %v2163_v24 = vsel %vm2161_vm5, %v2151_v41, 2102212464  ;;  %v2169_v30 = vsel %vm2159_vm8, %v2166_v57, %v2168_v25 }
 0x1fe   :  { %v1958_v4 = vmul.f32 %v1957_v55, %v4167_v7  ;;  %v1967_v60 = vxor.u32 2147483648, %v1950_v17  ;;  %v2663_v3 = vadd.s32 4294967294, %v2077_v51  ;;  %v2095_v7 = vsub.s32 4, %v4189_v53 }
 0x1ff   :  { %v2180_v32 = vmul.u32 %v2178_v9, %v4202_v36  ;;  %vm2292_vm10 = vcmp.gt.s32.totalorder %v4232_v43, 0  ;;  %vm4258_vm11 = vcmp.le.f32.partialorder %v1971_v19, 0.7853982  ;;  %v2179_v26 = vmul.u32 %v2177_v18, %v4202_v36 }
 0x200   :  { %v1964_v54 = vxor.u32 2147483648, %v1958_v4  ;;  %v1968_v27 = vsel %vm1966_vm15, %v1967_v60, %v1958_v4  ;;  %vm2664_vm9 = vcmp.lt.s32.totalorder %v2663_v3, 0  ;;  %v2181_v34 = vmul.u32 %v2177_v18, %v2176_v22 }
 0x201   :  { %v2080_v56 = vsel %vm2664_vm9, 0, %v2663_v3  ;;  %v2096_v19 = vsel %vm1973_vm7, %v2095_v7, %v4189_v53  ;;  %v2199_v20 = vand.u32 65535, %v2169_v30  ;;  %v2200_v52 = vshrl.u32 %v2169_v30, 16 }
 0x202   :  { %v1965_v15 = vsel %vm1963_vm0, %v1950_v17, %v1964_v54  ;;  %v2081_v13 = vsub.s32 32, %v2080_v56  ;;  %v2082_v12 = vshll.u32 %v4208_v8, %v2080_v56  ;;  %v2085_v42 = vsub.s32 4294967266, %v2080_v56 }
 0x203   :  { %v1969_v41 = vsel %vm1962_vm1, %v1965_v15, %v1968_v27  ;;  %v2182_v11 = vmul.u32 %v2178_v9, %v2176_v22  ;;  %v2183_v44 = vshll.u32 %v2180_v32, 16  ;;  %v2162_v5 = vsel %vm2158_vm2, %v2142_v10, %v2145_v49 }
 0x204   :  { %v1970_v61 = vsel %vm1959_vm3, nan, %v1969_v41  ;;  %v2083_v6 = vshrl.u32 %v4176_v47, %v2081_v13  ;;  %v2086_v14 = vadd.s32 127, %v2085_v42  ;;  %v2164_v62 = vsel %vm2160_vm4, %v4205_v45, %v2163_v24 }
 0x205   :  { %2602 = vst [vmem:[#allocation5 + $0x58] sm:$0xff] %v1970_v61  ;;  %v2184_v8 = vshrl.u32 %v2180_v32, 16  ;;  %v2185_v50 = vshll.u32 %v2181_v34, 16  ;;  %vm2187_vm12 = vc.u32 %v2179_v26, %v2183_v44  ;;  %v2189_v53 = vadd.s32 %v2183_v44, %v2179_v26 }
 0x206   :  { %v2084_v17 = vor.u32 %v2083_v6, %v2082_v12  ;;  %v2087_v55 = vshll.u32 %v2086_v14, 23  ;;  %v2188_v48 = vsel %vm2187_vm12, 1, %v2746_v23  ;;  %v2201_v47 = vmul.u32 %v2199_v20, %v4202_v36 }
 0x207   :  { %v2202_v51 = vmul.u32 %v2200_v52, %v4202_v36  ;;  %v2203_v57 = vmul.u32 %v2199_v20, %v2176_v22  ;;  %v2190_v49 = vadd.s32 %v2188_v48, %v2182_v11  ;;  %vm2191_vm13 = vc.u32 %v2189_v53, %v2185_v50 }
 0x208   :  { %v2088_v16 = vor.u32 4788187, %v2087_v55  ;;  %v2091_v4 = vcvt.s32.f32 %v2084_v17  ;;  %v2192_v60 = vsel %vm2191_vm13, 1, %v2746_v23  ;;  %v2204_v45 = vmul.u32 %v2200_v52, %v2176_v22 }
 0x209   :  { %v2205_v25 = vshll.u32 %v2202_v51, 16  ;;  %v2207_v40 = vshll.u32 %v2203_v57, 16  ;;  %v2098_v18 = vsel %vm4258_vm11, 0, %v2096_v19  ;;  %v2194_v9 = vadd.s32 %v2192_v60, %v2190_v49 }
 0x20a   :  { %v2089_v3 = vand.u32 2147483647, %v2088_v16  ;;  %v2289_v54 = vor.u32 8388608, %v4241_v59  ;;  %v2165_v36 = vsel %vm2159_vm8, %v2162_v5, %v2164_v62  ;;  %v2293_v7 = vsel %vm2292_vm10, %v4232_v43, 0 }
 0x20b   :  { %vm2209_vm14 = vc.u32 %v2201_v47, %v2205_v25  ;;  %v2211_v27 = vadd.s32 %v2205_v25, %v2201_v47  ;;  %v2186_v22 = vshrl.u32 %v2181_v34, 16  ;;  %v2195_v24 = vadd.s32 %v2194_v9, %v2184_v8 }
 0x20c   :  { %v2092_v10 = vmul.f32 %v2091_v4, %v2089_v3  ;;  %v2210_v30 = vsel %vm2209_vm14, 1, %v2746_v23  ;;  %v2206_v32 = vshrl.u32 %v2202_v51, 16  ;;  %v2295_v56 = vand.u32 31, %v2293_v7 }
 0x20d   :  { %v2212_v15 = vadd.s32 %v2210_v30, %v2204_v45  ;;  %vm2213_vm15 = vc.u32 %v2211_v27, %v2207_v40  ;;  %v2115_v59 = vadd.s32 3, %v2098_v18  ;;  %v2208_v41 = vshrl.u32 %v2203_v57, 16 }
 0x20e   :  { %v2093_v26 = vxor.u32 2147483648, %v2092_v10  ;;  %v2214_v21 = vsel %vm2213_vm15, 1, %v2746_v23  ;;  %v2219_v12 = vmul.u32 %v4180_v28, %v2165_v36  ;;  %v4292_v42 = vshrl.u32 %v2293_v7, 5 }
 0x20f   :  { %v2216_v13 = vadd.s32 %v2214_v21, %v2212_v15  ;;  %v4294_v43 = vsub.s32 32, %v2295_v56  ;;  %v4298_v61 = vadd.s32 %v2195_v24, %v2186_v22  ;;  %v4300_v19 = vadd.s32 %v2211_v27, %v2207_v40 }
 0x210   :  { %v2094_v34 = vsel %vm1973_vm7, %v2093_v26, %v2092_v10  ;;  %v2298_v20 = vshll.u32 %v2740_v29, %v2295_v56  ;;  %v2301_v14 = vshll.u32 %v2741_v31, %v2295_v56  ;;  %v2304_v5 = vshll.u32 %v2742_v33, %v2295_v56 }
 0x211   :  { %v2097_v52 = vsel %vm4258_vm11, %v2787_v63, %v2094_v34  ;;  %v2217_v6 = vadd.s32 %v2216_v13, %v2206_v32  ;;  %v2299_v28 = vshrl.u32 %v2741_v31, %v4294_v43  ;;  %v2302_v44 = vshrl.u32 %v2742_v33, %v4294_v43 }
 0x212   :  { %v2099_v11 = vmul.f32 %v2097_v52, %v2097_v52  ;;  %v2307_v62 = vshll.u32 %v2743_v35, %v2295_v56  ;;  %v2305_v50 = vshrl.u32 %v2743_v35, %v4294_v43  ;;  %v2308_v38 = vshrl.u32 %v2744_v37, %v4294_v43 }
 0x213   :  { %v2218_v8 = vadd.s32 %v2217_v6, %v2208_v41  ;;  %v2310_v17 = vshll.u32 %v2744_v37, %v2295_v56  ;;  %vm2221_vm0 = vc.u32 %v4298_v61, %v4300_v19  ;;  %v4320_v48 = vor.u32 %v2299_v28, %v2298_v20 }
 0x214   :  { %v2100_v55 = vmul.f32 -0.001358992, %v2099_v11  ;;  %v2107_v53 = vmul.f32 -0.00019511016, %v2099_v11  ;;  %v4322_v51 = vor.u32 %v2302_v44, %v2301_v14  ;;  %v2309_v57 = vor.u32 %v2308_v38, %v2307_v62 }
 0x215   :  { %v2222_v47 = vadd.s32 1, %v2218_v8  ;;  %v2311_v16 = vshrl.u32 %v2745_v46, %v4294_v43  ;;  %vm2313_vm1 = vcmp.lt.s32.totalorder %v4292_v42, 1  ;;  %vm2316_vm2 = vcmp.lt.s32.totalorder %v4292_v42, 4 }
 0x216   :  { %v2101_v4 = vadd.f32 0.041655596, %v2100_v55  ;;  %v2108_v49 = vadd.f32 0.008332121, %v2107_v53  ;;  %v4328_v45 = vor.u32 %v2305_v50, %v2304_v5  ;;  %v4330_v40 = vshll.u32 %v2289_v54, 8 }
 0x217   :  { %v2223_v60 = vsel %vm2221_vm0, %v2222_v47, %v2218_v8  ;;  %v2312_v25 = vor.u32 %v2311_v16, %v2310_v17  ;;  %vm2315_vm3 = vcmp.lt.s32.totalorder %v4292_v42, 3  ;;  %vm2314_vm4 = vcmp.lt.s32.totalorder %v4292_v42, 2 }
 0x218   :  { %v2102_v3 = vmul.f32 %v2101_v4, %v2099_v11  ;;  %v2109_v18 = vmul.f32 %v2108_v49, %v2099_v11  ;;  %v2224_v9 = vadd.s32 %v2223_v60, %v2219_v12  ;;  %v2321_v36 = vsel %vm2313_vm1, %v4320_v48, %v4322_v51 }
 0x219   :  { %v2322_v27 = vsel %vm2316_vm2, %v2309_v57, 920167782  ;;  %v2116_v22 = vand.u32 3, %v2115_v59  ;;  %v2325_v30 = vsel %vm2313_vm1, %v4322_v51, %v4328_v45  ;;  %v2326_v32 = vsel %vm2316_vm2, %v2312_v25, 1326507024 }
 0x21a   :  { %v2103_v7 = vadd.f32 -0.4999988, %v2102_v3  ;;  %v2110_v10 = vadd.f32 -0.16666654, %v2109_v18  ;;  %v2225_v54 = vadd.s32 536870912, %v2224_v9  ;;  %v2323_v24 = vsel %vm2315_vm3, %v4328_v45, %v2322_v27 }
 0x21b   :  { %v2330_v15 = vand.u32 65535, %v4330_v40  ;;  %v2324_v59 = vsel %vm2314_vm4, %v2321_v36, %v2323_v24  ;;  %v2327_v21 = vsel %vm2315_vm3, %v2309_v57, %v2326_v32  ;;  %vm2114_vm5 = vweird.f32 %v2787_v63 }
 0x21c   :  { %v2104_v56 = vmul.f32 %v2103_v7, %v2099_v11  ;;  %v2111_v26 = vmul.f32 %v2110_v10, %v2099_v11  ;;  %v4350_v41 = vshrl.u32 %v2225_v54, 30  ;;  %v2355_v13 = vshrl.u32 %v2324_v59, 16 }
 0x21d   :  { %vm2121_vm6 = vcmp.eq.s32.totalorder %v2116_v22, 2  ;;  %v2328_v6 = vsel %vm2314_vm4, %v2325_v30, %v2327_v21  ;;  %v2331_v28 = vshrl.u32 %v4330_v40, 16  ;;  %v2354_v14 = vand.u32 65535, %v2324_v59 }
 0x21e   :  { %v2105_v12 = vadd.f32 1.0, %v2104_v56  ;;  %v2112_v34 = vadd.f32 1.0, %v2111_v26  ;;  %v2227_v20 = vshll.u32 %v4350_v41, 30  ;;  %v4361_v62 = vmul.u32 %v2355_v13, %v2330_v15 }
 0x21f   :  { %vm2117_vm7 = vcmp.lt.s32.totalorder %v2116_v22, 2  ;;  %vm2118_vm8 = vcmp.eq.s32.totalorder %v2116_v22, 0  ;;  %v2332_v8 = vand.u32 65535, %v2328_v6  ;;  %v2333_v50 = vshrl.u32 %v2328_v6, 16 }
 0x220   :  { %v2113_v11 = vmul.f32 %v2112_v34, %v2097_v52  ;;  %v2122_v44 = vxor.u32 2147483648, %v2105_v12  ;;  %v2228_v5 = vsub.s32 %v2224_v9, %v2227_v20  ;;  %v2356_v16 = vmul.u32 %v2354_v14, %v2330_v15 }
 0x221   :  { %v2334_v53 = vmul.u32 %v2332_v8, %v2330_v15  ;;  %v2335_v47 = vmul.u32 %v2333_v50, %v2330_v15  ;;  %v2336_v57 = vmul.u32 %v2332_v8, %v2331_v28  ;;  %v2358_v60 = vmul.u32 %v2354_v14, %v2331_v28 }
 0x222   :  { %v2119_v38 = vxor.u32 2147483648, %v2113_v11  ;;  %v2123_v17 = vsel %vm2121_vm6, %v2122_v44, %v2113_v11  ;;  %vm2229_vm9 = vcmp.lt.s32.totalorder %v2228_v5, 0  ;;  %v2230_v55 = vsub.s32 0, %v2228_v5 }
 0x223   :  { %v2360_v52 = vshll.u32 %v4361_v62, 16  ;;  %v2337_v18 = vmul.u32 %v2333_v50, %v2331_v28  ;;  %v2338_v9 = vshll.u32 %v2335_v47, 16  ;;  %v2220_v27 = vadd.s32 %v4300_v19, %v4298_v61 }
 0x224   :  { %v2120_v4 = vsel %vm2118_vm8, %v2105_v12, %v2119_v38  ;;  %v2231_v49 = vsel %vm2229_vm9, %v2230_v55, %v2228_v5  ;;  %v2297_v7 = vshrl.u32 %v2740_v29, %v4294_v43  ;;  %v2340_v10 = vshll.u32 %v2336_v57, 16 }
 0x225   :  { %v2124_v25 = vsel %vm2117_vm7, %v2120_v4, %v2123_v17  ;;  %v2232_v3 = vclz %v2231_v49  ;;  %vm2342_vm10 = vc.u32 %v2334_v53, %v2338_v9  ;;  %v2344_v24 = vadd.s32 %v2338_v9, %v2334_v53 }
 0x226   :  { %v2125_v36 = vsel %vm2114_vm5, nan, %v2124_v25  ;;  %v2359_v30 = vmul.u32 %v2355_v13, %v2331_v28  ;;  %v2339_v22 = vshrl.u32 %v2335_v47, 16  ;;  %v2343_v32 = vsel %vm2342_vm10, 1, %v2746_v23 }
 0x227   :  { %v2666_v54 = vadd.s32 4294967294, %v2232_v3  ;;  %2603 = vst [vmem:[#allocation5 + $0x60] sm:$0xff] %v2125_v36  ;;  %v2362_v15 = vshll.u32 %v2358_v60, 16  ;;  %vm2364_vm11 = vc.u32 %v2356_v16, %v2360_v52  ;;  %v2345_v63 = vadd.s32 %v2343_v32, %v2337_v18 }
 0x228   :  { %vm2346_vm13 = vc.u32 %v2344_v24, %v2340_v10  ;;  %v2366_v56 = vadd.s32 %v2360_v52, %v2356_v16  ;;  %v2318_v43 = vsel %vm2316_vm2, %v4328_v45, 2102212464  ;;  %v2365_v19 = vsel %vm2364_vm11, 1, %v2746_v23 }
 0x229   :  { %vm2667_vm12 = vcmp.lt.s32.totalorder %v2666_v54, 0  ;;  %v2347_v61 = vsel %vm2346_vm13, 1, %v2746_v23  ;;  %v2341_v34 = vshrl.u32 %v2336_v57, 16  ;;  %v2361_v20 = vshrl.u32 %v4361_v62, 16 }
 0x22a   :  { %v2235_v26 = vsel %vm2667_vm12, 0, %v2666_v54  ;;  %v2349_v12 = vadd.s32 %v2347_v61, %v2345_v63  ;;  %v2367_v6 = vadd.s32 %v2365_v19, %v2359_v30  ;;  %vm2368_vm14 = vc.u32 %v2366_v56, %v2362_v15 }
 0x22b   :  { %v2236_v59 = vsub.s32 32, %v2235_v26  ;;  %v2237_v21 = vshll.u32 %v2228_v5, %v2235_v26  ;;  %v2240_v13 = vsub.s32 4294967266, %v2235_v26  ;;  %v2250_v44 = vsub.s32 4, %v4350_v41 }
 0x22c   :  { %v2350_v11 = vadd.s32 %v2349_v12, %v2339_v22  ;;  %v2317_v45 = vsel %vm2313_vm1, %v2297_v7, %v4320_v48  ;;  %v2319_v5 = vsel %vm2315_vm3, %v4322_v51, %v2318_v43  ;;  %v2369_v8 = vsel %vm2368_vm14, 1, %v2746_v23 }
 0x22d   :  { %v2238_v28 = vshrl.u32 %v2220_v27, %v2236_v59  ;;  %v2241_v14 = vadd.s32 127, %v2240_v13  ;;  %v2363_v62 = vshrl.u32 %v2358_v60, 16  ;;  %v2371_v17 = vadd.s32 %v2369_v8, %v2367_v6 }
 0x22e   :  { %vm2128_vm15 = vcmp.lt.s32.totalorder %v2789_v0, 0  ;;  %v4387_v55 = vadd.s32 %v2350_v11, %v2341_v34  ;;  %v4389_v53 = vadd.s32 %v2366_v56, %v2362_v15  ;;  %v2439_v47 = vand.u32 2139095040, %v2793_v2 }
 0x22f   :  { %v2239_v50 = vor.u32 %v2238_v28, %v2237_v21  ;;  %v2242_v38 = vshll.u32 %v2241_v14, 23  ;;  %v2320_v16 = vsel %vm2314_vm4, %v2317_v45, %v2319_v5  ;;  %v2372_v51 = vadd.s32 %v2371_v17, %v2361_v20 }
 0x230   :  { %v2251_v4 = vsel %vm2128_vm15, %v2250_v44, %v4350_v41  ;;  %v2440_v49 = vshrl.u32 %v2439_v47, 23  ;;  %vm2127_vm0 = vcmp.le.f32.partialorder %v2126_v39, 0.7853982  ;;  %v2374_v25 = vmul.u32 %v4330_v40, %v2320_v16 }
 0x231   :  { %v2243_v57 = vor.u32 4788187, %v2242_v38  ;;  %v2246_v48 = vcvt.s32.f32 %v2239_v50  ;;  %v2373_v52 = vadd.s32 %v2372_v51, %v2363_v62  ;;  %vm2376_vm1 = vc.u32 %v4387_v55, %v4389_v53 }
 0x232   :  { %v2671_v3 = vadd.s32 4294967169, %v2440_v49  ;;  %v2253_v42 = vsel %vm2127_vm0, 0, %v2251_v4  ;;  %v2436_v32 = vand.u32 2147483647, %v2793_v2  ;;  %vm2269_vm12 = vweird.f32 %v2789_v0 }
 0x233   :  { %v2244_v60 = vand.u32 2147483647, %v2243_v57  ;;  %v2377_v9 = vadd.s32 1, %v2373_v52  ;;  %v2270_v10 = vadd.s32 3, %v2253_v42  ;;  %vm2283_vm13 = vcmp.lt.s32.totalorder %v2791_v1, 0 }
 0x234   :  { %v2446_v36 = vadd.s32 1, %v2671_v3  ;;  %v2443_v21 = vand.u32 8388607, %v2436_v32  ;;  %vm4484_vm14 = vcmp.le.f32.partialorder %v2281_v58, 0.7853982 }
 0x235   :  { %v2247_v18 = vmul.f32 %v2246_v48, %v2244_v60  ;;  %v2378_v7 = vsel %vm2376_vm1, %v2377_v9, %v2373_v52  ;;  %v4406_v15 = vand.u32 3, %v2270_v10 }
 0x236   :  { %v2379_v41 = vadd.s32 %v2378_v7, %v2374_v25  ;;  %vm2447_vm2 = vcmp.gt.s32.totalorder %v2446_v36, 0  ;;  %v2444_v47 = vor.u32 8388608, %v2443_v21 }
 0x237   :  { %v2248_v27 = vxor.u32 2147483648, %v2247_v18  ;;  %v2448_v24 = vsel %vm2447_vm2, %v2446_v36, 0  ;;  %vm2276_vm3 = vcmp.eq.s32.totalorder %v4406_v15, 2  ;;  %vm2273_vm4 = vcmp.eq.s32.totalorder %v4406_v15, 0 }
 0x238   :  { %v2380_v40 = vadd.s32 536870912, %v2379_v41  ;;  %v2450_v30 = vand.u32 31, %v2448_v24  ;;  %v4418_v12 = vshrl.u32 %v2448_v24, 5  ;;  %vm2272_vm6 = vcmp.lt.s32.totalorder %v4406_v15, 2 }
 0x239   :  { %v2249_v54 = vsel %vm2128_vm15, %v2248_v27, %v2247_v18  ;;  %v4449_v3 = vshll.u32 %v2444_v47, 8 }
 0x23a   :  { %v2252_v39 = vsel %vm2127_vm0, %v2789_v0, %v2249_v54  ;;  %v4408_v63 = vshrl.u32 %v2380_v40, 30  ;;  %v4410_v43 = vsub.s32 32, %v2450_v30  ;;  %v2453_v34 = vshll.u32 %v2740_v29, %v2450_v30 }
 0x23b   :  { %v2254_v22 = vmul.f32 %v2252_v39, %v2252_v39  ;;  %v2456_v20 = vshll.u32 %v2741_v31, %v2450_v30  ;;  %v2462_v14 = vshll.u32 %v2743_v35, %v2450_v30  ;;  %v2465_v38 = vshll.u32 %v2744_v37, %v2450_v30 }
 0x23c   :  { %v2382_v61 = vshll.u32 %v4408_v63, 30  ;;  %v2463_v11 = vshrl.u32 %v2744_v37, %v4410_v43  ;;  %v2454_v45 = vshrl.u32 %v2741_v31, %v4410_v43  ;;  %v2457_v5 = vshrl.u32 %v2742_v33, %v4410_v43 }
 0x23d   :  { %v2255_v56 = vmul.f32 -0.001358992, %v2254_v22  ;;  %v2262_v26 = vmul.f32 -0.00019511016, %v2254_v22  ;;  %v2466_v62 = vshrl.u32 %v2745_v46, %v4410_v43  ;;  %v2459_v57 = vshll.u32 %v2742_v33, %v2450_v30 }
 0x23e   :  { %v4416_v13 = vsub.s32 %v2379_v41, %v2382_v61  ;;  %v2460_v31 = vshrl.u32 %v2743_v35, %v4410_v43  ;;  %v2464_v4 = vor.u32 %v2463_v11, %v2462_v14  ;;  %v4440_v49 = vor.u32 %v2454_v45, %v2453_v34 }
 0x23f   :  { %v2256_v19 = vadd.f32 0.041655596, %v2255_v56  ;;  %v2263_v59 = vadd.f32 0.008332121, %v2262_v26  ;;  %v4442_v60 = vor.u32 %v2457_v5, %v2456_v20  ;;  %v2467_v37 = vor.u32 %v2466_v62, %v2465_v38 }
 0x240   :  { %vm2384_vm5 = vcmp.lt.s32.totalorder %v4416_v13, 0  ;;  %v2385_v44 = vsub.s32 0, %v4416_v13  ;;  %vm2471_vm7 = vcmp.lt.s32.totalorder %v4418_v12, 4  ;;  %vm2468_vm8 = vcmp.lt.s32.totalorder %v4418_v12, 1 }
 0x241   :  { %v2257_v6 = vmul.f32 %v2256_v19, %v2254_v22  ;;  %v2264_v28 = vmul.f32 %v2263_v59, %v2254_v22  ;;  %v2375_v33 = vadd.s32 %v4389_v53, %v4387_v55  ;;  %v2461_v35 = vor.u32 %v2460_v31, %v2459_v57 }
 0x242   :  { %v2386_v17 = vsel %vm2384_vm5, %v2385_v44, %v4416_v13  ;;  %vm2470_vm9 = vcmp.lt.s32.totalorder %v4418_v12, 3  ;;  %v2477_v9 = vsel %vm2471_vm7, %v2464_v4, 920167782  ;;  %vm2469_vm11 = vcmp.lt.s32.totalorder %v4418_v12, 2 }
 0x243   :  { %v2258_v8 = vadd.f32 -0.4999988, %v2257_v6  ;;  %v2265_v50 = vadd.f32 -0.16666654, %v2264_v28  ;;  %v2387_v51 = vclz %v2386_v17  ;;  %v2476_v27 = vsel %vm2468_vm8, %v4440_v49, %v4442_v60 }
 0x244   :  { %v2481_v55 = vsel %vm2471_vm7, %v2467_v37, 1326507024  ;;  %v2478_v24 = vsel %vm2470_vm9, %v2461_v35, %v2477_v9  ;;  %v2485_v56 = vand.u32 65535, %v4449_v3  ;;  %v2486_v19 = vshrl.u32 %v4449_v3, 16 }
 0x245   :  { %v2259_v48 = vmul.f32 %v2258_v8, %v2254_v22  ;;  %v2266_v16 = vmul.f32 %v2265_v50, %v2254_v22  ;;  %v2669_v25 = vadd.s32 4294967294, %v2387_v51  ;;  %v2482_v22 = vsel %vm2470_vm9, %v2464_v4, %v2481_v55 }
 0x246   :  { %v2479_v61 = vsel %vm2469_vm11, %v2476_v27, %v2478_v24  ;;  %v2452_v11 = vshrl.u32 %v2740_v29, %v4410_v43  ;;  %v2473_v44 = vsel %vm2471_vm7, %v2461_v35, 2102212464  ;;  %v2405_v38 = vsub.s32 4, %v4408_v63 }
 0x247   :  { %v2260_v46 = vadd.f32 1.0, %v2259_v48  ;;  %v2267_v52 = vadd.f32 1.0, %v2266_v16  ;;  %vm2670_vm10 = vcmp.lt.s32.totalorder %v2669_v25, 0  ;;  %v2509_v28 = vand.u32 65535, %v2479_v61 }
 0x248   :  { %v2390_v36 = vsel %vm2670_vm10, 0, %v2669_v25  ;;  %v2510_v45 = vshrl.u32 %v2479_v61, 16  ;;  %v2472_v29 = vsel %vm2468_vm8, %v2452_v11, %v4440_v49  ;;  %v2474_v43 = vsel %vm2470_vm9, %v4442_v60, %v2473_v44 }
 0x249   :  { %v2268_v18 = vmul.f32 %v2267_v52, %v2252_v39  ;;  %v2277_v42 = vxor.u32 2147483648, %v2260_v46  ;;  %v2391_v10 = vsub.s32 32, %v2390_v36  ;;  %v2392_v41 = vshll.u32 %v4416_v13, %v2390_v36 }
 0x24a   :  { %v2395_v54 = vsub.s32 4294967266, %v2390_v36  ;;  %v2480_v39 = vsel %vm2468_vm8, %v4442_v60, %v2461_v35  ;;  %v2511_v62 = vmul.u32 %v2509_v28, %v2485_v56  ;;  %v2512_v17 = vmul.u32 %v2510_v45, %v2485_v56 }
 0x24b   :  { %v2274_v53 = vxor.u32 2147483648, %v2268_v18  ;;  %v2278_v7 = vsel %vm2276_vm3, %v2277_v42, %v2268_v18  ;;  %v2393_v30 = vshrl.u32 %v2375_v33, %v2391_v10  ;;  %v2483_v13 = vsel %vm2469_vm11, %v2480_v39, %v2482_v22 }
 0x24c   :  { %v2396_v26 = vadd.s32 127, %v2395_v54  ;;  %v2487_v20 = vand.u32 65535, %v2483_v13  ;;  %v2488_v6 = vshrl.u32 %v2483_v13, 16  ;;  %v2513_v47 = vmul.u32 %v2509_v28, %v2486_v19 }
 0x24d   :  { %v2275_v40 = vsel %vm2273_vm4, %v2260_v46, %v2274_v53  ;;  %v2394_v21 = vor.u32 %v2393_v30, %v2392_v41  ;;  %v2514_v51 = vmul.u32 %v2510_v45, %v2486_v19  ;;  %v2515_v4 = vshll.u32 %v2512_v17, 16 }
 0x24e   :  { %v2279_v0 = vsel %vm2272_vm6, %v2275_v40, %v2278_v7  ;;  %v2397_v15 = vshll.u32 %v2396_v26, 23  ;;  %v2489_v8 = vmul.u32 %v2487_v20, %v2485_v56  ;;  %v2490_v50 = vmul.u32 %v2488_v6, %v2485_v56 }
 0x24f   :  { %v2280_v59 = vsel %vm2269_vm12, nan, %v2279_v0  ;;  %v2401_v14 = vcvt.s32.f32 %v2394_v21  ;;  %v2491_v58 = vmul.u32 %v2487_v20, %v2486_v19  ;;  %v2492_v31 = vmul.u32 %v2488_v6, %v2486_v19 }
 0x250   :  { %2604 = vst [vmem:[#allocation5 + $0x68] sm:$0xff] %v2280_v59  ;;  %v2398_v5 = vor.u32 4788187, %v2397_v15  ;;  %v2493_v48 = vshll.u32 %v2490_v50, 16  ;;  %v2517_v52 = vshll.u32 %v2513_v47, 16  ;;  %v2494_v25 = vshrl.u32 %v2490_v50, 16 }
 0x251   :  { %v2495_v16 = vshll.u32 %v2491_v58, 16  ;;  %vm2519_vm0 = vc.u32 %v2511_v62, %v2515_v4  ;;  %v2521_v35 = vadd.s32 %v2515_v4, %v2511_v62  ;;  %v2516_v36 = vshrl.u32 %v2512_v17, 16 }
 0x252   :  { %v2399_v57 = vand.u32 2147483647, %v2398_v5  ;;  %vm2497_vm15 = vc.u32 %v2489_v8, %v2493_v48  ;;  %v2499_v46 = vadd.s32 %v2493_v48, %v2489_v8  ;;  %v2520_v49 = vsel %vm2519_vm0, 1, %v2746_v23 }
 0x253   :  { %v2498_v33 = vsel %vm2497_vm15, 1, %v2746_v23  ;;  %v2522_v60 = vadd.s32 %v2520_v49, %v2514_v51  ;;  %vm2523_vm2 = vc.u32 %v2521_v35, %v2517_v52  ;;  %v2496_v55 = vshrl.u32 %v2491_v58, 16 }
 0x254   :  { %v2402_v37 = vmul.f32 %v2401_v14, %v2399_v57  ;;  %v2500_v42 = vadd.s32 %v2498_v33, %v2492_v31  ;;  %vm2501_vm1 = vc.u32 %v2499_v46, %v2495_v16  ;;  %v2524_v7 = vsel %vm2523_vm2, 1, %v2746_v23 }
 0x255   :  { %v2502_v9 = vsel %vm2501_vm1, 1, %v2746_v23  ;;  %v2406_v10 = vsel %vm2283_vm13, %v2405_v38, %v4408_v63  ;;  %v2518_v54 = vshrl.u32 %v2513_v47, 16  ;;  %v2526_v24 = vadd.s32 %v2524_v7, %v2522_v60 }
 0x256   :  { %v2403_v18 = vxor.u32 2147483648, %v2402_v37  ;;  %v2504_v53 = vadd.s32 %v2502_v9, %v2500_v42  ;;  %v2525_v30 = vadd.s32 %v2521_v35, %v2517_v52  ;;  %v2475_v22 = vsel %vm2469_vm11, %v2472_v29, %v2474_v43 }
 0x257   :  { %v2527_v56 = vadd.s32 %v2526_v24, %v2516_v36  ;;  %v2408_v23 = vsel %vm4484_vm14, 0, %v2406_v10  ;;  %v2529_v21 = vmul.u32 %v4449_v3, %v2475_v22  ;;  %vm2424_vm7 = vweird.f32 %v2791_v1 }
 0x258   :  { %v2404_v27 = vsel %vm2283_vm13, %v2403_v18, %v2402_v37  ;;  %v2505_v40 = vadd.s32 %v2504_v53, %v2494_v25  ;;  %v2425_v13 = vadd.s32 3, %v2408_v23  ;;  %vm2438_vm10 = vcmp.lt.s32.totalorder %v2793_v2, 0 }
 0x259   :  { %v2407_v41 = vsel %vm4484_vm14, %v2791_v1, %v2404_v27  ;;  %v2528_v63 = vadd.s32 %v2527_v56, %v2518_v54  ;;  %vm2437_vm11 = vcmp.le.f32.partialorder %v2436_v32, 0.7853982  ;;  %vm2579_vm15 = vweird.f32 %v2793_v2 }
 0x25a   :  { %v2409_v39 = vmul.f32 %v2407_v41, %v2407_v41  ;;  %v2506_v61 = vadd.s32 %v2505_v40, %v2496_v55  ;;  %v2426_v44 = vand.u32 3, %v2425_v13 }
 0x25b   :  { %v2532_v15 = vadd.s32 1, %v2528_v63 }
 0x25c   :  { %v2410_v0 = vmul.f32 -0.001358992, %v2409_v39  ;;  %v2417_v26 = vmul.f32 -0.00019511016, %v2409_v39  ;;  %vm2531_vm3 = vc.u32 %v2506_v61, %v2525_v30  ;;  %vm2431_vm4 = vcmp.eq.s32.totalorder %v2426_v44, 2 }
 0x25d   :  { %v2533_v28 = vsel %vm2531_vm3, %v2532_v15, %v2528_v63  ;;  %vm2428_vm5 = vcmp.eq.s32.totalorder %v2426_v44, 0  ;;  %vm2427_vm6 = vcmp.lt.s32.totalorder %v2426_v44, 2  ;;  %v2530_v37 = vadd.s32 %v2525_v30, %v2506_v61 }
 0x25e   :  { %v2411_v19 = vadd.f32 0.041655596, %v2410_v0  ;;  %v2418_v59 = vadd.f32 0.008332121, %v2417_v26  ;;  %v2534_v11 = vadd.s32 %v2533_v28, %v2529_v21 }
 0x260   :  { %v2412_v20 = vmul.f32 %v2411_v19, %v2409_v39  ;;  %v2419_v6 = vmul.f32 %v2418_v59, %v2409_v39  ;;  %v2535_v5 = vadd.s32 536870912, %v2534_v11 }
 0x262   :  { %v2413_v12 = vadd.f32 -0.4999988, %v2412_v20  ;;  %v2420_v14 = vadd.f32 -0.16666654, %v2419_v6  ;;  %v2536_v58 = vshrl.u32 %v2535_v5, 30 }
 0x264   :  { %v2414_v34 = vmul.f32 %v2413_v12, %v2409_v39  ;;  %v2421_v45 = vmul.f32 %v2420_v14, %v2409_v39  ;;  %v2537_v3 = vshll.u32 %v2536_v58, 30  ;;  %v2560_v27 = vsub.s32 4, %v2536_v58 }
 0x266   :  { %v2415_v8 = vadd.f32 1.0, %v2414_v34  ;;  %v2422_v50 = vadd.f32 1.0, %v2421_v45  ;;  %v2538_v57 = vsub.s32 %v2534_v11, %v2537_v3  ;;  %v2561_v7 = vsel %vm2438_vm10, %v2560_v27, %v2536_v58 }
 0x267   :  { %v2563_v54 = vsel %vm2437_vm11, 0, %v2561_v7 }
 0x268   :  { %v2423_v38 = vmul.f32 %v2422_v50, %v2407_v41  ;;  %v2432_v62 = vxor.u32 2147483648, %v2415_v8  ;;  %vm2539_vm8 = vcmp.lt.s32.totalorder %v2538_v57, 0  ;;  %v2540_v48 = vsub.s32 0, %v2538_v57 }
 0x269   :  { %v2580_v22 = vadd.s32 3, %v2563_v54 }
 0x26a   :  { %v2429_v17 = vxor.u32 2147483648, %v2423_v38  ;;  %v2433_v47 = vsel %vm2431_vm4, %v2432_v62, %v2423_v38  ;;  %v2541_v43 = vsel %vm2539_vm8, %v2540_v48, %v2538_v57 }
 0x26b   :  { %v2542_v51 = vclz %v2541_v43  ;;  %v2581_v61 = vand.u32 3, %v2580_v22 }
 0x26c   :  { %v2430_v31 = vsel %vm2428_vm5, %v2415_v8, %v2429_v17 }
 0x26d   :  { %v2434_v16 = vsel %vm2427_vm6, %v2430_v31, %v2433_v47  ;;  %v2672_v4 = vadd.s32 4294967294, %v2542_v51  ;;  %vm2586_vm12 = vcmp.eq.s32.totalorder %v2581_v61, 2  ;;  %vm2583_vm13 = vcmp.eq.s32.totalorder %v2581_v61, 0 }
 0x26e   :  { %v2435_v29 = vsel %vm2424_vm7, nan, %v2434_v16  ;;  %vm2582_vm14 = vcmp.lt.s32.totalorder %v2581_v61, 2 }
 0x26f   :  { %2605 = vst [vmem:[#allocation5 + $0x70] sm:$0xff] %v2435_v29  ;;  %vm2673_vm9 = vcmp.lt.s32.totalorder %v2672_v4, 0 }
 0x270   :  { %v2545_v46 = vsel %vm2673_vm9, 0, %v2672_v4 }
 0x271   :  { %v2546_v52 = vsub.s32 32, %v2545_v46  ;;  %v2547_v25 = vshll.u32 %v2538_v57, %v2545_v46  ;;  %v2550_v33 = vsub.s32 4294967266, %v2545_v46 }
 0x273   :  { %v2548_v35 = vshrl.u32 %v2530_v37, %v2546_v52  ;;  %v2551_v18 = vadd.s32 127, %v2550_v33 }
 0x275   :  { %v2549_v42 = vor.u32 %v2548_v35, %v2547_v25  ;;  %v2552_v49 = vshll.u32 %v2551_v18, 23 }
 0x277   :  { %v2553_v1 = vor.u32 4788187, %v2552_v49  ;;  %v2556_v9 = vcvt.s32.f32 %v2549_v42 }
 0x279   :  { %v2554_v36 = vand.u32 2147483647, %v2553_v1 }
 0x27b   :  { %v2557_v60 = vmul.f32 %v2556_v9, %v2554_v36 }
 0x27d   :  { %v2558_v55 = vxor.u32 2147483648, %v2557_v60 }
 0x27f   :  { %v2559_v53 = vsel %vm2438_vm10, %v2558_v55, %v2557_v60 }
 0x280   :  { %v2562_v10 = vsel %vm2437_vm11, %v2793_v2, %v2559_v53 }
 0x281   :  { %v2564_v41 = vmul.f32 %v2562_v10, %v2562_v10 }
 0x283   :  { %v2565_v24 = vmul.f32 -0.001358992, %v2564_v41  ;;  %v2572_v39 = vmul.f32 -0.00019511016, %v2564_v41 }
 0x285   :  { %v2566_v40 = vadd.f32 0.041655596, %v2565_v24  ;;  %v2573_v30 = vadd.f32 0.008332121, %v2572_v39 }
 0x287   :  { %v2567_v56 = vmul.f32 %v2566_v40, %v2564_v41  ;;  %v2574_v23 = vmul.f32 %v2573_v30, %v2564_v41 }
 0x289   :  { %v2568_v0 = vadd.f32 -0.4999988, %v2567_v56  ;;  %v2575_v26 = vadd.f32 -0.16666654, %v2574_v23 }
 0x28b   :  { %v2569_v63 = vmul.f32 %v2568_v0, %v2564_v41  ;;  %v2576_v19 = vmul.f32 %v2575_v26, %v2564_v41 }
 0x28d   :  { %v2570_v32 = vadd.f32 1.0, %v2569_v63  ;;  %v2577_v59 = vadd.f32 1.0, %v2576_v19 }
 0x28f   :  { %v2578_v21 = vmul.f32 %v2577_v59, %v2562_v10  ;;  %v2587_v13 = vxor.u32 2147483648, %v2570_v32 }
 0x291   :  { %v2584_v15 = vxor.u32 2147483648, %v2578_v21  ;;  %v2588_v20 = vsel %vm2586_vm12, %v2587_v13, %v2578_v21 }
 0x293   :  { %v2585_v6 = vsel %vm2583_vm13, %v2570_v32, %v2584_v15 }
 0x294   :  { %v2589_v28 = vsel %vm2582_vm14, %v2585_v6, %v2588_v20 }
 0x295   :  { %v2590_v12 = vsel %vm2579_vm15, nan, %v2589_v28 }
 0x296   :  { %2606 = vst [vmem:[#allocation5 + $0x78] sm:$0xff] %v2590_v12 }
 0x297   :  { %2619 = dma.vmem_to_hbm [thread:$0]  %s2612_s11, 2048, %s2614_s14, [#allocation4], %s2748_s15, %s2748_s15, %s2749_s16  }
 0x298   :  { %2737 = dma.done.wait [#allocation4], 2048  }
 0x299   :  { %2738 = vsyncadd [#allocation4], 4294965248 }
 0x29a   :  { %2624 = vsyncpa [#allocation3], 1 }
 0x29b   :  { %2625 = vsyncpa [#allocation4], 1 }

</bundles_post_ra>
